<compile_context>
chip_gen: v6e
topology: v6e:2x2x1
jax: 0.10.0
libtpu: 0.0.40
codegen_flags: <defaults>
</compile_context>

<pallas_src>
import numpy as np

import jax
import jax.numpy as jnp
from jax.experimental import pallas as pl
from jax.experimental.pallas import tpu as pltpu


# ----------------------------------------------------------------------------
# Fused LeNet5 forward kernel (single invocation, no grid).
#
#   xcol : (r, 9)      bf16  conv1 im2col of the input, rows position-major
#   mask : (r, 9)      f32   conv2 boundary mask (1 where the tap is valid)
#   w1   : (9, 32)     bf16  conv1 weight  [tap, cout]
#   w2   : (288, 64)   bf16  conv2 weight  [tap*32 + cin, cout]
#   w3   : (3136, 200) bf16  linear1 weight permuted to (h, w, c) row order
#   w4   : (200, 10)   bf16  linear2 weight (transposed)
#   b*   : (1, C)      f32   biases
#   out  : (batch, 10) f32
# ----------------------------------------------------------------------------
def _lenet5_kernel(xcol_ref, mask_ref, w1_ref, b1_ref, w2_ref, b2_ref,
                   w3_ref, b3_ref, w4_ref, b4_ref, out_ref,
                   h1pad_ref, col2_ref, h2_ref, flat_ref):
    f32 = jnp.float32
    bf16 = jnp.bfloat16
    r = xcol_ref.shape[0]                 # batch * 49
    c1 = w1_ref.shape[1]                  # 32
    c2 = w2_ref.shape[1]                  # 64
    nb = out_ref.shape[0]                 # batch
    n_pos = r // nb                       # 49
    pad = 8 * nb                          # max |tap row offset| = 8 * batch

    # ---- conv1 + ReLU: one bf16 MXU pass (im2col done in the wrapper) ------
    h1 = jnp.dot(xcol_ref[...], w1_ref[...], preferred_element_type=f32)
    h1 = jnp.maximum(h1 + b1_ref[...], 0.0)                       # (r, c1) f32

    # ---- conv2 + ReLU: build (r, 288) im2col via shifts, one MXU pass ------
    # Stage h1 in a zero-padded scratch; each 3x3 tap is then a static
    # sublane slice (offset = (dy*7 + dx) * batch) times a boundary mask,
    # stored at a static lane offset.  No MXU passes spent on data movement.
    h1pad_ref[...] = jnp.zeros_like(h1pad_ref)
    h1pad_ref[pad:pad + r, :] = h1
    mask = mask_ref[...]                                          # (r, 9) f32
    for t in range(9):                    # stores bound live ranges; static
        dy, dx = t // 3 - 1, t % 3 - 1
        off = pad + (dy * 7 + dx) * nb
        shifted = h1pad_ref[off:off + r, :] * mask[:, t:t + 1]
        col2_ref[:, t * c1:(t + 1) * c1] = shifted
    h2 = jnp.dot(col2_ref[...].astype(bf16), w2_ref[...],         # single cast
                 preferred_element_type=f32)
    h2 = jnp.maximum(h2 + b2_ref[...], 0.0)                       # (r, c2) f32
    h2_ref[...] = h2

    # ---- flatten: (batch, 3136) in the PyTorch (C,H,W) order ---------------
    # The (C,H,W) flatten order is absorbed into w3's host-side permutation,
    # so this is just laying the 49 contiguous (batch, 64) position blocks
    # out along lanes.  Each iteration ends in a store -> no vreg pressure.
    for p in range(n_pos):
        flat_ref[:, p * c2:(p + 1) * c2] = h2_ref[p * nb:(p + 1) * nb, :]

    # ---- linear1 + ReLU: one deep-K (3136) bf16 MXU pass --------------------
    z1 = jnp.dot(flat_ref[...].astype(bf16), w3_ref[...],
                 preferred_element_type=f32)
    z1 = jnp.maximum(z1 + b3_ref[...], 0.0)                       # (nb, 200)

    # ---- linear2 -------------------------------------------------------------
    out = jnp.dot(z1.astype(bf16), w4_ref[...], preferred_element_type=f32)
    out_ref[...] = (out + b4_ref[...]).astype(out_ref.dtype)      # (nb, 10)


# ----------------------------------------------------------------------------
# Host-side one-time preparation (constants + PyTorch -> kernel weight layout).
# ----------------------------------------------------------------------------
def _build_conv_mask(batch):
    """(49*batch, 9) f32, 1 where the 3x3 tap stays inside the 7x7 image.

    Rows are position-major (row = p*batch + n), matching the activations.
    """
    m = np.zeros((49, batch, 9), np.float32)
    for p in range(49):
        y, x = divmod(p, 7)
        for t in range(9):
            dy, dx = t // 3 - 1, t % 3 - 1
            if 0 <= y + dy < 7 and 0 <= x + dx < 7:
                m[p, :, t] = 1.0
    return jnp.asarray(m.reshape(49 * batch, 9))


def prepare_params(params, batch):
    """One-time rearrangement of PyTorch-layout weights for the fused kernel."""
    bf16 = jnp.bfloat16
    w1 = params["conv1_w"].reshape(32, 9).T.astype(bf16)            # (9, 32)
    b1 = params["conv1_b"].reshape(1, 32)
    w2 = jnp.transpose(params["conv2_w"].reshape(64, 32, 9), (2, 1, 0))
    w2 = w2.reshape(9 * 32, 64).astype(bf16)                        # (288, 64)
    b2 = params["conv2_b"].reshape(1, 64)
    # linear1_w columns are (c, h, w) flattened; permute to (h, w, c) so the
    # in-kernel flatten needs no activation transpose.  Stored bf16.
    w3 = params["linear1_w"].reshape(200, 64, 49)
    w3 = jnp.transpose(w3, (2, 1, 0)).reshape(49 * 64, 200).astype(bf16)
    b3 = params["linear1_b"].reshape(1, 200)
    w4 = params["linear2_w"].T.astype(bf16)                         # (200, 10)
    b4 = params["linear2_b"].reshape(1, 10)
    return {"mask": _build_conv_mask(batch),
            "w1": w1, "b1": b1, "w2": w2, "b2": b2,
            "w3": w3, "b3": b3, "w4": w4, "b4": b4}


def _im2col_conv1(x_nchw):
    """(N,1,7,7) -> (49*N, 9) bf16 conv1 patches, rows position-major."""
    n = x_nchw.shape[0]
    xp = jnp.pad(x_nchw[:, 0], ((0, 0), (1, 1), (1, 1)))            # (N, 9, 9)
    taps = [xp[:, ki:ki + 7, kj:kj + 7]                             # (N, 7, 7)
            for ki in range(3) for kj in range(3)]
    cols = jnp.stack(taps, axis=-1)                                 # (N,7,7,9)
    cols = cols.reshape(n, 49, 9).transpose(1, 0, 2)                # (49, N, 9)
    return cols.reshape(49 * n, 9).astype(jnp.bfloat16)


# ----------------------------------------------------------------------------
# Forward pass: one fused pallas_call, everything whole-array in VMEM.
# ----------------------------------------------------------------------------
def _lenet5_pallas(xcol, mask, prep, batch):
    r = xcol.shape[0]
    c1 = prep["w1"].shape[1]
    c2 = prep["w2"].shape[1]
    n_out = prep["w4"].shape[1]
    vmem = pl.BlockSpec(memory_space=pltpu.MemorySpace.VMEM)
    return pl.pallas_call(
        _lenet5_kernel,
        out_shape=jax.ShapeDtypeStruct((batch, n_out), jnp.float32),
        in_specs=[vmem] * 10,
        out_specs=vmem,
        scratch_shapes=[
            pltpu.VMEM((r + 16 * batch, c1), jnp.float32),          # padded h1
            pltpu.VMEM((r, 9 * c1), jnp.float32),                   # conv2 cols
            pltpu.VMEM((r, c2), jnp.float32),                       # h2
            pltpu.VMEM((batch, (r // batch) * c2), jnp.float32),    # flat acts
        ],
        cost_estimate=pl.CostEstimate(
            flops=6_500_000, transcendentals=0, bytes_accessed=1_500_000),
    )(xcol, mask, prep["w1"], prep["b1"], prep["w2"], prep["b2"],
      prep["w3"], prep["b3"], prep["w4"], prep["b4"])


@jax.jit
def lenet5_forward(x_nchw, prep):
    assert x_nchw.shape[1] == 1, "LeNet5 spec has a single input channel"
    n = x_nchw.shape[0]
    assert prep["mask"].shape[0] == 49 * n, "prep built for a different batch"
    xcol = _im2col_conv1(x_nchw)        # input layout plumbing, outside kernel
    return _lenet5_pallas(xcol, prep["mask"], prep, n)


# ----------------------------------------------------------------------------
# Parameter init (PyTorch-layout shapes, matching the nn.Module).
# ----------------------------------------------------------------------------
def init_params(key):
    ks = jax.random.split(key, 8)

    def w(k, shape, fan_in):
        return (jax.random.normal(k, shape, jnp.float32)
                / jnp.sqrt(fan_in)).astype(jnp.float32)

    return {
        "conv1_w": w(ks[0], (32, 1, 3, 3), 1 * 9),
        "conv1_b": w(ks[1], (32,), 1 * 9),
        "conv2_w": w(ks[2], (64, 32, 3, 3), 32 * 9),
        "conv2_b": w(ks[3], (64,), 32 * 9),
        "linear1_w": w(ks[4], (200, 7 * 7 * 64), 7 * 7 * 64),
        "linear1_b": w(ks[5], (200,), 7 * 7 * 64),
        "linear2_w": w(ks[6], (10, 200), 200),
        "linear2_b": w(ks[7], (10,), 200),
    }


if __name__ == "__main__":
    key = jax.random.PRNGKey(0)
    k_param, k_x = jax.random.split(key)
    params = init_params(k_param)

    # linear1 (7*7*64 inputs) implies 7x7 spatial, 1 channel.
    batch = 2
    x = jax.random.normal(k_x, (batch, 1, 7, 7), jnp.float32)   # NCHW

    prep = prepare_params(params, batch)        # one-time weight/constant prep
    out = lenet5_forward(x, prep)
    out = jax.block_until_ready(out)
    assert out.shape == (batch, 10), out.shape
    print("KERNEL_OK")
</pallas_src>

<mosaic_0001>
module attributes {stable_mosaic.version = 11 : i64} {
  func.func @_lenet5_kernel(%arg0: memref<98x9xbf16, #tpu.memory_space<vmem>>, %arg1: memref<98x9xf32, #tpu.memory_space<vmem>>, %arg2: memref<9x32xbf16, #tpu.memory_space<vmem>>, %arg3: memref<1x32xf32, #tpu.memory_space<vmem>>, %arg4: memref<288x64xbf16, #tpu.memory_space<vmem>>, %arg5: memref<1x64xf32, #tpu.memory_space<vmem>>, %arg6: memref<3136x200xbf16, #tpu.memory_space<vmem>>, %arg7: memref<1x200xf32, #tpu.memory_space<vmem>>, %arg8: memref<200x10xbf16, #tpu.memory_space<vmem>>, %arg9: memref<1x10xf32, #tpu.memory_space<vmem>>, %arg10: memref<2x10xf32, #tpu.memory_space<vmem>>, %arg11: memref<130x32xf32, #tpu.memory_space<vmem>>, %arg12: memref<98x288xf32, #tpu.memory_space<vmem>>, %arg13: memref<98x64xf32, #tpu.memory_space<vmem>>, %arg14: memref<2x3136xf32, #tpu.memory_space<vmem>>) attributes {dimension_semantics = [], scalar_prefetch = 0 : i64, scratch_operands = 4 : i64, tpu.core_type = #tpu.core_type<tc>} {
    %c0 = arith.constant 0 : index
    %c0_0 = arith.constant 0 : index
    %0 = vector.load %arg0[%c0, %c0_0] : memref<98x9xbf16, #tpu.memory_space<vmem>>, vector<98x9xbf16>
    %c0_1 = arith.constant 0 : index
    %c0_2 = arith.constant 0 : index
    %1 = vector.load %arg2[%c0_1, %c0_2] : memref<9x32xbf16, #tpu.memory_space<vmem>>, vector<9x32xbf16>
    %cst = arith.constant dense<0.000000e+00> : vector<98x32xf32>
    %2 = tpu.matmul %0, %1, %cst {dimension_numbers = #tpu.dot_dimension_numbers<[1], [0], [0], [1], [0, 0, 1, 1], [], []>} : vector<98x9xbf16>, vector<9x32xbf16>, vector<98x32xf32> -> vector<98x32xf32>
    %c0_3 = arith.constant 0 : index
    %c0_4 = arith.constant 0 : index
    %3 = vector.load %arg3[%c0_3, %c0_4] : memref<1x32xf32, #tpu.memory_space<vmem>>, vector<1x32xf32>
    %4 = vector.broadcast %3 : vector<1x32xf32> to vector<98x32xf32>
    %5 = arith.addf %2, %4 : vector<98x32xf32>
    %cst_5 = arith.constant 0.000000e+00 : f32
    %6 = vector.broadcast %cst_5 : f32 to vector<98x32xf32>
    %7 = arith.maximumf %5, %6 : vector<98x32xf32>
    %cst_6 = arith.constant 0.000000e+00 : f32
    %8 = vector.broadcast %cst_6 : f32 to vector<130x32xf32>
    %c0_7 = arith.constant 0 : index
    %c0_8 = arith.constant 0 : index
    %9 = vector.load %arg11[%c0_7, %c0_8] : memref<130x32xf32, #tpu.memory_space<vmem>>, vector<130x32xf32>
    tpu.vector_store %arg11[%c0_7, %c0_8], %8 {strides = array<i32>} : memref<130x32xf32, #tpu.memory_space<vmem>>, vector<130x32xf32>,
    %c16 = arith.constant 16 : index
    %c0_9 = arith.constant 0 : index
    %10 = vector.load %arg11[%c16, %c0_9] : memref<130x32xf32, #tpu.memory_space<vmem>>, vector<98x32xf32>
    tpu.vector_store %arg11[%c16, %c0_9], %7 {strides = array<i32>} : memref<130x32xf32, #tpu.memory_space<vmem>>, vector<98x32xf32>,
    %c0_10 = arith.constant 0 : index
    %c0_11 = arith.constant 0 : index
    %11 = vector.load %arg1[%c0_10, %c0_11] : memref<98x9xf32, #tpu.memory_space<vmem>>, vector<98x9xf32>
    %c0_12 = arith.constant 0 : index
    %c0_13 = arith.constant 0 : index
    %12 = vector.load %arg11[%c0_12, %c0_13] : memref<130x32xf32, #tpu.memory_space<vmem>>, vector<98x32xf32>
    %13 = vector.extract_strided_slice %11 {offsets = [0, 0], sizes = [98, 1], strides = [1, 1]} : vector<98x9xf32> to vector<98x1xf32>
    %14 = vector.broadcast %13 : vector<98x1xf32> to vector<98x32xf32>
    %15 = arith.mulf %12, %14 : vector<98x32xf32>
    %c0_14 = arith.constant 0 : index
    %c0_15 = arith.constant 0 : index
    %16 = vector.load %arg12[%c0_14, %c0_15] : memref<98x288xf32, #tpu.memory_space<vmem>>, vector<98x32xf32>
    tpu.vector_store %arg12[%c0_14, %c0_15], %15 {strides = array<i32>} : memref<98x288xf32, #tpu.memory_space<vmem>>, vector<98x32xf32>,
    %c2 = arith.constant 2 : index
    %c0_16 = arith.constant 0 : index
    %17 = vector.load %arg11[%c2, %c0_16] : memref<130x32xf32, #tpu.memory_space<vmem>>, vector<98x32xf32>
    %18 = vector.extract_strided_slice %11 {offsets = [0, 1], sizes = [98, 1], strides = [1, 1]} : vector<98x9xf32> to vector<98x1xf32>
    %19 = vector.broadcast %18 : vector<98x1xf32> to vector<98x32xf32>
    %20 = arith.mulf %17, %19 : vector<98x32xf32>
    %c0_17 = arith.constant 0 : index
    %c32 = arith.constant 32 : index
    %21 = vector.load %arg12[%c0_17, %c32] : memref<98x288xf32, #tpu.memory_space<vmem>>, vector<98x32xf32>
    tpu.vector_store %arg12[%c0_17, %c32], %20 {strides = array<i32>} : memref<98x288xf32, #tpu.memory_space<vmem>>, vector<98x32xf32>,
    %c4 = arith.constant 4 : index
    %c0_18 = arith.constant 0 : index
    %22 = vector.load %arg11[%c4, %c0_18] : memref<130x32xf32, #tpu.memory_space<vmem>>, vector<98x32xf32>
    %23 = vector.extract_strided_slice %11 {offsets = [0, 2], sizes = [98, 1], strides = [1, 1]} : vector<98x9xf32> to vector<98x1xf32>
    %24 = vector.broadcast %23 : vector<98x1xf32> to vector<98x32xf32>
    %25 = arith.mulf %22, %24 : vector<98x32xf32>
    %c0_19 = arith.constant 0 : index
    %c64 = arith.constant 64 : index
    %26 = vector.load %arg12[%c0_19, %c64] : memref<98x288xf32, #tpu.memory_space<vmem>>, vector<98x32xf32>
    tpu.vector_store %arg12[%c0_19, %c64], %25 {strides = array<i32>} : memref<98x288xf32, #tpu.memory_space<vmem>>, vector<98x32xf32>,
    %c14 = arith.constant 14 : index
    %c0_20 = arith.constant 0 : index
    %27 = vector.load %arg11[%c14, %c0_20] : memref<130x32xf32, #tpu.memory_space<vmem>>, vector<98x32xf32>
    %28 = vector.extract_strided_slice %11 {offsets = [0, 3], sizes = [98, 1], strides = [1, 1]} : vector<98x9xf32> to vector<98x1xf32>
    %29 = vector.broadcast %28 : vector<98x1xf32> to vector<98x32xf32>
    %30 = arith.mulf %27, %29 : vector<98x32xf32>
    %c0_21 = arith.constant 0 : index
    %c96 = arith.constant 96 : index
    %31 = vector.load %arg12[%c0_21, %c96] : memref<98x288xf32, #tpu.memory_space<vmem>>, vector<98x32xf32>
    tpu.vector_store %arg12[%c0_21, %c96], %30 {strides = array<i32>} : memref<98x288xf32, #tpu.memory_space<vmem>>, vector<98x32xf32>,
    %c16_22 = arith.constant 16 : index
    %c0_23 = arith.constant 0 : index
    %32 = vector.load %arg11[%c16_22, %c0_23] : memref<130x32xf32, #tpu.memory_space<vmem>>, vector<98x32xf32>
    %33 = vector.extract_strided_slice %11 {offsets = [0, 4], sizes = [98, 1], strides = [1, 1]} : vector<98x9xf32> to vector<98x1xf32>
    %34 = vector.broadcast %33 : vector<98x1xf32> to vector<98x32xf32>
    %35 = arith.mulf %32, %34 : vector<98x32xf32>
    %c0_24 = arith.constant 0 : index
    %c128 = arith.constant 128 : index
    %36 = vector.load %arg12[%c0_24, %c128] : memref<98x288xf32, #tpu.memory_space<vmem>>, vector<98x32xf32>
    tpu.vector_store %arg12[%c0_24, %c128], %35 {strides = array<i32>} : memref<98x288xf32, #tpu.memory_space<vmem>>, vector<98x32xf32>,
    %c18 = arith.constant 18 : index
    %c0_25 = arith.constant 0 : index
    %37 = vector.load %arg11[%c18, %c0_25] : memref<130x32xf32, #tpu.memory_space<vmem>>, vector<98x32xf32>
    %38 = vector.extract_strided_slice %11 {offsets = [0, 5], sizes = [98, 1], strides = [1, 1]} : vector<98x9xf32> to vector<98x1xf32>
    %39 = vector.broadcast %38 : vector<98x1xf32> to vector<98x32xf32>
    %40 = arith.mulf %37, %39 : vector<98x32xf32>
    %c0_26 = arith.constant 0 : index
    %c160 = arith.constant 160 : index
    %41 = vector.load %arg12[%c0_26, %c160] : memref<98x288xf32, #tpu.memory_space<vmem>>, vector<98x32xf32>
    tpu.vector_store %arg12[%c0_26, %c160], %40 {strides = array<i32>} : memref<98x288xf32, #tpu.memory_space<vmem>>, vector<98x32xf32>,
    %c28 = arith.constant 28 : index
    %c0_27 = arith.constant 0 : index
    %42 = vector.load %arg11[%c28, %c0_27] : memref<130x32xf32, #tpu.memory_space<vmem>>, vector<98x32xf32>
    %43 = vector.extract_strided_slice %11 {offsets = [0, 6], sizes = [98, 1], strides = [1, 1]} : vector<98x9xf32> to vector<98x1xf32>
    %44 = vector.broadcast %43 : vector<98x1xf32> to vector<98x32xf32>
    %45 = arith.mulf %42, %44 : vector<98x32xf32>
    %c0_28 = arith.constant 0 : index
    %c192 = arith.constant 192 : index
    %46 = vector.load %arg12[%c0_28, %c192] : memref<98x288xf32, #tpu.memory_space<vmem>>, vector<98x32xf32>
    tpu.vector_store %arg12[%c0_28, %c192], %45 {strides = array<i32>} : memref<98x288xf32, #tpu.memory_space<vmem>>, vector<98x32xf32>,
    %c30 = arith.constant 30 : index
    %c0_29 = arith.constant 0 : index
    %47 = vector.load %arg11[%c30, %c0_29] : memref<130x32xf32, #tpu.memory_space<vmem>>, vector<98x32xf32>
    %48 = vector.extract_strided_slice %11 {offsets = [0, 7], sizes = [98, 1], strides = [1, 1]} : vector<98x9xf32> to vector<98x1xf32>
    %49 = vector.broadcast %48 : vector<98x1xf32> to vector<98x32xf32>
    %50 = arith.mulf %47, %49 : vector<98x32xf32>
    %c0_30 = arith.constant 0 : index
    %c224 = arith.constant 224 : index
    %51 = vector.load %arg12[%c0_30, %c224] : memref<98x288xf32, #tpu.memory_space<vmem>>, vector<98x32xf32>
    tpu.vector_store %arg12[%c0_30, %c224], %50 {strides = array<i32>} : memref<98x288xf32, #tpu.memory_space<vmem>>, vector<98x32xf32>,
    %c32_31 = arith.constant 32 : index
    %c0_32 = arith.constant 0 : index
    %52 = vector.load %arg11[%c32_31, %c0_32] : memref<130x32xf32, #tpu.memory_space<vmem>>, vector<98x32xf32>
    %53 = vector.extract_strided_slice %11 {offsets = [0, 8], sizes = [98, 1], strides = [1, 1]} : vector<98x9xf32> to vector<98x1xf32>
    %54 = vector.broadcast %53 : vector<98x1xf32> to vector<98x32xf32>
    %55 = arith.mulf %52, %54 : vector<98x32xf32>
    %c0_33 = arith.constant 0 : index
    %c256 = arith.constant 256 : index
    %56 = vector.load %arg12[%c0_33, %c256] : memref<98x288xf32, #tpu.memory_space<vmem>>, vector<98x32xf32>
    tpu.vector_store %arg12[%c0_33, %c256], %55 {strides = array<i32>} : memref<98x288xf32, #tpu.memory_space<vmem>>, vector<98x32xf32>,
    %c0_34 = arith.constant 0 : index
    %c0_35 = arith.constant 0 : index
    %57 = vector.load %arg12[%c0_34, %c0_35] : memref<98x288xf32, #tpu.memory_space<vmem>>, vector<98x288xf32>
    %58 = arith.truncf %57 : vector<98x288xf32> to vector<98x288xbf16>
    %c0_36 = arith.constant 0 : index
    %c0_37 = arith.constant 0 : index
    %59 = vector.load %arg4[%c0_36, %c0_37] : memref<288x64xbf16, #tpu.memory_space<vmem>>, vector<288x64xbf16>
    %cst_38 = arith.constant dense<0.000000e+00> : vector<98x64xf32>
    %60 = tpu.matmul %58, %59, %cst_38 {dimension_numbers = #tpu.dot_dimension_numbers<[1], [0], [0], [1], [0, 0, 1, 1], [], []>} : vector<98x288xbf16>, vector<288x64xbf16>, vector<98x64xf32> -> vector<98x64xf32>
    %c0_39 = arith.constant 0 : index
    %c0_40 = arith.constant 0 : index
    %61 = vector.load %arg5[%c0_39, %c0_40] : memref<1x64xf32, #tpu.memory_space<vmem>>, vector<1x64xf32>
    %62 = vector.broadcast %61 : vector<1x64xf32> to vector<98x64xf32>
    %63 = arith.addf %60, %62 : vector<98x64xf32>
    %cst_41 = arith.constant 0.000000e+00 : f32
    %64 = vector.broadcast %cst_41 : f32 to vector<98x64xf32>
    %65 = arith.maximumf %63, %64 : vector<98x64xf32>
    %c0_42 = arith.constant 0 : index
    %c0_43 = arith.constant 0 : index
    %66 = vector.load %arg13[%c0_42, %c0_43] : memref<98x64xf32, #tpu.memory_space<vmem>>, vector<98x64xf32>
    tpu.vector_store %arg13[%c0_42, %c0_43], %65 {strides = array<i32>} : memref<98x64xf32, #tpu.memory_space<vmem>>, vector<98x64xf32>,
    %c0_44 = arith.constant 0 : index
    %c0_45 = arith.constant 0 : index
    %67 = vector.load %arg13[%c0_44, %c0_45] : memref<98x64xf32, #tpu.memory_space<vmem>>, vector<2x64xf32>
    %c0_46 = arith.constant 0 : index
    %c0_47 = arith.constant 0 : index
    %68 = vector.load %arg14[%c0_46, %c0_47] : memref<2x3136xf32, #tpu.memory_space<vmem>>, vector<2x64xf32>
    tpu.vector_store %arg14[%c0_46, %c0_47], %67 {strides = array<i32>} : memref<2x3136xf32, #tpu.memory_space<vmem>>, vector<2x64xf32>,
    %c2_48 = arith.constant 2 : index
    %c0_49 = arith.constant 0 : index
    %69 = vector.load %arg13[%c2_48, %c0_49] : memref<98x64xf32, #tpu.memory_space<vmem>>, vector<2x64xf32>
    %c0_50 = arith.constant 0 : index
    %c64_51 = arith.constant 64 : index
    %70 = vector.load %arg14[%c0_50, %c64_51] : memref<2x3136xf32, #tpu.memory_space<vmem>>, vector<2x64xf32>
    tpu.vector_store %arg14[%c0_50, %c64_51], %69 {strides = array<i32>} : memref<2x3136xf32, #tpu.memory_space<vmem>>, vector<2x64xf32>,
    %c4_52 = arith.constant 4 : index
    %c0_53 = arith.constant 0 : index
    %71 = vector.load %arg13[%c4_52, %c0_53] : memref<98x64xf32, #tpu.memory_space<vmem>>, vector<2x64xf32>
    %c0_54 = arith.constant 0 : index
    %c128_55 = arith.constant 128 : index
    %72 = vector.load %arg14[%c0_54, %c128_55] : memref<2x3136xf32, #tpu.memory_space<vmem>>, vector<2x64xf32>
    tpu.vector_store %arg14[%c0_54, %c128_55], %71 {strides = array<i32>} : memref<2x3136xf32, #tpu.memory_space<vmem>>, vector<2x64xf32>,
    %c6 = arith.constant 6 : index
    %c0_56 = arith.constant 0 : index
    %73 = vector.load %arg13[%c6, %c0_56] : memref<98x64xf32, #tpu.memory_space<vmem>>, vector<2x64xf32>
    %c0_57 = arith.constant 0 : index
    %c192_58 = arith.constant 192 : index
    %74 = vector.load %arg14[%c0_57, %c192_58] : memref<2x3136xf32, #tpu.memory_space<vmem>>, vector<2x64xf32>
    tpu.vector_store %arg14[%c0_57, %c192_58], %73 {strides = array<i32>} : memref<2x3136xf32, #tpu.memory_space<vmem>>, vector<2x64xf32>,
    %c8 = arith.constant 8 : index
    %c0_59 = arith.constant 0 : index
    %75 = vector.load %arg13[%c8, %c0_59] : memref<98x64xf32, #tpu.memory_space<vmem>>, vector<2x64xf32>
    %c0_60 = arith.constant 0 : index
    %c256_61 = arith.constant 256 : index
    %76 = vector.load %arg14[%c0_60, %c256_61] : memref<2x3136xf32, #tpu.memory_space<vmem>>, vector<2x64xf32>
    tpu.vector_store %arg14[%c0_60, %c256_61], %75 {strides = array<i32>} : memref<2x3136xf32, #tpu.memory_space<vmem>>, vector<2x64xf32>,
    %c10 = arith.constant 10 : index
    %c0_62 = arith.constant 0 : index
    %77 = vector.load %arg13[%c10, %c0_62] : memref<98x64xf32, #tpu.memory_space<vmem>>, vector<2x64xf32>
    %c0_63 = arith.constant 0 : index
    %c320 = arith.constant 320 : index
    %78 = vector.load %arg14[%c0_63, %c320] : memref<2x3136xf32, #tpu.memory_space<vmem>>, vector<2x64xf32>
    tpu.vector_store %arg14[%c0_63, %c320], %77 {strides = array<i32>} : memref<2x3136xf32, #tpu.memory_space<vmem>>, vector<2x64xf32>,
    %c12 = arith.constant 12 : index
    %c0_64 = arith.constant 0 : index
    %79 = vector.load %arg13[%c12, %c0_64] : memref<98x64xf32, #tpu.memory_space<vmem>>, vector<2x64xf32>
    %c0_65 = arith.constant 0 : index
    %c384 = arith.constant 384 : index
    %80 = vector.load %arg14[%c0_65, %c384] : memref<2x3136xf32, #tpu.memory_space<vmem>>, vector<2x64xf32>
    tpu.vector_store %arg14[%c0_65, %c384], %79 {strides = array<i32>} : memref<2x3136xf32, #tpu.memory_space<vmem>>, vector<2x64xf32>,
    %c14_66 = arith.constant 14 : index
    %c0_67 = arith.constant 0 : index
    %81 = vector.load %arg13[%c14_66, %c0_67] : memref<98x64xf32, #tpu.memory_space<vmem>>, vector<2x64xf32>
    %c0_68 = arith.constant 0 : index
    %c448 = arith.constant 448 : index
    %82 = vector.load %arg14[%c0_68, %c448] : memref<2x3136xf32, #tpu.memory_space<vmem>>, vector<2x64xf32>
    tpu.vector_store %arg14[%c0_68, %c448], %81 {strides = array<i32>} : memref<2x3136xf32, #tpu.memory_space<vmem>>, vector<2x64xf32>,
    %c16_69 = arith.constant 16 : index
    %c0_70 = arith.constant 0 : index
    %83 = vector.load %arg13[%c16_69, %c0_70] : memref<98x64xf32, #tpu.memory_space<vmem>>, vector<2x64xf32>
    %c0_71 = arith.constant 0 : index
    %c512 = arith.constant 512 : index
    %84 = vector.load %arg14[%c0_71, %c512] : memref<2x3136xf32, #tpu.memory_space<vmem>>, vector<2x64xf32>
    tpu.vector_store %arg14[%c0_71, %c512], %83 {strides = array<i32>} : memref<2x3136xf32, #tpu.memory_space<vmem>>, vector<2x64xf32>,
    %c18_72 = arith.constant 18 : index
    %c0_73 = arith.constant 0 : index
    %85 = vector.load %arg13[%c18_72, %c0_73] : memref<98x64xf32, #tpu.memory_space<vmem>>, vector<2x64xf32>
    %c0_74 = arith.constant 0 : index
    %c576 = arith.constant 576 : index
    %86 = vector.load %arg14[%c0_74, %c576] : memref<2x3136xf32, #tpu.memory_space<vmem>>, vector<2x64xf32>
    tpu.vector_store %arg14[%c0_74, %c576], %85 {strides = array<i32>} : memref<2x3136xf32, #tpu.memory_space<vmem>>, vector<2x64xf32>,
    %c20 = arith.constant 20 : index
    %c0_75 = arith.constant 0 : index
    %87 = vector.load %arg13[%c20, %c0_75] : memref<98x64xf32, #tpu.memory_space<vmem>>, vector<2x64xf32>
    %c0_76 = arith.constant 0 : index
    %c640 = arith.constant 640 : index
    %88 = vector.load %arg14[%c0_76, %c640] : memref<2x3136xf32, #tpu.memory_space<vmem>>, vector<2x64xf32>
    tpu.vector_store %arg14[%c0_76, %c640], %87 {strides = array<i32>} : memref<2x3136xf32, #tpu.memory_space<vmem>>, vector<2x64xf32>,
    %c22 = arith.constant 22 : index
    %c0_77 = arith.constant 0 : index
    %89 = vector.load %arg13[%c22, %c0_77] : memref<98x64xf32, #tpu.memory_space<vmem>>, vector<2x64xf32>
    %c0_78 = arith.constant 0 : index
    %c704 = arith.constant 704 : index
    %90 = vector.load %arg14[%c0_78, %c704] : memref<2x3136xf32, #tpu.memory_space<vmem>>, vector<2x64xf32>
    tpu.vector_store %arg14[%c0_78, %c704], %89 {strides = array<i32>} : memref<2x3136xf32, #tpu.memory_space<vmem>>, vector<2x64xf32>,
    %c24 = arith.constant 24 : index
    %c0_79 = arith.constant 0 : index
    %91 = vector.load %arg13[%c24, %c0_79] : memref<98x64xf32, #tpu.memory_space<vmem>>, vector<2x64xf32>
    %c0_80 = arith.constant 0 : index
    %c768 = arith.constant 768 : index
    %92 = vector.load %arg14[%c0_80, %c768] : memref<2x3136xf32, #tpu.memory_space<vmem>>, vector<2x64xf32>
    tpu.vector_store %arg14[%c0_80, %c768], %91 {strides = array<i32>} : memref<2x3136xf32, #tpu.memory_space<vmem>>, vector<2x64xf32>,
    %c26 = arith.constant 26 : index
    %c0_81 = arith.constant 0 : index
    %93 = vector.load %arg13[%c26, %c0_81] : memref<98x64xf32, #tpu.memory_space<vmem>>, vector<2x64xf32>
    %c0_82 = arith.constant 0 : index
    %c832 = arith.constant 832 : index
    %94 = vector.load %arg14[%c0_82, %c832] : memref<2x3136xf32, #tpu.memory_space<vmem>>, vector<2x64xf32>
    tpu.vector_store %arg14[%c0_82, %c832], %93 {strides = array<i32>} : memref<2x3136xf32, #tpu.memory_space<vmem>>, vector<2x64xf32>,
    %c28_83 = arith.constant 28 : index
    %c0_84 = arith.constant 0 : index
    %95 = vector.load %arg13[%c28_83, %c0_84] : memref<98x64xf32, #tpu.memory_space<vmem>>, vector<2x64xf32>
    %c0_85 = arith.constant 0 : index
    %c896 = arith.constant 896 : index
    %96 = vector.load %arg14[%c0_85, %c896] : memref<2x3136xf32, #tpu.memory_space<vmem>>, vector<2x64xf32>
    tpu.vector_store %arg14[%c0_85, %c896], %95 {strides = array<i32>} : memref<2x3136xf32, #tpu.memory_space<vmem>>, vector<2x64xf32>,
    %c30_86 = arith.constant 30 : index
    %c0_87 = arith.constant 0 : index
    %97 = vector.load %arg13[%c30_86, %c0_87] : memref<98x64xf32, #tpu.memory_space<vmem>>, vector<2x64xf32>
    %c0_88 = arith.constant 0 : index
    %c960 = arith.constant 960 : index
    %98 = vector.load %arg14[%c0_88, %c960] : memref<2x3136xf32, #tpu.memory_space<vmem>>, vector<2x64xf32>
    tpu.vector_store %arg14[%c0_88, %c960], %97 {strides = array<i32>} : memref<2x3136xf32, #tpu.memory_space<vmem>>, vector<2x64xf32>,
    %c32_89 = arith.constant 32 : index
    %c0_90 = arith.constant 0 : index
    %99 = vector.load %arg13[%c32_89, %c0_90] : memref<98x64xf32, #tpu.memory_space<vmem>>, vector<2x64xf32>
    %c0_91 = arith.constant 0 : index
    %c1024 = arith.constant 1024 : index
    %100 = vector.load %arg14[%c0_91, %c1024] : memref<2x3136xf32, #tpu.memory_space<vmem>>, vector<2x64xf32>
    tpu.vector_store %arg14[%c0_91, %c1024], %99 {strides = array<i32>} : memref<2x3136xf32, #tpu.memory_space<vmem>>, vector<2x64xf32>,
    %c34 = arith.constant 34 : index
    %c0_92 = arith.constant 0 : index
    %101 = vector.load %arg13[%c34, %c0_92] : memref<98x64xf32, #tpu.memory_space<vmem>>, vector<2x64xf32>
    %c0_93 = arith.constant 0 : index
    %c1088 = arith.constant 1088 : index
    %102 = vector.load %arg14[%c0_93, %c1088] : memref<2x3136xf32, #tpu.memory_space<vmem>>, vector<2x64xf32>
    tpu.vector_store %arg14[%c0_93, %c1088], %101 {strides = array<i32>} : memref<2x3136xf32, #tpu.memory_space<vmem>>, vector<2x64xf32>,
    %c36 = arith.constant 36 : index
    %c0_94 = arith.constant 0 : index
    %103 = vector.load %arg13[%c36, %c0_94] : memref<98x64xf32, #tpu.memory_space<vmem>>, vector<2x64xf32>
    %c0_95 = arith.constant 0 : index
    %c1152 = arith.constant 1152 : index
    %104 = vector.load %arg14[%c0_95, %c1152] : memref<2x3136xf32, #tpu.memory_space<vmem>>, vector<2x64xf32>
    tpu.vector_store %arg14[%c0_95, %c1152], %103 {strides = array<i32>} : memref<2x3136xf32, #tpu.memory_space<vmem>>, vector<2x64xf32>,
    %c38 = arith.constant 38 : index
    %c0_96 = arith.constant 0 : index
    %105 = vector.load %arg13[%c38, %c0_96] : memref<98x64xf32, #tpu.memory_space<vmem>>, vector<2x64xf32>
    %c0_97 = arith.constant 0 : index
    %c1216 = arith.constant 1216 : index
    %106 = vector.load %arg14[%c0_97, %c1216] : memref<2x3136xf32, #tpu.memory_space<vmem>>, vector<2x64xf32>
    tpu.vector_store %arg14[%c0_97, %c1216], %105 {strides = array<i32>} : memref<2x3136xf32, #tpu.memory_space<vmem>>, vector<2x64xf32>,
    %c40 = arith.constant 40 : index
    %c0_98 = arith.constant 0 : index
    %107 = vector.load %arg13[%c40, %c0_98] : memref<98x64xf32, #tpu.memory_space<vmem>>, vector<2x64xf32>
    %c0_99 = arith.constant 0 : index
    %c1280 = arith.constant 1280 : index
    %108 = vector.load %arg14[%c0_99, %c1280] : memref<2x3136xf32, #tpu.memory_space<vmem>>, vector<2x64xf32>
    tpu.vector_store %arg14[%c0_99, %c1280], %107 {strides = array<i32>} : memref<2x3136xf32, #tpu.memory_space<vmem>>, vector<2x64xf32>,
    %c42 = arith.constant 42 : index
    %c0_100 = arith.constant 0 : index
    %109 = vector.load %arg13[%c42, %c0_100] : memref<98x64xf32, #tpu.memory_space<vmem>>, vector<2x64xf32>
    %c0_101 = arith.constant 0 : index
    %c1344 = arith.constant 1344 : index
    %110 = vector.load %arg14[%c0_101, %c1344] : memref<2x3136xf32, #tpu.memory_space<vmem>>, vector<2x64xf32>
    tpu.vector_store %arg14[%c0_101, %c1344], %109 {strides = array<i32>} : memref<2x3136xf32, #tpu.memory_space<vmem>>, vector<2x64xf32>,
    %c44 = arith.constant 44 : index
    %c0_102 = arith.constant 0 : index
    %111 = vector.load %arg13[%c44, %c0_102] : memref<98x64xf32, #tpu.memory_space<vmem>>, vector<2x64xf32>
    %c0_103 = arith.constant 0 : index
    %c1408 = arith.constant 1408 : index
    %112 = vector.load %arg14[%c0_103, %c1408] : memref<2x3136xf32, #tpu.memory_space<vmem>>, vector<2x64xf32>
    tpu.vector_store %arg14[%c0_103, %c1408], %111 {strides = array<i32>} : memref<2x3136xf32, #tpu.memory_space<vmem>>, vector<2x64xf32>,
    %c46 = arith.constant 46 : index
    %c0_104 = arith.constant 0 : index
    %113 = vector.load %arg13[%c46, %c0_104] : memref<98x64xf32, #tpu.memory_space<vmem>>, vector<2x64xf32>
    %c0_105 = arith.constant 0 : index
    %c1472 = arith.constant 1472 : index
    %114 = vector.load %arg14[%c0_105, %c1472] : memref<2x3136xf32, #tpu.memory_space<vmem>>, vector<2x64xf32>
    tpu.vector_store %arg14[%c0_105, %c1472], %113 {strides = array<i32>} : memref<2x3136xf32, #tpu.memory_space<vmem>>, vector<2x64xf32>,
    %c48 = arith.constant 48 : index
    %c0_106 = arith.constant 0 : index
    %115 = vector.load %arg13[%c48, %c0_106] : memref<98x64xf32, #tpu.memory_space<vmem>>, vector<2x64xf32>
    %c0_107 = arith.constant 0 : index
    %c1536 = arith.constant 1536 : index
    %116 = vector.load %arg14[%c0_107, %c1536] : memref<2x3136xf32, #tpu.memory_space<vmem>>, vector<2x64xf32>
    tpu.vector_store %arg14[%c0_107, %c1536], %115 {strides = array<i32>} : memref<2x3136xf32, #tpu.memory_space<vmem>>, vector<2x64xf32>,
    %c50 = arith.constant 50 : index
    %c0_108 = arith.constant 0 : index
    %117 = vector.load %arg13[%c50, %c0_108] : memref<98x64xf32, #tpu.memory_space<vmem>>, vector<2x64xf32>
    %c0_109 = arith.constant 0 : index
    %c1600 = arith.constant 1600 : index
    %118 = vector.load %arg14[%c0_109, %c1600] : memref<2x3136xf32, #tpu.memory_space<vmem>>, vector<2x64xf32>
    tpu.vector_store %arg14[%c0_109, %c1600], %117 {strides = array<i32>} : memref<2x3136xf32, #tpu.memory_space<vmem>>, vector<2x64xf32>,
    %c52 = arith.constant 52 : index
    %c0_110 = arith.constant 0 : index
    %119 = vector.load %arg13[%c52, %c0_110] : memref<98x64xf32, #tpu.memory_space<vmem>>, vector<2x64xf32>
    %c0_111 = arith.constant 0 : index
    %c1664 = arith.constant 1664 : index
    %120 = vector.load %arg14[%c0_111, %c1664] : memref<2x3136xf32, #tpu.memory_space<vmem>>, vector<2x64xf32>
    tpu.vector_store %arg14[%c0_111, %c1664], %119 {strides = array<i32>} : memref<2x3136xf32, #tpu.memory_space<vmem>>, vector<2x64xf32>,
    %c54 = arith.constant 54 : index
    %c0_112 = arith.constant 0 : index
    %121 = vector.load %arg13[%c54, %c0_112] : memref<98x64xf32, #tpu.memory_space<vmem>>, vector<2x64xf32>
    %c0_113 = arith.constant 0 : index
    %c1728 = arith.constant 1728 : index
    %122 = vector.load %arg14[%c0_113, %c1728] : memref<2x3136xf32, #tpu.memory_space<vmem>>, vector<2x64xf32>
    tpu.vector_store %arg14[%c0_113, %c1728], %121 {strides = array<i32>} : memref<2x3136xf32, #tpu.memory_space<vmem>>, vector<2x64xf32>,
    %c56 = arith.constant 56 : index
    %c0_114 = arith.constant 0 : index
    %123 = vector.load %arg13[%c56, %c0_114] : memref<98x64xf32, #tpu.memory_space<vmem>>, vector<2x64xf32>
    %c0_115 = arith.constant 0 : index
    %c1792 = arith.constant 1792 : index
    %124 = vector.load %arg14[%c0_115, %c1792] : memref<2x3136xf32, #tpu.memory_space<vmem>>, vector<2x64xf32>
    tpu.vector_store %arg14[%c0_115, %c1792], %123 {strides = array<i32>} : memref<2x3136xf32, #tpu.memory_space<vmem>>, vector<2x64xf32>,
    %c58 = arith.constant 58 : index
    %c0_116 = arith.constant 0 : index
    %125 = vector.load %arg13[%c58, %c0_116] : memref<98x64xf32, #tpu.memory_space<vmem>>, vector<2x64xf32>
    %c0_117 = arith.constant 0 : index
    %c1856 = arith.constant 1856 : index
    %126 = vector.load %arg14[%c0_117, %c1856] : memref<2x3136xf32, #tpu.memory_space<vmem>>, vector<2x64xf32>
    tpu.vector_store %arg14[%c0_117, %c1856], %125 {strides = array<i32>} : memref<2x3136xf32, #tpu.memory_space<vmem>>, vector<2x64xf32>,
    %c60 = arith.constant 60 : index
    %c0_118 = arith.constant 0 : index
    %127 = vector.load %arg13[%c60, %c0_118] : memref<98x64xf32, #tpu.memory_space<vmem>>, vector<2x64xf32>
    %c0_119 = arith.constant 0 : index
    %c1920 = arith.constant 1920 : index
    %128 = vector.load %arg14[%c0_119, %c1920] : memref<2x3136xf32, #tpu.memory_space<vmem>>, vector<2x64xf32>
    tpu.vector_store %arg14[%c0_119, %c1920], %127 {strides = array<i32>} : memref<2x3136xf32, #tpu.memory_space<vmem>>, vector<2x64xf32>,
    %c62 = arith.constant 62 : index
    %c0_120 = arith.constant 0 : index
    %129 = vector.load %arg13[%c62, %c0_120] : memref<98x64xf32, #tpu.memory_space<vmem>>, vector<2x64xf32>
    %c0_121 = arith.constant 0 : index
    %c1984 = arith.constant 1984 : index
    %130 = vector.load %arg14[%c0_121, %c1984] : memref<2x3136xf32, #tpu.memory_space<vmem>>, vector<2x64xf32>
    tpu.vector_store %arg14[%c0_121, %c1984], %129 {strides = array<i32>} : memref<2x3136xf32, #tpu.memory_space<vmem>>, vector<2x64xf32>,
    %c64_122 = arith.constant 64 : index
    %c0_123 = arith.constant 0 : index
    %131 = vector.load %arg13[%c64_122, %c0_123] : memref<98x64xf32, #tpu.memory_space<vmem>>, vector<2x64xf32>
    %c0_124 = arith.constant 0 : index
    %c2048 = arith.constant 2048 : index
    %132 = vector.load %arg14[%c0_124, %c2048] : memref<2x3136xf32, #tpu.memory_space<vmem>>, vector<2x64xf32>
    tpu.vector_store %arg14[%c0_124, %c2048], %131 {strides = array<i32>} : memref<2x3136xf32, #tpu.memory_space<vmem>>, vector<2x64xf32>,
    %c66 = arith.constant 66 : index
    %c0_125 = arith.constant 0 : index
    %133 = vector.load %arg13[%c66, %c0_125] : memref<98x64xf32, #tpu.memory_space<vmem>>, vector<2x64xf32>
    %c0_126 = arith.constant 0 : index
    %c2112 = arith.constant 2112 : index
    %134 = vector.load %arg14[%c0_126, %c2112] : memref<2x3136xf32, #tpu.memory_space<vmem>>, vector<2x64xf32>
    tpu.vector_store %arg14[%c0_126, %c2112], %133 {strides = array<i32>} : memref<2x3136xf32, #tpu.memory_space<vmem>>, vector<2x64xf32>,
    %c68 = arith.constant 68 : index
    %c0_127 = arith.constant 0 : index
    %135 = vector.load %arg13[%c68, %c0_127] : memref<98x64xf32, #tpu.memory_space<vmem>>, vector<2x64xf32>
    %c0_128 = arith.constant 0 : index
    %c2176 = arith.constant 2176 : index
    %136 = vector.load %arg14[%c0_128, %c2176] : memref<2x3136xf32, #tpu.memory_space<vmem>>, vector<2x64xf32>
    tpu.vector_store %arg14[%c0_128, %c2176], %135 {strides = array<i32>} : memref<2x3136xf32, #tpu.memory_space<vmem>>, vector<2x64xf32>,
    %c70 = arith.constant 70 : index
    %c0_129 = arith.constant 0 : index
    %137 = vector.load %arg13[%c70, %c0_129] : memref<98x64xf32, #tpu.memory_space<vmem>>, vector<2x64xf32>
    %c0_130 = arith.constant 0 : index
    %c2240 = arith.constant 2240 : index
    %138 = vector.load %arg14[%c0_130, %c2240] : memref<2x3136xf32, #tpu.memory_space<vmem>>, vector<2x64xf32>
    tpu.vector_store %arg14[%c0_130, %c2240], %137 {strides = array<i32>} : memref<2x3136xf32, #tpu.memory_space<vmem>>, vector<2x64xf32>,
    %c72 = arith.constant 72 : index
    %c0_131 = arith.constant 0 : index
    %139 = vector.load %arg13[%c72, %c0_131] : memref<98x64xf32, #tpu.memory_space<vmem>>, vector<2x64xf32>
    %c0_132 = arith.constant 0 : index
    %c2304 = arith.constant 2304 : index
    %140 = vector.load %arg14[%c0_132, %c2304] : memref<2x3136xf32, #tpu.memory_space<vmem>>, vector<2x64xf32>
    tpu.vector_store %arg14[%c0_132, %c2304], %139 {strides = array<i32>} : memref<2x3136xf32, #tpu.memory_space<vmem>>, vector<2x64xf32>,
    %c74 = arith.constant 74 : index
    %c0_133 = arith.constant 0 : index
    %141 = vector.load %arg13[%c74, %c0_133] : memref<98x64xf32, #tpu.memory_space<vmem>>, vector<2x64xf32>
    %c0_134 = arith.constant 0 : index
    %c2368 = arith.constant 2368 : index
    %142 = vector.load %arg14[%c0_134, %c2368] : memref<2x3136xf32, #tpu.memory_space<vmem>>, vector<2x64xf32>
    tpu.vector_store %arg14[%c0_134, %c2368], %141 {strides = array<i32>} : memref<2x3136xf32, #tpu.memory_space<vmem>>, vector<2x64xf32>,
    %c76 = arith.constant 76 : index
    %c0_135 = arith.constant 0 : index
    %143 = vector.load %arg13[%c76, %c0_135] : memref<98x64xf32, #tpu.memory_space<vmem>>, vector<2x64xf32>
    %c0_136 = arith.constant 0 : index
    %c2432 = arith.constant 2432 : index
    %144 = vector.load %arg14[%c0_136, %c2432] : memref<2x3136xf32, #tpu.memory_space<vmem>>, vector<2x64xf32>
    tpu.vector_store %arg14[%c0_136, %c2432], %143 {strides = array<i32>} : memref<2x3136xf32, #tpu.memory_space<vmem>>, vector<2x64xf32>,
    %c78 = arith.constant 78 : index
    %c0_137 = arith.constant 0 : index
    %145 = vector.load %arg13[%c78, %c0_137] : memref<98x64xf32, #tpu.memory_space<vmem>>, vector<2x64xf32>
    %c0_138 = arith.constant 0 : index
    %c2496 = arith.constant 2496 : index
    %146 = vector.load %arg14[%c0_138, %c2496] : memref<2x3136xf32, #tpu.memory_space<vmem>>, vector<2x64xf32>
    tpu.vector_store %arg14[%c0_138, %c2496], %145 {strides = array<i32>} : memref<2x3136xf32, #tpu.memory_space<vmem>>, vector<2x64xf32>,
    %c80 = arith.constant 80 : index
    %c0_139 = arith.constant 0 : index
    %147 = vector.load %arg13[%c80, %c0_139] : memref<98x64xf32, #tpu.memory_space<vmem>>, vector<2x64xf32>
    %c0_140 = arith.constant 0 : index
    %c2560 = arith.constant 2560 : index
    %148 = vector.load %arg14[%c0_140, %c2560] : memref<2x3136xf32, #tpu.memory_space<vmem>>, vector<2x64xf32>
    tpu.vector_store %arg14[%c0_140, %c2560], %147 {strides = array<i32>} : memref<2x3136xf32, #tpu.memory_space<vmem>>, vector<2x64xf32>,
    %c82 = arith.constant 82 : index
    %c0_141 = arith.constant 0 : index
    %149 = vector.load %arg13[%c82, %c0_141] : memref<98x64xf32, #tpu.memory_space<vmem>>, vector<2x64xf32>
    %c0_142 = arith.constant 0 : index
    %c2624 = arith.constant 2624 : index
    %150 = vector.load %arg14[%c0_142, %c2624] : memref<2x3136xf32, #tpu.memory_space<vmem>>, vector<2x64xf32>
    tpu.vector_store %arg14[%c0_142, %c2624], %149 {strides = array<i32>} : memref<2x3136xf32, #tpu.memory_space<vmem>>, vector<2x64xf32>,
    %c84 = arith.constant 84 : index
    %c0_143 = arith.constant 0 : index
    %151 = vector.load %arg13[%c84, %c0_143] : memref<98x64xf32, #tpu.memory_space<vmem>>, vector<2x64xf32>
    %c0_144 = arith.constant 0 : index
    %c2688 = arith.constant 2688 : index
    %152 = vector.load %arg14[%c0_144, %c2688] : memref<2x3136xf32, #tpu.memory_space<vmem>>, vector<2x64xf32>
    tpu.vector_store %arg14[%c0_144, %c2688], %151 {strides = array<i32>} : memref<2x3136xf32, #tpu.memory_space<vmem>>, vector<2x64xf32>,
    %c86 = arith.constant 86 : index
    %c0_145 = arith.constant 0 : index
    %153 = vector.load %arg13[%c86, %c0_145] : memref<98x64xf32, #tpu.memory_space<vmem>>, vector<2x64xf32>
    %c0_146 = arith.constant 0 : index
    %c2752 = arith.constant 2752 : index
    %154 = vector.load %arg14[%c0_146, %c2752] : memref<2x3136xf32, #tpu.memory_space<vmem>>, vector<2x64xf32>
    tpu.vector_store %arg14[%c0_146, %c2752], %153 {strides = array<i32>} : memref<2x3136xf32, #tpu.memory_space<vmem>>, vector<2x64xf32>,
    %c88 = arith.constant 88 : index
    %c0_147 = arith.constant 0 : index
    %155 = vector.load %arg13[%c88, %c0_147] : memref<98x64xf32, #tpu.memory_space<vmem>>, vector<2x64xf32>
    %c0_148 = arith.constant 0 : index
    %c2816 = arith.constant 2816 : index
    %156 = vector.load %arg14[%c0_148, %c2816] : memref<2x3136xf32, #tpu.memory_space<vmem>>, vector<2x64xf32>
    tpu.vector_store %arg14[%c0_148, %c2816], %155 {strides = array<i32>} : memref<2x3136xf32, #tpu.memory_space<vmem>>, vector<2x64xf32>,
    %c90 = arith.constant 90 : index
    %c0_149 = arith.constant 0 : index
    %157 = vector.load %arg13[%c90, %c0_149] : memref<98x64xf32, #tpu.memory_space<vmem>>, vector<2x64xf32>
    %c0_150 = arith.constant 0 : index
    %c2880 = arith.constant 2880 : index
    %158 = vector.load %arg14[%c0_150, %c2880] : memref<2x3136xf32, #tpu.memory_space<vmem>>, vector<2x64xf32>
    tpu.vector_store %arg14[%c0_150, %c2880], %157 {strides = array<i32>} : memref<2x3136xf32, #tpu.memory_space<vmem>>, vector<2x64xf32>,
    %c92 = arith.constant 92 : index
    %c0_151 = arith.constant 0 : index
    %159 = vector.load %arg13[%c92, %c0_151] : memref<98x64xf32, #tpu.memory_space<vmem>>, vector<2x64xf32>
    %c0_152 = arith.constant 0 : index
    %c2944 = arith.constant 2944 : index
    %160 = vector.load %arg14[%c0_152, %c2944] : memref<2x3136xf32, #tpu.memory_space<vmem>>, vector<2x64xf32>
    tpu.vector_store %arg14[%c0_152, %c2944], %159 {strides = array<i32>} : memref<2x3136xf32, #tpu.memory_space<vmem>>, vector<2x64xf32>,
    %c94 = arith.constant 94 : index
    %c0_153 = arith.constant 0 : index
    %161 = vector.load %arg13[%c94, %c0_153] : memref<98x64xf32, #tpu.memory_space<vmem>>, vector<2x64xf32>
    %c0_154 = arith.constant 0 : index
    %c3008 = arith.constant 3008 : index
    %162 = vector.load %arg14[%c0_154, %c3008] : memref<2x3136xf32, #tpu.memory_space<vmem>>, vector<2x64xf32>
    tpu.vector_store %arg14[%c0_154, %c3008], %161 {strides = array<i32>} : memref<2x3136xf32, #tpu.memory_space<vmem>>, vector<2x64xf32>,
    %c96_155 = arith.constant 96 : index
    %c0_156 = arith.constant 0 : index
    %163 = vector.load %arg13[%c96_155, %c0_156] : memref<98x64xf32, #tpu.memory_space<vmem>>, vector<2x64xf32>
    %c0_157 = arith.constant 0 : index
    %c3072 = arith.constant 3072 : index
    %164 = vector.load %arg14[%c0_157, %c3072] : memref<2x3136xf32, #tpu.memory_space<vmem>>, vector<2x64xf32>
    tpu.vector_store %arg14[%c0_157, %c3072], %163 {strides = array<i32>} : memref<2x3136xf32, #tpu.memory_space<vmem>>, vector<2x64xf32>,
    %c0_158 = arith.constant 0 : index
    %c0_159 = arith.constant 0 : index
    %165 = vector.load %arg14[%c0_158, %c0_159] : memref<2x3136xf32, #tpu.memory_space<vmem>>, vector<2x3136xf32>
    %166 = arith.truncf %165 : vector<2x3136xf32> to vector<2x3136xbf16>
    %c0_160 = arith.constant 0 : index
    %c0_161 = arith.constant 0 : index
    %167 = vector.load %arg6[%c0_160, %c0_161] : memref<3136x200xbf16, #tpu.memory_space<vmem>>, vector<3136x200xbf16>
    %cst_162 = arith.constant dense<0.000000e+00> : vector<2x200xf32>
    %168 = tpu.matmul %166, %167, %cst_162 {dimension_numbers = #tpu.dot_dimension_numbers<[1], [0], [0], [1], [0, 0, 1, 1], [], []>} : vector<2x3136xbf16>, vector<3136x200xbf16>, vector<2x200xf32> -> vector<2x200xf32>
    %c0_163 = arith.constant 0 : index
    %c0_164 = arith.constant 0 : index
    %169 = vector.load %arg7[%c0_163, %c0_164] : memref<1x200xf32, #tpu.memory_space<vmem>>, vector<1x200xf32>
    %170 = vector.broadcast %169 : vector<1x200xf32> to vector<2x200xf32>
    %171 = arith.addf %168, %170 : vector<2x200xf32>
    %cst_165 = arith.constant 0.000000e+00 : f32
    %172 = vector.broadcast %cst_165 : f32 to vector<2x200xf32>
    %173 = arith.maximumf %171, %172 : vector<2x200xf32>
    %174 = arith.truncf %173 : vector<2x200xf32> to vector<2x200xbf16>
    %c0_166 = arith.constant 0 : index
    %c0_167 = arith.constant 0 : index
    %175 = vector.load %arg8[%c0_166, %c0_167] : memref<200x10xbf16, #tpu.memory_space<vmem>>, vector<200x10xbf16>
    %cst_168 = arith.constant dense<0.000000e+00> : vector<2x10xf32>
    %176 = tpu.matmul %174, %175, %cst_168 {dimension_numbers = #tpu.dot_dimension_numbers<[1], [0], [0], [1], [0, 0, 1, 1], [], []>} : vector<2x200xbf16>, vector<200x10xbf16>, vector<2x10xf32> -> vector<2x10xf32>
    %c0_169 = arith.constant 0 : index
    %c0_170 = arith.constant 0 : index
    %177 = vector.load %arg9[%c0_169, %c0_170] : memref<1x10xf32, #tpu.memory_space<vmem>>, vector<1x10xf32>
    %178 = vector.broadcast %177 : vector<1x10xf32> to vector<2x10xf32>
    %179 = arith.addf %176, %178 : vector<2x10xf32>
    %c0_171 = arith.constant 0 : index
    %c0_172 = arith.constant 0 : index
    %180 = vector.load %arg10[%c0_171, %c0_172] : memref<2x10xf32, #tpu.memory_space<vmem>>, vector<2x10xf32>
    tpu.vector_store %arg10[%c0_171, %c0_172], %179 {strides = array<i32>} : memref<2x10xf32, #tpu.memory_space<vmem>>, vector<2x10xf32>,
    return
  }
}

</mosaic_0001>

<bundles_post_ra>
// kernel: lenet5_forward.1
= control target key start
LH: loop header
LB: loop body
LE: loop exit
PB: predicated region body
PF: predicated region fallthrough
CT: control target
= control target key end

     0   :  { %vm119_vm0 = vcmask 1043456   ;;  %v6842_v1 = vmov 1   ;;  %v6843_v2 = vmov 0.0   ;;  %vm120_vm1 = vcmask 1044480   ;;  %s6854_s16 = smov 32   ;;  %s6855_s17 = smov 64   ;;  %s9327_s0 = inlined_call_operand.vmem [shape: bf16[98,9], index: 0, kind: input, shape index: {}]   ;;  %s9328_s1 = inlined_call_operand.vmem [shape: f32[98,9], index: 1, kind: input, shape index: {}]   ;;  %s9329_s2 = inlined_call_operand.vmem [shape: bf16[9,32], index: 2, kind: input, shape index: {}]   ;;  %s9330_s3 = inlined_call_operand.vmem [shape: f32[1,32], index: 3, kind: input, shape index: {}]   ;;  %s9331_s4 = inlined_call_operand.vmem [shape: bf16[288,64], index: 4, kind: input, shape index: {}]   ;;  %s9332_s5 = inlined_call_operand.vmem [shape: f32[1,64], index: 5, kind: input, shape index: {}]   ;;  %s9333_s6 = inlined_call_operand.vmem [shape: bf16[3136,200], index: 6, kind: input, shape index: {}]   ;;  %s9334_s7 = inlined_call_operand.vmem [shape: f32[1,200], index: 7, kind: input, shape index: {}]   ;;  %s9335_s8 = inlined_call_operand.vmem [shape: bf16[200,10], index: 8, kind: input, shape index: {}]   ;;  %s9336_s9 = inlined_call_operand.vmem [shape: f32[1,10], index: 9, kind: input, shape index: {}]   ;;  %s9337_s10 = inlined_call_operand.hbm [shape: f32[2,10], index: 10, kind: output, shape index: {}]  }
   0x1   :  { %v6917_v0 = vld [vmem:[%s9328_s1] sm:$0xff]  ;;  %6098 = vset.pattern.permute.xlu1 %v6842_v1  ;;  %6018 = vmatprep.subr.bf16.mxu0 %v6843_v2  ;;  %v6844_v4 = vmov 65535   ;;  %v6929_v7 = vld [vmem:[%s9328_s1 + $0x8] sm:$0xff]  ;;  %vm6845_vm2 = vmmov 0   ;;  %vm97_vm3 = vcmask 72704   ;;  %v6846_v10 = vmov 5  }
   0x2   :  { %v6183_v3 = vld [vmem:[%s9329_s2] sm:$0x1f]   ;;  %390 = vperm.xlu1 %6098, %v6917_v0   ;;  %v121_v5 = vsel %vm119_vm0, 4294967295, %v6844_v4  ;;  %6020 = vmatprep.mubr.msk.bf16.mxu0 %vm6845_vm2, %v6843_v2  ;;  %vm227_vm4 = vcmask 261120   ;;  %v6847_v11 = vmov 6   ;;  %v6185_v12 = vld [vmem:[%s9327_s0 + $0x8] sm:$0xff]  }
   0x3   :  { %v122_v6 = vsel %vm120_vm1, %v121_v5, 0  ;;  %v6184_v9 = vld [vmem:[%s9327_s0] sm:$0xff]   ;;  %6097 = vset.pattern.permute.xlu0 %v6846_v10  ;;  %228 = vst.msk [vmem:[#allocation2] sm:$0xff] %vm227_vm4, %v6843_v2  ;;  %229 = vst.msk [vmem:[#allocation2 + $0x8] sm:$0xff] %vm227_vm4, %v6843_v2  ;;  %v6848_v13 = vmov 2   ;;  %v6849_v14 = vmov 3  }
   0x4   :  { %v124_v8 = vand.u32 %v6183_v3, %v122_v6  ;;  %916 = vperm.xlu0 %6097, %v6917_v0   ;;  %230 = vst.msk [vmem:[#allocation2 + $0x10] sm:$0xff] %vm227_vm4, %v6843_v2  ;;  %231 = vst.msk [vmem:[#allocation2 + $0x18] sm:$0xff] %vm227_vm4, %v6843_v2  ;;  %v6186_v15 = vld [vmem:[%s9327_s0 + $0x10] sm:$0xff]   ;;  %v6994_v16 = vld [vmem:[%s9328_s1 + $0x18] sm:$0xff]  ;;  %v6850_v17 = vmov 7   ;;  %v6851_v20 = vmov 4  }
   0x5   :  { %232 = vst.msk [vmem:[#allocation2 + $0x20] sm:$0xff] %vm227_vm4, %v6843_v2  ;;  %233 = vst.msk [vmem:[#allocation2 + $0x28] sm:$0xff] %vm227_vm4, %v6843_v2  ;;  %v6187_v18 = vld [vmem:[%s9327_s0 + $0x18] sm:$0xff]   ;;  %v261_v19 = vld [vmem:[%s9328_s1 + $0x10] sm:$0xff]  ;;  %v6852_v22 = vmov 0   ;;  %v6853_v24 = vmov 8  }
   0x6   :  { %6019 = vmatpush3.bf16.msra.mxu0 %v124_v8  ;;  %394 = vperm.xlu1 %6098, %v6929_v7   ;;  %234 = vst.msk [vmem:[#allocation2 + $0x30] sm:$0xff] %vm227_vm4, %v6843_v2  ;;  %235 = vst.msk [vmem:[#allocation2 + $0x38] sm:$0xff] %vm227_vm4, %v6843_v2  ;;  %v6188_v21 = vld [vmem:[%s9327_s0 + $0x20] sm:$0xff]   ;;  %v264_v23 = vld [vmem:[%s9328_s1 + $0x28] sm:$0xff] }
   0x7   :  { %6048 = vmatprep.subr.bf16.mxu0 %v6843_v2  ;;  %236 = vst.msk [vmem:[#allocation2 + $0x40] sm:$0xff] %vm227_vm4, %v6843_v2  ;;  %237 = vst.msk [vmem:[#allocation2 + $0x48] sm:$0xff] %vm227_vm4, %v6843_v2  ;;  %v7056_v25 = vld [vmem:[%s9328_s1 + $0x20] sm:$0xff] }
   0x8   :  { %238 = vst.msk [vmem:[#allocation2 + $0x50] sm:$0xff] %vm227_vm4, %v6843_v2  ;;  %239 = vst.msk [vmem:[#allocation2 + $0x58] sm:$0xff] %vm227_vm4, %v6843_v2  ;;  %920 = vperm.xlu0 %6097, %v6929_v7  }
   0x9   :  { %240 = vst.msk [vmem:[#allocation2 + $0x60] sm:$0xff] %vm227_vm4, %v6843_v2  ;;  %241 = vst.msk [vmem:[#allocation2 + $0x68] sm:$0xff] %vm227_vm4, %v6843_v2  ;;  %6021 = vmatmul.mubr.msk.bf16.vlgmr.msra.gmra.mxu0 %vm97_vm3, %v6184_v9 }
   0xa   :  { %242 = vst.msk [vmem:[#allocation2 + $0x70] sm:$0xff] %vm227_vm4, %v6843_v2  ;;  %243 = vst.msk [vmem:[#allocation2 + $0x78] sm:$0xff] %vm227_vm4, %v6843_v2  ;;  %6099 = vset.pattern.permute.xlu1 %v6847_v11  ;;  %6024 = vmatprep.mubr.msk.bf16.mxu0 %vm6845_vm2, %v6843_v2  ;;  %v376_v29 = vld [vmem:[#allocation2 + $0x2] sm:$0xff] }
   0xb   :  { %1063 = vperm.xlu1 %6099, %v6929_v7   ;;  %v521_v31 = vld [vmem:[#allocation2 + $0x4] sm:$0xff] }
   0xc   :  { %6102 = vset.pattern.permute.xlu0 %v6849_v14  ;;  %v272_v41 = vld [vmem:[#allocation2] sm:$0xff] }
   0xd   :  { %680 = vperm.xlu0 %6102, %v6917_v0  }
   0xf   :  { %6100 = vset.pattern.permute.xlu1 %v6848_v13 }
  0x10   :  { %535 = vperm.xlu1 %6100, %v6917_v0  }
  0x11   :  { %6025 = vmatmul.mubr.msk.bf16.gmra.mxu0 %vm97_vm3, %v6185_v12  ;;  %6108 = vset.pattern.permute.xlu0 %v6842_v1 }
  0x12   :  { %6028 = vmatprep.mubr.msk.bf16.mxu0 %vm6845_vm2, %v6843_v2  ;;  %402 = vperm.xlu0 %6108, %v6994_v16  }
  0x14   :  { %6101 = vset.pattern.permute.xlu1 %v6850_v17 }
  0x15   :  { %1202 = vperm.xlu1 %6101, %v6917_v0  }
  0x16   :  { %6109 = vset.pattern.permute.xlu0 %v6847_v11 }
  0x17   :  { %1059 = vperm.xlu0 %6109, %v6917_v0  }
  0x19   :  { %6029 = vmatmul.mubr.msk.bf16.gmra.mxu0 %vm97_vm3, %v6186_v15  ;;  %1206 = vperm.xlu1 %6101, %v6929_v7  }
  0x1a   :  { %6032 = vmatprep.mubr.msk.bf16.mxu0 %vm6845_vm2, %v6843_v2 }
  0x1b   :  { %1067 = vperm.xlu0 %6109, %v261_v19  }
  0x1d   :  { %6103 = vset.pattern.permute.xlu1 %v6849_v14 }
  0x1e   :  { %684 = vperm.xlu1 %6103, %v6929_v7  }
  0x1f   :  { %6110 = vset.pattern.permute.xlu0 %v6848_v13 }
  0x20   :  { %539 = vperm.xlu0 %6110, %v6929_v7  }
  0x21   :  { %6033 = vmatmul.mubr.msk.bf16.gmra.mxu0 %vm97_vm3, %v6187_v18 }
  0x22   :  { %6104 = vset.pattern.permute.xlu1 %v6851_v20  ;;  %6036 = vmatprep.mubr.msk.bf16.mxu0 %vm6845_vm2, %v6843_v2 }
  0x23   :  { %825 = vperm.xlu1 %6104, %v6917_v0  }
  0x24   :  { %547 = vperm.xlu0 %6110, %v6994_v16  }
  0x27   :  { %6105 = vset.pattern.permute.xlu1 %v6852_v22 }
  0x28   :  { %287 = vperm.xlu1 %6105, %v6917_v0   ;;  %6113 = vset.pattern.permute.xlu0 %v6850_v17 }
  0x29   :  { %6037 = vmatmul.mubr.msk.bf16.gmra.mxu0 %vm97_vm3, %v6188_v21  ;;  %1210 = vperm.xlu0 %6113, %v261_v19  }
  0x2a   :  { %6040 = vmatprep.mubr.msk.bf16.mxu0 %vm6845_vm2, %v6843_v2 }
  0x2c   :  { %292 = vperm.xlu1 %6105, %v6929_v7  }
  0x2d   :  { %6114 = vset.pattern.permute.xlu0 %v6851_v20 }
  0x2e   :  { %829 = vperm.xlu0 %6114, %v6929_v7  }
  0x30   :  { %6106 = vset.pattern.permute.xlu1 %v6846_v10 }
  0x31   :  { %928 = vperm.xlu1 %6106, %v6994_v16  }
  0x32   :  { %837 = vperm.xlu0 %6114, %v6994_v16  }
  0x35   :  { %6107 = vset.pattern.permute.xlu1 %v6842_v1 }
  0x36   :  { %398 = vperm.xlu1 %6107, %v261_v19   ;;  %6119 = vset.pattern.permute.xlu0 %v6849_v14 }
  0x37   :  { %692 = vperm.xlu0 %6119, %v6994_v16  }
  0x3a   :  { %6111 = vset.pattern.permute.xlu1 %v6847_v11 }
  0x3b   :  { %1071 = vperm.xlu1 %6111, %v6994_v16   ;;  %700 = vperm.xlu0 %6119, %v264_v23  }
  0x3f   :  { %6112 = vset.pattern.permute.xlu1 %v6848_v13  ;;  %6127 = vset.pattern.permute.xlu0 %v6853_v24 }
  0x40   :  { %543 = vperm.xlu1 %6112, %v261_v19   ;;  %1345 = vperm.xlu0 %6127, %v6917_v0  }
  0x44   :  { %6115 = vset.pattern.permute.xlu1 %v6850_v17  ;;  %1353 = vperm.xlu0 %6127, %v261_v19  }
  0x45   :  { %1214 = vperm.xlu1 %6115, %v6994_v16  }
  0x48   :  { %6128 = vset.pattern.permute.xlu0 %v6846_v10 }
  0x49   :  { %6116 = vset.pattern.permute.xlu1 %v6849_v14  ;;  %924 = vperm.xlu0 %6128, %v261_v19  }
  0x4a   :  { %688 = vperm.xlu1 %6116, %v261_v19  }
  0x4d   :  { %932 = vperm.xlu0 %6128, %v7056_v25  }
  0x4e   :  { %6117 = vset.pattern.permute.xlu1 %v6853_v24 }
  0x4f   :  { %1349 = vperm.xlu1 %6117, %v6929_v7  }
  0x53   :  { %6118 = vset.pattern.permute.xlu1 %v6851_v20 }
  0x54   :  { %833 = vperm.xlu1 %6118, %v261_v19  }
  0x58   :  { %6120 = vset.pattern.permute.xlu1 %v6852_v22 }
  0x59   :  { %297 = vperm.xlu1 %6120, %v261_v19  }
  0x5d   :  { %302 = vperm.xlu1 %6120, %v6994_v16  }
  0x61   :  { %6121 = vset.pattern.permute.xlu1 %v6846_v10 }
  0x62   :  { %936 = vperm.xlu1 %6121, %v264_v23  }
  0x66   :  { %6122 = vset.pattern.permute.xlu1 %v6842_v1 }
  0x67   :  { %406 = vperm.xlu1 %6122, %v7056_v25  }
  0x6b   :  { %6123 = vset.pattern.permute.xlu1 %v6847_v11 }
  0x6c   :  { %1079 = vperm.xlu1 %6123, %v264_v23  }
  0x70   :  { %6124 = vset.pattern.permute.xlu1 %v6848_v13 }
  0x71   :  { %551 = vperm.xlu1 %6124, %v7056_v25  }
  0x75   :  { %6125 = vset.pattern.permute.xlu1 %v6850_v17 }
  0x76   :  { %1222 = vperm.xlu1 %6125, %v264_v23  }
  0x7a   :  { %6126 = vset.pattern.permute.xlu1 %v6849_v14 }
  0x7b   :  { %696 = vperm.xlu1 %6126, %v7056_v25  }
  0x7d   :  { %v391_v26 = vpop.permute.xlu1 %390 }
  0x7e   :  { %v441_v32 = vmul.f32 %v391_v26, %v376_v29 }
  0x7f   :  { %6129 = vset.pattern.permute.xlu1 %v6853_v24  ;;  %v7084_v35 = vpop.permute.xlu0 %916 }
  0x80   :  { %1357 = vperm.xlu1 %6129, %v6994_v16  }
  0x81   :  { %v7074_v27 = vpop.permute.xlu1 %394 }
  0x83   :  { %v7091_v37 = vpop.permute.xlu0 %920 }
  0x84   :  { %6130 = vset.pattern.permute.xlu1 %v6851_v20 }
  0x85   :  { %841 = vperm.xlu1 %6130, %v7056_v25  }
  0x86   :  { %v7078_v28 = vpop.permute.xlu1 %1063 }
  0x88   :  { %v681_v40 = vpop.permute.xlu0 %680 }
  0x89   :  { %6131 = vset.pattern.permute.xlu1 %v6852_v22 }
  0x8a   :  { %307 = vperm.xlu1 %6131, %v7056_v25  }
  0x8b   :  { %v536_v30 = vpop.permute.xlu1 %535 }
  0x8c   :  { %v586_v34 = vmul.f32 %v536_v30, %v521_v31 }
  0x8d   :  { %v7097_v44 = vpop.permute.xlu0 %402 }
  0x8e   :  { %312 = vperm.xlu1 %6131, %v264_v23  }
  0x90   :  { %v7082_v33 = vpop.permute.xlu1 %1202 }
  0x92   :  { %467 = vrot.lane.b32.xlu1 %v441_v32, %s6854_s16 }
  0x93   :  { %6133 = vset.pattern.permute.xlu1 %v6846_v10 }
  0x94   :  { %v7088_v36 = vpop.permute.xlu1 %1206 }
  0x96   :  { %612 = vrot.lane.b32.xlu1 %v586_v34, %s6855_s17 }
  0x99   :  { %v7093_v38 = vpop.permute.xlu1 %684 }
  0x9e   :  { %v7095_v39 = vpop.permute.xlu1 %825 }
  0xa3   :  { %v288_v42 = vpop.permute.xlu1 %287 }
  0xa4   :  { %v350_v43 = vmul.f32 %v288_v42, %v272_v41 }
  0xa5   :  { %15 = vsyncpa [#allocation7], 0  ;;  %v273_v45 = vld [vmem:[#allocation2 + $0x8] sm:$0xff]  ;;  %v7101_v48 = vpop.permute.xlu0 %1059  ;;  %v6192_v54 = vld [vmem:[%s9331_s4 + $0x80] sm:$0xff]   ;;  %vm506_vm5 = vcmask 523520   ;;  %vm651_vm6 = vcmask 785920  }
  0xa6   :  { %363 = vst.msk [vmem:[#allocation3] sm:$0xff] %vm227_vm4, %v350_v43  ;;  %v6189_v51 = vld [vmem:[%s9327_s0 + $0x28] sm:$0xff]   ;;  %v6190_v57 = vld [vmem:[%s9327_s0 + $0x30] ss:$0 sps:$4 sm:$0x11]   ;;  %s6856_s0 = smov 96  }
  0xa7   :  { %v293_v46 = vpop.permute.xlu1 %292  ;;  %v6191_v52 = vld [vmem:[%s9331_s4 + $0x88] sm:$0xff]   ;;  %6041 = vmatmul.mubr.msk.bf16.gmra.mxu0 %vm97_vm3, %v6189_v51  ;;  %v7143_v63 = vld [vmem:[%s9330_s3] ss:$0 sm:$0xff]  ;;  %vm796_vm7 = vcmask 1048320   ;;  %vm244_vm8 = vcmask 254976   ;;  %vm1843_vm9 = vcmask 523264  }
  0xa8   :  { %v351_v47 = vmul.f32 %v293_v46, %v273_v45  ;;  %6044 = vmatprep.mubr.msk.bf16.mxu0 %vm6845_vm2, %v6843_v2  ;;  %6049 = vmatpush3.bf16.msra.mxu0 %v6191_v52  ;;  %245 = vst.msk [vmem:[#allocation2 + $0x80] sm:$0x3] %vm244_vm8, %v6843_v2  ;;  %vm1856_vm10 = vcmask 517120   ;;  %vm1872_vm11 = vcmask 1041920   ;;  %vm519_vm12 = vcmask 517376   ;;  %s6858_s12 = smov [#allocation6]  }
  0xa9   :  { %v7105_v50 = vpop.permute.xlu0 %1067  ;;  %6050 = vmatprep.subr.bf16.mxu0 %v6843_v2  ;;  %vm664_vm13 = vcmask 779776   ;;  %vm809_vm14 = vcmask 1042176   ;;  %vm5405_vm15 = vcmask 588800  }
  0xaa   :  { %364 = vst.msk [vmem:[#allocation3 + $0x18] sm:$0xff] %vm227_vm4, %v351_v47 }
  0xac   :  { %v7103_v49 = vpop.permute.xlu1 %928  ;;  %6051 = vmatpush3.bf16.msra.mxu0 %v6192_v54 }
  0xad   :  { %v540_v56 = vpop.permute.xlu0 %539 }
  0xaf   :  { %6045 = vmatmul.mubr.msk.bf16.gmra.mxu0 %vm97_vm3, %v6190_v57 }
  0xb0   :  { %6052 = vmatprep.mubr.msk.bf16.mxu0 %vm6845_vm2, %v6843_v2 }
  0xb1   :  { %v7113_v53 = vpop.permute.xlu1 %398  ;;  %v7132_v59 = vpop.permute.xlu0 %547 }
  0xb5   :  { %v7136_v61 = vpop.permute.xlu0 %1210 }
  0xb6   :  { %v7122_v55 = vpop.permute.xlu1 %1071 }
  0xb9   :  { %v830_v0 = vpop.permute.xlu0 %829 }
  0xbb   :  { %v7128_v58 = vpop.permute.xlu1 %543 }
  0xbd   :  { %v7148_v8 = vpop.permute.xlu0 %837 }
  0xc0   :  { %v7134_v60 = vpop.permute.xlu1 %1214 }
  0xc1   :  { %v7156_v23 = vpop.permute.xlu0 %692 }
  0xc5   :  { %v7138_v62 = vpop.permute.xlu1 %688 }
  0xc9   :  { %v160_v3 = vpop.f32.mrf.mxu0 }
  0xca   :  { %v161_v4 = vadd.f32 %v7143_v63, %v160_v3  ;;  %v7146_v5 = vpop.permute.xlu1 %1349  ;;  %v7164_v3 = vpop.permute.xlu0 %700 }
  0xcb   :  { %v6022_v6 = vpop.f32.mrf.mxu0 }
  0xcc   :  { %v214_v7 = vmax.f32 %v161_v4, 0.0 }
  0xcd   :  { %v163_v9 = vpop.f32.mrf.mxu0 }
  0xce   :  { %246 = vst.msk [vmem:[#allocation2 + $0x10] sm:$0xff] %vm227_vm4, %v214_v7  ;;  %v164_v12 = vadd.f32 %v7143_v63, %v163_v9 }
  0xcf   :  { %v6023_v15 = vpop.f32.mrf.mxu0  ;;  %v7152_v16 = vpop.permute.xlu1 %833 }
  0xd0   :  { %v215_v18 = vmax.f32 %v164_v12, 0.0 }
  0xd1   :  { %v168_v19 = vpop.f32.mrf.mxu0 }
  0xd2   :  { %247 = vst.msk [vmem:[#allocation2 + $0x18] sm:$0xff] %vm227_vm4, %v215_v18  ;;  %v169_v21 = vadd.f32 %v7143_v63, %v168_v19 }
  0xd3   :  { %v6026_v26 = vpop.f32.mrf.mxu0 }
  0xd4   :  { %v216_v29 = vmax.f32 %v169_v21, 0.0  ;;  %v298_v30 = vpop.permute.xlu1 %297 }
  0xd5   :  { %v274_v31 = vld [vmem:[#allocation2 + $0x10] sm:$0xff]  ;;  %v171_v32 = vpop.f32.mrf.mxu0 }
  0xd6   :  { %v666_v34 = vld [vmem:[#allocation2 + $0xe] sm:$0xff]  ;;  %248 = vst.msk [vmem:[#allocation2 + $0x20] sm:$0xff] %vm227_vm4, %v216_v29  ;;  %v352_v41 = vmul.f32 %v298_v30, %v274_v31  ;;  %v172_v42 = vadd.f32 %v7143_v63, %v171_v32  ;;  %v876_v51 = vmul.f32 %v7095_v39, %v274_v31 }
  0xd7   :  { %v731_v43 = vmul.f32 %v681_v40, %v666_v34  ;;  %v377_v45 = vld [vmem:[#allocation2 + $0xa] sm:$0xff]  ;;  %v6027_v46 = vpop.f32.mrf.mxu0 }
  0xd8   :  { %v442_v47 = vmul.f32 %v7074_v27, %v377_v45  ;;  %v522_v52 = vld [vmem:[#allocation2 + $0xc] sm:$0xff]  ;;  %365 = vst.msk [vmem:[#allocation3 + $0x30] sm:$0xff] %vm227_vm4, %v352_v41  ;;  %v217_v54 = vmax.f32 %v172_v42, 0.0  ;;  %v303_v57 = vpop.permute.xlu1 %302  ;;  %889 = vst.msk [vmem:[#allocation3 + $0x8] sm:$0xff] %vm227_vm4, %v876_v51 }
  0xd9   :  { %757 = vrot.lane.b32.xlu1 %v731_v43, %s6856_s0  ;;  %v275_v4 = vld [vmem:[#allocation2 + $0x18] sm:$0xff]  ;;  %v176_v40 = vpop.f32.mrf.mxu0  ;;  %v587_v12 = vmul.f32 %v540_v56, %v522_v52  ;;  %v1346_v56 = vpop.permute.xlu0 %1345 }
  0xda   :  { %469 = vrot.lane.b32.xlu0 %v442_v47, %s6854_s16  ;;  %v7167_v6 = vld [vmem:[#allocation2 + $0x12] sm:$0xff]  ;;  %249 = vst.msk [vmem:[#allocation2 + $0x28] sm:$0xff] %vm227_vm4, %v217_v54  ;;  %v353_v27 = vmul.f32 %v303_v57, %v275_v4  ;;  %v877_v39 = vmul.f32 %v830_v0, %v275_v4  ;;  %v177_v7 = vadd.f32 %v7143_v63, %v176_v40 }
  0xdb   :  { %v967_v9 = vmul.f32 %v7084_v35, %v7167_v6  ;;  %v6030_v15 = vpop.f32.mrf.mxu0  ;;  %v667_v19 = vld [vmem:[#allocation2 + $0x16] sm:$0xff] }
  0xdc   :  { %366 = vst.msk [vmem:[#allocation3 + $0x48] sm:$0xff] %vm227_vm4, %v353_v27  ;;  %890 = vst.msk [vmem:[#allocation3 + $0x20] sm:$0xff] %vm227_vm4, %v877_v39  ;;  %v218_v18 = vmax.f32 %v177_v7, 0.0  ;;  %v7181_v0 = vld [vmem:[%s9328_s1 + $0x38] sm:$0xff]  ;;  %v732_v29 = vmul.f32 %v7093_v38, %v667_v19  ;;  %v7201_v38 = vld [vmem:[%s9328_s1 + $0x30] sm:$0xff] }
  0xdd   :  { %993 = vrot.lane.b32.xlu1 %v967_v9, %s6854_s16  ;;  %v7183_v21 = vpop.permute.xlu1 %936  ;;  %v179_v35 = vpop.f32.mrf.mxu0  ;;  %v7186_v26 = vld [vmem:[#allocation2 + $0x20] sm:$0xff] }
  0xde   :  { %614 = vrot.lane.b32.xlu0 %v587_v12, %s6855_s17  ;;  %250 = vst.msk [vmem:[#allocation2 + $0x30] sm:$0xff] %vm227_vm4, %v218_v18  ;;  %v1396_v30 = vmul.f32 %v1346_v56, %v7186_v26  ;;  %v180_v31 = vadd.f32 %v7143_v63, %v179_v35  ;;  %v7230_v12 = vld [vmem:[%s9328_s1 + $0x28] sm:$0xff] }
  0xdf   :  { %v6031_v32 = vpop.f32.mrf.mxu0 }
  0xe0   :  { %1409 = vst.msk [vmem:[#allocation3 + $0x10] sm:$0xff] %vm227_vm4, %v1396_v30  ;;  %v219_v41 = vmax.f32 %v180_v31, 0.0  ;;  %v443_v30 = vmul.f32 %v7167_v6, %v7113_v53  ;;  %v523_v32 = vld [vmem:[#allocation2 + $0x14] sm:$0xff] }
  0xe1   :  { %944 = vperm.xlu1 %6133, %v7181_v0   ;;  %v7192_v34 = vld [vmem:[#allocation2 + $0x28] sm:$0xff]  ;;  %v184_v42 = vpop.f32.mrf.mxu0  ;;  %v6194_v6 = vld [vmem:[%s9331_s4 + $0x38] sm:$0xff]  }
  0xe2   :  { %759 = vrot.lane.b32.xlu0 %v732_v29, %s6856_s0  ;;  %v1397_v43 = vmul.f32 %v7146_v5, %v7192_v34  ;;  %v879_v45 = vmul.f32 %v7192_v34, %v7148_v8  ;;  %v7205_v46 = vpop.permute.xlu1 %406  ;;  %251 = vst.msk [vmem:[#allocation2 + $0x38] sm:$0xff] %vm227_vm4, %v219_v41  ;;  %v185_v47 = vadd.f32 %v7143_v63, %v184_v42  ;;  %v1354_v8 = vpop.permute.xlu0 %1353  ;;  %v6193_v41 = vld [vmem:[%s9331_s4 + $0x78] sm:$0xff]  }
  0xe3   :  { %v6034_v51 = vpop.f32.mrf.mxu0  ;;  %v878_v5 = vmul.f32 %v7186_v26, %v7152_v16  ;;  %v588_v42 = vmul.f32 %v7128_v58, %v523_v32  ;;  %5951 = vmatprep.subr.bf16.mxu1 %v6193_v41  ;;  %v6195_v58 = vld [vmem:[%s9331_s4 + $0x70] sm:$0xff]   ;;  %v6202_v41 = vld [vmem:[%s9331_s4 + $0x18] sm:$0xff]  }
  0xe4   :  { %1410 = vst.msk [vmem:[#allocation3 + $0x28] sm:$0xff] %vm227_vm4, %v1397_v43  ;;  %892 = vst.msk [vmem:[#allocation3 + $0x50] sm:$0xff] %vm227_vm4, %v879_v45  ;;  %v220_v54 = vmax.f32 %v185_v47, 0.0  ;;  %v903_v43 = vld [vmem:[#allocation2 + $0x1a] sm:$0xff]  ;;  %5952 = vmatpush3.bf16.msra.mxu1 %v6194_v6  ;;  %v669_v6 = vld [vmem:[#allocation2 + $0x26] sm:$0xff] }
  0xe5   :  { %6134 = vset.pattern.permute.xlu1 %v6842_v1  ;;  %v7216_v52 = vld [vmem:[#allocation2 + $0x30] sm:$0xff]  ;;  %v187_v57 = vpop.f32.mrf.mxu0  ;;  %891 = vst.msk [vmem:[#allocation3 + $0x38] sm:$0xff] %vm227_vm4, %v878_v5  ;;  %v968_v45 = vmul.f32 %v7091_v37, %v903_v43  ;;  %v1045_v51 = vld [vmem:[#allocation2 + $0x1c] sm:$0xff]  ;;  %5953 = vmatprep.subr.bf16.mxu1 %v6195_v58 }
  0xe6   :  { %940 = vperm.xlu0 %6128, %v7201_v38   ;;  %414 = vperm.xlu1 %6134, %v7201_v38   ;;  %v1398_v4 = vmul.f32 %v1354_v8, %v7216_v52  ;;  %v188_v40 = vadd.f32 %v7143_v63, %v187_v57  ;;  %252 = vst.msk [vmem:[#allocation2 + $0x40] sm:$0xff] %vm227_vm4, %v220_v54  ;;  %v6196_v5 = vld [vmem:[%s9331_s4 + $0x30] sm:$0xff]   ;;  %v6197_v57 = vld [vmem:[%s9331_s4 + $0x68] sm:$0xff]  }
  0xe7   :  { %v7221_v27 = vpop.permute.xlu1 %1079  ;;  %v6035_v16 = vpop.f32.mrf.mxu0  ;;  %v1424_v7 = vld [vmem:[#allocation3 + $0x10] sm:$0xff]  ;;  %v1110_v54 = vmul.f32 %v7101_v48, %v1045_v51  ;;  %v904_v58 = vld [vmem:[#allocation2 + $0x22] sm:$0xff] }
  0xe8   :  { %1411 = vst.msk [vmem:[#allocation3 + $0x40] sm:$0xff] %vm227_vm4, %v1398_v4  ;;  %v221_v39 = vmax.f32 %v188_v40, 0.0  ;;  %5954 = vmatpush3.bf16.msra.mxu1 %v6196_v5  ;;  %v1188_v4 = vld [vmem:[#allocation2 + $0x1e] sm:$0xff]  ;;  %v6198_v40 = vld [vmem:[%s9331_s4 + $0x28] sm:$0xff]   ;;  %v734_v5 = vmul.f32 %v7156_v23, %v669_v6 }
  0xe9   :  { %v192_v9 = vpop.f32.mrf.mxu0  ;;  %v7265_v47 = vld [vmem:[#allocation2 + $0x38] sm:$0xff]  ;;  %5955 = vmatprep.subr.bf16.mxu1 %v6197_v57  ;;  %v1253_v48 = vmul.f32 %v7082_v33, %v1188_v4  ;;  %v733_v33 = vmul.f32 %v1188_v4, %v7138_v62  ;;  %v445_v57 = vmul.f32 %v904_v58, %v7205_v46 }
  0xea   :  { %6132 = vset.pattern.permute.xlu0 %v6842_v1  ;;  %6137 = vset.pattern.permute.xlu1 %v6847_v11  ;;  %253 = vst.msk [vmem:[#allocation2 + $0x48] sm:$0xff] %vm227_vm4, %v221_v39  ;;  %v193_v15 = vadd.f32 %v7143_v63, %v192_v9  ;;  %v6200_v9 = vld [vmem:[%s9331_s4 + $0x20] sm:$0xff]   ;;  %v7361_v46 = vld [vmem:[#allocation2 + $0x34] sm:$0xff] }
  0xeb   :  { %410 = vperm.xlu0 %6132, %v7230_v12   ;;  %1087 = vperm.xlu1 %6137, %v7181_v0   ;;  %v1427_v18 = vld [vmem:[#allocation3 + $0x28] sm:$0xff]  ;;  %v6038_v19 = vpop.f32.mrf.mxu0 }
  0xec   :  { %v7236_v35 = vpop.permute.xlu1 %551  ;;  %v1463_v56 = vpack.c.bf16 %v1427_v18, %v1424_v7  ;;  %v222_v29 = vmax.f32 %v193_v15, 0.0  ;;  %5956 = vmatpush3.bf16.msra.mxu1 %v6198_v40  ;;  %v6199_v7 = vld [vmem:[%s9331_s4 + $0x60] sm:$0xff]   ;;  %v905_v40 = vld [vmem:[#allocation2 + $0x2a] sm:$0xff] }
  0xed   :  { %5957 = vmatprep.subr.bf16.mxu1 %v6199_v7  ;;  %v7358_v7 = vld [vmem:[#allocation2 + $0x2e] sm:$0xff] }
  0xee   :  { %254 = vst.msk [vmem:[#allocation2 + $0x50] sm:$0xff] %vm227_vm4, %v222_v29  ;;  %6053 = vmatmul.mubr.msk.bf16.vlgmr.msra.gmra.mxu0 %vm227_vm4, %v1463_v56  ;;  %v6201_v56 = vld [vmem:[%s9331_s4 + $0x58] sm:$0xff]   ;;  %v1046_v29 = vld [vmem:[#allocation2 + $0x24] sm:$0xff] }
  0xef   :  { %418 = vperm.xlu0 %6132, %v7181_v0   ;;  %6138 = vset.pattern.permute.xlu1 %v6848_v13  ;;  %v1430_v15 = vld [vmem:[#allocation3 + $0x40] sm:$0xff]  ;;  %v1111_v62 = vmul.f32 %v7078_v28, %v1046_v29  ;;  %v589_v28 = vmul.f32 %v1045_v51, %v7132_v59  ;;  %v590_v4 = vmul.f32 %v1046_v29, %v7236_v35  ;;  %v7378_v29 = vld [vmem:[#allocation2 + $0x3a] sm:$0xff] }
  0xf0   :  { %559 = vperm.xlu1 %6138, %v7201_v38   ;;  %6056 = vmatprep.mubr.msk.bf16.mxu0 %vm6845_vm2, %v6843_v2  ;;  %v6206_v59 = vld [vmem:[%s9331_s4 + $0x8] sm:$0xff]   ;;  %v1255_v35 = vmul.f32 %v7136_v61, %v7358_v7 }
  0xf1   :  { %v7247_v31 = vpop.permute.xlu1 %1222  ;;  %5958 = vmatpush3.bf16.msra.mxu1 %v6200_v9  ;;  %v1113_v9 = vmul.f32 %v7122_v55, %v7361_v46 }
  0xf2   :  { %5959 = vmatprep.subr.bf16.mxu1 %v6201_v56 }
  0xf3   :  { %6135 = vset.pattern.permute.xlu0 %v6847_v11 }
  0xf4   :  { %1075 = vperm.xlu0 %6135, %v7056_v25   ;;  %471 = vrot.lane.b32.xlu1 %v443_v30, %s6854_s16 }
  0xf5   :  { %6140 = vset.pattern.permute.xlu1 %v6850_v17  ;;  %5960 = vmatpush3.bf16.msra.mxu1 %v6202_v41 }
  0xf6   :  { %v7257_v53 = vpop.permute.xlu1 %696 }
  0xf8   :  { %1083 = vperm.xlu0 %6135, %v7201_v38   ;;  %616 = vrot.lane.b32.xlu1 %v588_v42, %s6855_s17 }
  0xfb   :  { %v1358_v8 = vpop.permute.xlu1 %1357 }
  0xfc   :  { %6136 = vset.pattern.permute.xlu0 %v6848_v13  ;;  %995 = vrot.lane.b32.xlu1 %v968_v45, %s6854_s16  ;;  %v1399_v37 = vmul.f32 %v1358_v8, %v7265_v47 }
  0xfd   :  { %555 = vperm.xlu0 %6136, %v7230_v12  }
  0xfe   :  { %1412 = vst.msk [vmem:[#allocation3 + $0x58] sm:$0xff] %vm227_vm4, %v1399_v37  ;;  %v6205_v37 = vld [vmem:[%s9331_s4 + $0x48] sm:$0xff]  }
 0x100   :  { %1136 = vrot.lane.b32.xlu1 %v1110_v54, %s6855_s17  ;;  %v842_v16 = vpop.permute.xlu1 %841  ;;  %v6208_v54 = vld [vmem:[%s9331_s4] sm:$0xff]  }
 0x101   :  { %563 = vperm.xlu0 %6136, %v7181_v0   ;;  %v880_v39 = vmul.f32 %v7216_v52, %v842_v16  ;;  %v970_v16 = vmul.f32 %v7103_v49, %v905_v40  ;;  %v7368_v49 = vld [vmem:[#allocation2 + $0x36] sm:$0xff] }
 0x103   :  { %893 = vst.msk [vmem:[#allocation3 + $0x68] sm:$0xff] %vm227_vm4, %v880_v39 }
 0x104   :  { %1279 = vrot.lane.b32.xlu1 %v1253_v48, %s6856_s0  ;;  %v1047_v48 = vld [vmem:[#allocation2 + $0x2c] sm:$0xff] }
 0x105   :  { %6139 = vset.pattern.permute.xlu0 %v6850_v17  ;;  %v308_v18 = vpop.permute.xlu1 %307  ;;  %v1433_v19 = vld [vmem:[#allocation3 + $0x58] sm:$0xff]  ;;  %v1112_v39 = vmul.f32 %v7105_v50, %v1047_v48  ;;  %v1256_v50 = vmul.f32 %v7134_v60, %v7368_v49  ;;  %v972_v60 = vmul.f32 %v7183_v21, %v7378_v29 }
 0x106   :  { %1218 = vperm.xlu0 %6139, %v7056_v25   ;;  %v354_v30 = vmul.f32 %v7186_v26, %v308_v18  ;;  %v1466_v32 = vpack.c.bf16 %v1433_v19, %v1430_v15  ;;  %v444_v25 = vmul.f32 %v903_v43, %v7097_v44  ;;  %v6203_v26 = vld [vmem:[%s9331_s4 + $0x50] sm:$0xff]   ;;  %v925_v43 = vpop.permute.xlu0 %924 }
 0x107   :  { %v6204_v44 = vld [vmem:[%s9331_s4 + $0x10] sm:$0xff]   ;;  %5961 = vmatprep.subr.bf16.mxu1 %v6203_v26  ;;  %v969_v51 = vmul.f32 %v925_v43, %v904_v58  ;;  %v7403_v58 = vld [vmem:[#allocation2 + $0x3c] sm:$0xff] }
 0x108   :  { %761 = vrot.lane.b32.xlu1 %v733_v33, %s6856_s0  ;;  %367 = vst.msk [vmem:[#allocation3 + $0x60] sm:$0xff] %vm227_vm4, %v354_v30  ;;  %6057 = vmatmul.mubr.msk.bf16.gmra.mxu0 %vm227_vm4, %v1466_v32  ;;  %v7373_v15 = vld [vmem:[#allocation2 + $0x32] sm:$0xff]  ;;  %v195_v33 = vpop.f32.mrf.mxu0 }
 0x109   :  { %v313_v42 = vpop.permute.xlu1 %312  ;;  %6060 = vmatprep.mubr.msk.bf16.mxu0 %vm6845_vm2, %v6843_v2  ;;  %5962 = vmatpush3.bf16.msra.mxu1 %v6204_v44  ;;  %v196_v19 = vadd.f32 %v7143_v63, %v195_v33 }
 0x10a   :  { %473 = vrot.lane.b32.xlu0 %v444_v25, %s6854_s16  ;;  %v355_v45 = vmul.f32 %v7192_v34, %v313_v42  ;;  %v1254_v34 = vmul.f32 %v7088_v36, %v669_v6  ;;  %5963 = vmatprep.subr.bf16.mxu1 %v6205_v37  ;;  %v6207_v36 = vld [vmem:[%s9331_s4 + $0x40] sm:$0xff]   ;;  %v933_v18 = vpop.permute.xlu0 %932  ;;  %v6039_v56 = vpop.f32.mrf.mxu0 }
 0x10b   :  { %v971_v61 = vmul.f32 %v933_v18, %v7373_v15  ;;  %v223_v55 = vmax.f32 %v196_v19, 0.0 }
 0x10c   :  { %1138 = vrot.lane.b32.xlu1 %v1111_v62, %s6855_s17  ;;  %368 = vst.msk [vmem:[#allocation3 + $0x78] sm:$0xff] %vm227_vm4, %v355_v45 }
 0x10d   :  { %v468_v8 = vpop.permute.xlu1 %467  ;;  %5964 = vmatpush3.bf16.msra.mxu1 %v6206_v59  ;;  %255 = vst.msk [vmem:[#allocation2 + $0x58] sm:$0xff] %vm227_vm4, %v223_v55 }
 0x10e   :  { %618 = vrot.lane.b32.xlu0 %v589_v28, %s6855_s17  ;;  %507 = vst.msk [vmem:[#allocation3] sm:$0xff] %vm506_vm5, %v468_v8  ;;  %5965 = vmatprep.subr.bf16.mxu1 %v6207_v36 }
 0x110   :  { %1281 = vrot.lane.b32.xlu1 %v1254_v34, %s6856_s0 }
 0x111   :  { %v613_v23 = vpop.permute.xlu1 %612  ;;  %5966 = vmatpush3.bf16.msra.mxu1 %v6208_v54 }
 0x112   :  { %763 = vrot.lane.b32.xlu0 %v734_v5, %s6856_s0  ;;  %652 = vst.msk [vmem:[#allocation3] sm:$0xff] %vm651_vm6, %v613_v23 }
 0x114   :  { %997 = vrot.lane.b32.xlu1 %v969_v51, %s6854_s16 }
 0x116   :  { %1226 = vperm.xlu0 %6139, %v7201_v38  }
 0x118   :  { %1230 = vperm.xlu1 %6140, %v7181_v0  }
 0x11a   :  { %6142 = vset.pattern.permute.xlu0 %v6849_v14 }
 0x11c   :  { %6141 = vset.pattern.permute.xlu1 %v6849_v14 }
 0x11d   :  { %704 = vperm.xlu1 %6141, %v7201_v38  }
 0x121   :  { %475 = vrot.lane.b32.xlu1 %v445_v57, %s6854_s16 }
 0x122   :  { %6144 = vset.pattern.permute.xlu1 %v6853_v24 }
 0x125   :  { %620 = vrot.lane.b32.xlu1 %v590_v4, %s6855_s17 }
 0x129   :  { %999 = vrot.lane.b32.xlu1 %v970_v16, %s6854_s16 }
 0x12d   :  { %1140 = vrot.lane.b32.xlu1 %v1112_v39, %s6855_s17 }
 0x131   :  { %1283 = vrot.lane.b32.xlu1 %v1255_v35, %s6856_s0 }
 0x135   :  { %1142 = vrot.lane.b32.xlu1 %v1113_v9, %s6855_s17 }
 0x139   :  { %1285 = vrot.lane.b32.xlu1 %v1256_v50, %s6856_s0 }
 0x13d   :  { %1001 = vrot.lane.b32.xlu1 %v971_v61, %s6854_s16 }
 0x141   :  { %1003 = vrot.lane.b32.xlu1 %v972_v60, %s6854_s16 }
 0x14b   :  { %v758_v30 = vpop.permute.xlu1 %757 }
 0x14c   :  { %797 = vst.msk [vmem:[#allocation3] sm:$0xff] %vm796_vm7, %v758_v30  ;;  %v470_v32 = vpop.permute.xlu0 %469  ;;  %v7423_v30 = vld [vmem:[#allocation2 + $0x3e] sm:$0xff] }
 0x14d   :  { %508 = vst.msk [vmem:[#allocation3 + $0x18] sm:$0xff] %vm506_vm5, %v470_v32  ;;  %v7425_v32 = vld [vmem:[#allocation2 + $0x44] sm:$0xff] }
 0x14f   :  { %v994_v41 = vpop.permute.xlu1 %993 }
 0x150   :  { %v615_v25 = vpop.permute.xlu0 %614  ;;  %1032 = vst.msk [vmem:[#allocation3 + $0x8] sm:$0xff] %vm506_vm5, %v994_v41 }
 0x151   :  { %653 = vst.msk [vmem:[#allocation3 + $0x18] sm:$0xff] %vm651_vm6, %v615_v25 }
 0x154   :  { %v760_v62 = vpop.permute.xlu0 %759 }
 0x155   :  { %798 = vst.msk [vmem:[#allocation3 + $0x18] sm:$0xff] %vm796_vm7, %v760_v62  ;;  %v1115_v62 = vmul.f32 %v7221_v27, %v7425_v32 }
 0x15c   :  { %v7390_v42 = vpop.permute.xlu1 %944 }
 0x161   :  { %v7392_v21 = vpop.permute.xlu0 %940  ;;  %v7394_v26 = vpop.permute.xlu1 %414 }
 0x166   :  { %v411_v6 = vpop.permute.xlu0 %410  ;;  %v7396_v45 = vpop.permute.xlu1 %1087 }
 0x167   :  { %v446_v44 = vmul.f32 %v905_v40, %v411_v6  ;;  %v200_v51 = vpop.f32.mrf.mxu0 }
 0x168   :  { %v201_v36 = vadd.f32 %v7143_v63, %v200_v51  ;;  %v735_v51 = vmul.f32 %v7257_v53, %v7358_v7 }
 0x169   :  { %477 = vrot.lane.b32.xlu0 %v446_v44, %s6854_s16  ;;  %v6042_v23 = vpop.f32.mrf.mxu0  ;;  %v7435_v44 = vld [vmem:[#allocation2 + $0x46] sm:$0xff] }
 0x16a   :  { %v7399_v28 = vpop.permute.xlu0 %418  ;;  %v224_v57 = vmax.f32 %v201_v36, 0.0  ;;  %v1425_v36 = vld [vmem:[#allocation3 + $0x18] sm:$0xff] }
 0x16b   :  { %v7401_v43 = vpop.permute.xlu1 %559  ;;  %v203_v40 = vpop.f32.mrf.mxu0  ;;  %v448_v23 = vmul.f32 %v7399_v28, %v7378_v29  ;;  %v7477_v28 = vld [vmem:[%s9328_s1 + $0x40] sm:$0xff] }
 0x16c   :  { %256 = vst.msk [vmem:[#allocation2 + $0x60] sm:$0xff] %vm227_vm4, %v224_v57  ;;  %v204_v39 = vadd.f32 %v7143_v63, %v203_v40  ;;  %v1422_v40 = vld [vmem:[#allocation3] sm:$0xff] }
 0x16d   :  { %v6043_v35 = vpop.f32.mrf.mxu0 }
 0x16e   :  { %v225_v50 = vmax.f32 %v204_v39, 0.0  ;;  %v7486_v39 = vld [vmem:[%s9328_s1 + $0x48] sm:$0xff] }
 0x16f   :  { %v1076_v5 = vpop.permute.xlu0 %1075  ;;  %v472_v34 = vpop.permute.xlu1 %471 }
 0x170   :  { %v1114_v8 = vmul.f32 %v1076_v5, %v7403_v58  ;;  %509 = vst.msk [vmem:[#allocation3 + $0x30] sm:$0xff] %vm506_vm5, %v472_v34  ;;  %v208_v18 = vpop.f32.mrf.mxu0  ;;  %v736_v5 = vmul.f32 %v7368_v49, %v7164_v3 }
 0x171   :  { %257 = vst.msk [vmem:[#allocation2 + $0x68] sm:$0xff] %vm227_vm4, %v225_v50 }
 0x172   :  { %1144 = vrot.lane.b32.xlu1 %v1114_v8, %s6855_s17  ;;  %v6046_v19 = vpop.f32.mrf.mxu0  ;;  %v1258_v8 = vmul.f32 %v7247_v31, %v7435_v44  ;;  %v6817_v31 = vld [vmem:[%s9328_s1 + $0x20] sm:$0xff] }
 0x173   :  { %v7408_v37 = vpop.permute.xlu0 %1083  ;;  %v617_v59 = vpop.permute.xlu1 %616 }
 0x174   :  { %654 = vst.msk [vmem:[#allocation3 + $0x30] sm:$0xff] %vm651_vm6, %v617_v59  ;;  %v211_v55 = vpop.f32.mrf.mxu0 }
 0x176   :  { %v6047_v25 = vpop.f32.mrf.mxu0 }
 0x177   :  { %v996_v54 = vpop.permute.xlu1 %995 }
 0x178   :  { %v556_v4 = vpop.permute.xlu0 %555  ;;  %1033 = vst.msk [vmem:[#allocation3 + $0x20] sm:$0xff] %vm506_vm5, %v996_v54 }
 0x179   :  { %v591_v16 = vmul.f32 %v1047_v48, %v556_v4  ;;  %v209_v48 = vadd.f32 %v7143_v63, %v208_v18 }
 0x17b   :  { %622 = vrot.lane.b32.xlu0 %v591_v16, %s6855_s17  ;;  %v1137_v9 = vpop.permute.xlu1 %1136  ;;  %v226_v56 = vmax.f32 %v209_v48, 0.0  ;;  %v1461_v16 = vpack.c.bf16 %v1425_v36, %v1422_v40 }
 0x17c   :  { %v564_v33 = vpop.permute.xlu0 %563  ;;  %1175 = vst.msk [vmem:[#allocation3 + $0x8] sm:$0xff] %vm651_vm6, %v1137_v9  ;;  %v7492_v9 = vld [vmem:[#allocation2 + $0x42] sm:$0xff] }
 0x17d   :  { %258 = vst.msk [vmem:[#allocation2 + $0x70] sm:$0x3] %vm244_vm8, %v226_v56  ;;  %v593_v53 = vmul.f32 %v7403_v58, %v564_v33  ;;  %v7496_v33 = vld [vmem:[#allocation2 + $0x4a] sm:$0xff]  ;;  %v973_v18 = vmul.f32 %v7392_v21, %v7492_v9 }
 0x17e   :  { %v974_v48 = vmul.f32 %v7390_v42, %v7496_v33  ;;  %v447_v42 = vmul.f32 %v7373_v15, %v7394_v26 }
 0x17f   :  { %708 = vperm.xlu0 %6142, %v7181_v0   ;;  %v1280_v61 = vpop.permute.xlu1 %1279 }
 0x180   :  { %1318 = vst.msk [vmem:[#allocation3 + $0x8] sm:$0xff] %vm796_vm7, %v1280_v61 }
 0x181   :  { %v1219_v60 = vpop.permute.xlu0 %1218 }
 0x182   :  { %v1257_v41 = vmul.f32 %v1219_v60, %v7423_v30 }
 0x183   :  { %6143 = vset.pattern.permute.xlu0 %v6851_v20  ;;  %v762_v63 = vpop.permute.xlu1 %761 }
 0x184   :  { %799 = vst.msk [vmem:[#allocation3 + $0x30] sm:$0xff] %vm796_vm7, %v762_v63  ;;  %845 = vperm.xlu0 %6143, %v7230_v12   ;;  %1287 = vrot.lane.b32.xlu1 %v1257_v41, %s6856_s0 }
 0x185   :  { %v474_v6 = vpop.permute.xlu0 %473 }
 0x186   :  { %510 = vst.msk [vmem:[#allocation3 + $0x48] sm:$0xff] %vm506_vm5, %v474_v6 }
 0x187   :  { %v1139_v34 = vpop.permute.xlu1 %1138  ;;  %v1423_v57 = vld [vmem:[#allocation3 + $0x8] sm:$0xff] }
 0x188   :  { %1176 = vst.msk [vmem:[#allocation3 + $0x20] sm:$0xff] %vm651_vm6, %v1139_v34  ;;  %767 = vrot.lane.b32.xlu0 %v736_v5, %s6856_s0  ;;  %1146 = vrot.lane.b32.xlu1 %v1115_v62, %s6855_s17  ;;  %v7518_v34 = vld [vmem:[#allocation2 + $0x4c] sm:$0xff] }
 0x189   :  { %v619_v59 = vpop.permute.xlu0 %618  ;;  %v1116_v15 = vmul.f32 %v7408_v37, %v7518_v34 }
 0x18a   :  { %655 = vst.msk [vmem:[#allocation3 + $0x48] sm:$0xff] %vm651_vm6, %v619_v59  ;;  %v7521_v59 = vld [vmem:[#allocation2 + $0x54] sm:$0xff] }
 0x18b   :  { %v1282_v27 = vpop.permute.xlu1 %1281  ;;  %v1428_v5 = vld [vmem:[#allocation3 + $0x30] sm:$0xff]  ;;  %v1117_v26 = vmul.f32 %v7396_v45, %v7521_v59 }
 0x18c   :  { %1319 = vst.msk [vmem:[#allocation3 + $0x20] sm:$0xff] %vm796_vm7, %v1282_v27  ;;  %853 = vperm.xlu0 %6143, %v7181_v0   ;;  %1289 = vrot.lane.b32.xlu1 %v1258_v8, %s6856_s0 }
 0x18d   :  { %v764_v3 = vpop.permute.xlu0 %763 }
 0x18e   :  { %800 = vst.msk [vmem:[#allocation3 + $0x48] sm:$0xff] %vm796_vm7, %v764_v3 }
 0x18f   :  { %v998_v49 = vpop.permute.xlu1 %997 }
 0x190   :  { %6146 = vset.pattern.permute.xlu0 %v6853_v24  ;;  %1365 = vperm.xlu1 %6144, %v7230_v12   ;;  %1034 = vst.msk [vmem:[#allocation3 + $0x38] sm:$0xff] %vm506_vm5, %v998_v49  ;;  %v592_v49 = vmul.f32 %v7361_v46, %v7401_v43 }
 0x191   :  { %1361 = vperm.xlu0 %6146, %v6817_v31   ;;  %v1227_v45 = vpop.permute.xlu0 %1226 }
 0x193   :  { %v7460_v54 = vpop.permute.xlu1 %1230  ;;  %v1426_v4 = vld [vmem:[#allocation3 + $0x20] sm:$0xff] }
 0x194   :  { %765 = vrot.lane.b32.xlu1 %v735_v51, %s6856_s0  ;;  %v1462_v12 = vpack.c.bf16 %v1426_v4, %v1423_v57  ;;  %v7539_v51 = vld [vmem:[#allocation2 + $0x4e] sm:$0xff] }
 0x195   :  { %481 = vrot.lane.b32.xlu0 %v448_v23, %s6854_s16  ;;  %6145 = vset.pattern.permute.xlu1 %v6851_v20  ;;  %v1431_v25 = vld [vmem:[#allocation3 + $0x48] sm:$0xff]  ;;  %v1259_v36 = vmul.f32 %v1227_v45, %v7539_v51 }
 0x196   :  { %1686 = vmatprep.mubr.bf16.mxu1 %v1462_v12  ;;  %v1464_v8 = vpack.c.bf16 %v1431_v25, %v1428_v5  ;;  %v7543_v23 = vld [vmem:[#allocation2 + $0x56] sm:$0xff] }
 0x197   :  { %1687 = vmatmul.mubr.bf16.vlgmr.msra.gmra.mxu1 %v1461_v16  ;;  %v1260_v46 = vmul.f32 %v7460_v54, %v7543_v23  ;;  %v7559_v54 = vld [vmem:[%s9328_s1 + $0x50] sm:$0xff] }
 0x198   :  { %849 = vperm.xlu1 %6145, %v7201_v38   ;;  %v7467_v7 = vpop.permute.xlu1 %704 }
 0x199   :  { %626 = vrot.lane.b32.xlu0 %v593_v53, %s6855_s17  ;;  %v737_v4 = vmul.f32 %v7423_v30, %v7467_v7  ;;  %v7568_v30 = vld [vmem:[%s9328_s1 + $0x58] sm:$0xff] }
 0x19c   :  { %6147 = vset.pattern.permute.xlu1 %v6852_v22  ;;  %v476_v29 = vpop.permute.xlu1 %475 }
 0x19d   :  { %511 = vst.msk [vmem:[#allocation3 + $0x60] sm:$0xff] %vm506_vm5, %v476_v29  ;;  %1369 = vperm.xlu0 %6146, %v7201_v38   ;;  %317 = vperm.xlu1 %6147, %v7201_v38  }
 0x1a0   :  { %v621_v58 = vpop.permute.xlu1 %620 }
 0x1a1   :  { %656 = vst.msk [vmem:[#allocation3 + $0x60] sm:$0xff] %vm651_vm6, %v621_v58  ;;  %6154 = vset.pattern.permute.xlu0 %v6846_v10  ;;  %322 = vperm.xlu1 %6147, %v7181_v0  }
 0x1a2   :  { %948 = vperm.xlu0 %6154, %v7477_v28  }
 0x1a4   :  { %v1000_v38 = vpop.permute.xlu1 %999 }
 0x1a5   :  { %1035 = vst.msk [vmem:[#allocation3 + $0x50] sm:$0xff] %vm506_vm5, %v1000_v38  ;;  %6148 = vset.pattern.permute.xlu1 %v6846_v10 }
 0x1a6   :  { %952 = vperm.xlu1 %6148, %v7486_v39  }
 0x1a8   :  { %v1141_v35 = vpop.permute.xlu1 %1140 }
 0x1a9   :  { %1177 = vst.msk [vmem:[#allocation3 + $0x38] sm:$0xff] %vm651_vm6, %v1141_v35 }
 0x1aa   :  { %6149 = vset.pattern.permute.xlu1 %v6842_v1 }
 0x1ab   :  { %422 = vperm.xlu1 %6149, %v7477_v28  }
 0x1ac   :  { %v1284_v50 = vpop.permute.xlu1 %1283 }
 0x1ad   :  { %1320 = vst.msk [vmem:[#allocation3 + $0x38] sm:$0xff] %vm796_vm7, %v1284_v50  ;;  %v7591_v50 = vld [vmem:[#allocation2 + $0x48] sm:$0xff] }
 0x1ae   :  { %v7505_v61 = vpop.f32.mrf.mxu0 }
 0x1af   :  { %1005 = vrot.lane.b32.xlu1 %v973_v18, %s6854_s16 }
 0x1b0   :  { %v1143_v19 = vpop.permute.xlu1 %1142  ;;  %6150 = vset.pattern.permute.xlu1 %v6847_v11  ;;  %v6054_v56 = vpop.f32.mrf.mxu0 }
 0x1b1   :  { %1178 = vst.msk [vmem:[#allocation3 + $0x50] sm:$0xff] %vm651_vm6, %v1143_v19 }
 0x1b2   :  { %v7509_v60 = vpop.f32.mrf.mxu0 }
 0x1b3   :  { %1007 = vrot.lane.b32.xlu1 %v974_v48, %s6854_s16  ;;  %v7601_v48 = vld [vmem:[%s9328_s1 + $0x60] sm:$0x3] }
 0x1b4   :  { %v1286_v55 = vpop.permute.xlu1 %1285  ;;  %v6055_v21 = vpop.f32.mrf.mxu0  ;;  %v1429_v63 = vld [vmem:[#allocation3 + $0x38] sm:$0xff] }
 0x1b5   :  { %1321 = vst.msk [vmem:[#allocation3 + $0x50] sm:$0xff] %vm796_vm7, %v1286_v55  ;;  %v7604_v21 = vld [vmem:[#allocation2 + $0x40] sm:$0xff] }
 0x1b7   :  { %1095 = vperm.xlu1 %6150, %v7486_v39  }
 0x1b8   :  { %v1002_v41 = vpop.permute.xlu1 %1001 }
 0x1b9   :  { %1036 = vst.msk [vmem:[#allocation3 + $0x68] sm:$0xff] %vm506_vm5, %v1002_v41 }
 0x1bb   :  { %479 = vrot.lane.b32.xlu1 %v447_v42, %s6854_s16 }
 0x1bc   :  { %6151 = vset.pattern.permute.xlu1 %v6848_v13  ;;  %v1432_v62 = vld [vmem:[#allocation3 + $0x50] sm:$0xff]  ;;  %v1004_v57 = vpop.permute.xlu1 %1003 }
 0x1bd   :  { %v1465_v6 = vpack.c.bf16 %v1432_v62, %v1429_v63 }
 0x1bf   :  { %567 = vperm.xlu1 %6151, %v7477_v28   ;;  %1694 = vmatprep.mubr.bf16.mxu1 %v1465_v6 }
 0x1c0   :  { %1695 = vmatmul.mubr.bf16.gmra.mxu1 %v1464_v8 }
 0x1c3   :  { %1148 = vrot.lane.b32.xlu1 %v1116_v15, %s6855_s17 }
 0x1c4   :  { %6152 = vset.pattern.permute.xlu1 %v6850_v17 }
 0x1c7   :  { %1150 = vrot.lane.b32.xlu1 %v1117_v26, %s6855_s17  ;;  %v7620_v26 = vld [vmem:[#allocation2 + $0x50] sm:$0xff] }
 0x1c8   :  { %v7530_v27 = vpop.f32.mrf.mxu0 }
 0x1ca   :  { %v6058_v3 = vpop.f32.mrf.mxu0 }
 0x1cb   :  { %1238 = vperm.xlu1 %6152, %v7486_v39  }
 0x1cc   :  { %v7535_v31 = vpop.f32.mrf.mxu0 }
 0x1ce   :  { %v6059_v37 = vpop.f32.mrf.mxu0 }
 0x1cf   :  { %624 = vrot.lane.b32.xlu1 %v592_v49, %s6855_s17 }
 0x1d0   :  { %6153 = vset.pattern.permute.xlu1 %v6849_v14 }
 0x1d3   :  { %712 = vperm.xlu1 %6153, %v7477_v28  }
 0x1d7   :  { %1291 = vrot.lane.b32.xlu1 %v1259_v36, %s6856_s0 }
 0x1d8   :  { %6155 = vset.pattern.permute.xlu1 %v6853_v24 }
 0x1db   :  { %v478_v43 = vpop.permute.xlu0 %477  ;;  %1293 = vrot.lane.b32.xlu1 %v1260_v46, %s6856_s0 }
 0x1dc   :  { %512 = vst.msk [vmem:[#allocation3 + $0x78] sm:$0xff] %vm506_vm5, %v478_v43 }
 0x1df   :  { %1373 = vperm.xlu1 %6155, %v7181_v0  }
 0x1e3   :  { %769 = vrot.lane.b32.xlu1 %v737_v4, %s6856_s0 }
 0x1e4   :  { %v1145_v12 = vpop.permute.xlu1 %1144  ;;  %6156 = vset.pattern.permute.xlu1 %v6846_v10 }
 0x1e5   :  { %1179 = vst.msk [vmem:[#allocation3 + $0x68] sm:$0xff] %vm651_vm6, %v1145_v12 }
 0x1e7   :  { %956 = vperm.xlu1 %6156, %v7559_v54  }
 0x1eb   :  { %6158 = vset.pattern.permute.xlu1 %v6842_v1 }
 0x1ec   :  { %430 = vperm.xlu1 %6158, %v7559_v54  }
 0x1ed   :  { %v623_v0 = vpop.permute.xlu0 %622 }
 0x1ee   :  { %657 = vst.msk [vmem:[#allocation3 + $0x78] sm:$0xff] %vm651_vm6, %v623_v0 }
 0x1f0   :  { %434 = vperm.xlu1 %6158, %v7568_v30  }
 0x1f4   :  { %6160 = vset.pattern.permute.xlu1 %v6847_v11 }
 0x1f5   :  { %1103 = vperm.xlu1 %6160, %v7568_v30  }
 0x1f6   :  { %v1288_v40 = vpop.permute.xlu1 %1287 }
 0x1f7   :  { %1322 = vst.msk [vmem:[#allocation3 + $0x68] sm:$0xff] %vm796_vm7, %v1288_v40 }
 0x1f9   :  { %6161 = vset.pattern.permute.xlu1 %v6848_v13 }
 0x1fa   :  { %v709_v16 = vpop.permute.xlu0 %708  ;;  %575 = vperm.xlu1 %6161, %v7559_v54   ;;  %v1147_v7 = vpop.permute.xlu1 %1146 }
 0x1fb   :  { %v738_v53 = vmul.f32 %v7435_v44, %v709_v16  ;;  %v7655_v16 = vld [vmem:[#allocation2 + $0x52] sm:$0xff] }
 0x1fd   :  { %771 = vrot.lane.b32.xlu0 %v738_v53, %s6856_s0 }
 0x1fe   :  { %6163 = vset.pattern.permute.xlu1 %v6850_v17  ;;  %v1290_v38 = vpop.permute.xlu1 %1289  ;;  %v1435_v41 = vld [vmem:[#allocation3 + $0x68] sm:$0xff] }
 0x1ff   :  { %v846_v29 = vpop.permute.xlu0 %845  ;;  %1242 = vperm.xlu1 %6163, %v7559_v54  }
 0x200   :  { %v881_v58 = vmul.f32 %v7265_v47, %v846_v29 }
 0x201   :  { %960 = vperm.xlu0 %6154, %v7568_v30  }
 0x202   :  { %894 = vst.msk [vmem:[#allocation3 + $0x80] sm:$0xff] %vm227_vm4, %v881_v58 }
 0x203   :  { %1037 = vst.msk [vmem:[#allocation3 + $0x80] sm:$0xff] %vm506_vm5, %v1004_v57  ;;  %v768_v35 = vpop.permute.xlu0 %767  ;;  %1246 = vperm.xlu1 %6163, %v7568_v30  }
 0x204   :  { %1180 = vst.msk [vmem:[#allocation3 + $0x80] sm:$0xff] %vm651_vm6, %v1147_v7 }
 0x205   :  { %802 = vst.msk [vmem:[#allocation3 + $0x78] sm:$0xff] %vm796_vm7, %v768_v35  ;;  %1323 = vst.msk [vmem:[#allocation3 + $0x80] sm:$0xff] %vm796_vm7, %v1290_v38  ;;  %6157 = vset.pattern.permute.xlu0 %v6847_v11 }
 0x206   :  { %1091 = vperm.xlu0 %6157, %v7477_v28  }
 0x207   :  { %v854_v44 = vpop.permute.xlu0 %853  ;;  %6165 = vset.pattern.permute.xlu1 %v6849_v14 }
 0x208   :  { %v883_v18 = vmul.f32 %v854_v44, %v7591_v50  ;;  %724 = vperm.xlu1 %6165, %v7568_v30  }
 0x20a   :  { %896 = vst.msk [vmem:[#allocation3 + $0xb0] sm:$0xff] %vm227_vm4, %v883_v18  ;;  %1099 = vperm.xlu0 %6157, %v7559_v54  }
 0x20b   :  { %v1366_v19 = vpop.permute.xlu1 %1365 }
 0x20c   :  { %v1401_v56 = vmul.f32 %v1366_v19, %v7591_v50  ;;  %v1362_v55 = vpop.permute.xlu0 %1361  ;;  %6166 = vset.pattern.permute.xlu1 %v6846_v10  ;;  %v1438_v42 = vld [vmem:[#allocation3 + $0x80] sm:$0xff]  ;;  %v1437_v37 = vld [vmem:[#allocation3 + $0x78] sm:$0xff] }
 0x20d   :  { %v1400_v25 = vmul.f32 %v1362_v55, %v7604_v21  ;;  %964 = vperm.xlu1 %6166, %v7601_v48   ;;  %v1468_v63 = vpack.c.bf16 %v1438_v42, %v1435_v41  ;;  %v7681_v41 = vld [vmem:[%s9332_s5] ss:$0 sm:$0xff] }
 0x20e   :  { %1414 = vst.msk [vmem:[#allocation3 + $0x88] sm:$0xff] %vm227_vm4, %v1401_v56  ;;  %6159 = vset.pattern.permute.xlu0 %v6848_v13 }
 0x20f   :  { %1413 = vst.msk [vmem:[#allocation3 + $0x70] sm:$0xff] %vm227_vm4, %v1400_v25  ;;  %1702 = vmatprep.mubr.bf16.mxu1 %v1468_v63  ;;  %v766_v62 = vpop.permute.xlu1 %765  ;;  %571 = vperm.xlu0 %6159, %v7486_v39   ;;  %v7683_v63 = vld [vmem:[#allocation2 + $0x58] sm:$0xff] }
 0x210   :  { %801 = vst.msk [vmem:[#allocation3 + $0x60] sm:$0xff] %vm796_vm7, %v766_v62  ;;  %v482_v10 = vpop.permute.xlu0 %481 }
 0x211   :  { %6168 = vset.pattern.permute.xlu1 %v6847_v11 }
 0x212   :  { %1107 = vperm.xlu1 %6168, %v7601_v48  }
 0x213   :  { %v850_v6 = vpop.permute.xlu1 %849  ;;  %579 = vperm.xlu0 %6159, %v7568_v30  }
 0x214   :  { %v882_v5 = vmul.f32 %v7604_v21, %v850_v6  ;;  %v627_v8 = vpop.permute.xlu0 %626 }
 0x215   :  { %v1439_v15 = vld [vmem:[#allocation3 + $0x88] sm:$0xff] }
 0x216   :  { %895 = vst.msk [vmem:[#allocation3 + $0x98] sm:$0xff] %vm227_vm4, %v882_v5  ;;  %6169 = vset.pattern.permute.xlu1 %v6848_v13  ;;  %v1436_v3 = vld [vmem:[#allocation3 + $0x70] sm:$0xff] }
 0x217   :  { %6162 = vset.pattern.permute.xlu0 %v6849_v14  ;;  %583 = vperm.xlu1 %6169, %v7601_v48   ;;  %v1469_v11 = vpack.c.bf16 %v1439_v15, %v1436_v3  ;;  %v1434_v49 = vld [vmem:[#allocation3 + $0x60] sm:$0xff] }
 0x218   :  { %v1370_v45 = vpop.permute.xlu0 %1369  ;;  %v318_v36 = vpop.permute.xlu1 %317  ;;  %716 = vperm.xlu0 %6162, %v7486_v39   ;;  %v1467_v46 = vpack.c.bf16 %v1437_v37, %v1434_v49 }
 0x219   :  { %v1402_v43 = vmul.f32 %v1370_v45, %v7620_v26  ;;  %v356_v57 = vmul.f32 %v7216_v52, %v318_v36  ;;  %6061 = vmatmul.mubr.msk.bf16.gmra.mxu0 %vm227_vm4, %v1469_v11 }
 0x21a   :  { %1703 = vmatmul.mubr.bf16.gmra.mxu1 %v1467_v46  ;;  %6064 = vmatprep.mubr.msk.bf16.mxu0 %vm6845_vm2, %v6843_v2 }
 0x21b   :  { %1415 = vst.msk [vmem:[#allocation3 + $0xa0] sm:$0xff] %vm227_vm4, %v1402_v43  ;;  %369 = vst.msk [vmem:[#allocation3 + $0x90] sm:$0xff] %vm227_vm4, %v356_v57  ;;  %6170 = vset.pattern.permute.xlu1 %v6849_v14 }
 0x21c   :  { %v323_v13 = vpop.permute.xlu1 %322  ;;  %720 = vperm.xlu0 %6162, %v7559_v54   ;;  %728 = vperm.xlu1 %6170, %v7601_v48  }
 0x21d   :  { %v357_v4 = vmul.f32 %v7265_v47, %v323_v13  ;;  %v949_v0 = vpop.permute.xlu0 %948 }
 0x21f   :  { %370 = vst.msk [vmem:[#allocation3 + $0xa8] sm:$0xff] %vm227_vm4, %v357_v4 }
 0x220   :  { %514 = vst.msk [vmem:[#allocation3 + $0xa8] sm:$0xff] %vm506_vm5, %v482_v10  ;;  %6164 = vset.pattern.permute.xlu0 %v6842_v1  ;;  %6171 = vset.pattern.permute.xlu1 %v6851_v20  ;;  %v7649_v1 = vld [vmem:[#allocation2 + $0x5a] sm:$0xff] }
 0x221   :  { %659 = vst.msk [vmem:[#allocation3 + $0xa8] sm:$0xff] %vm651_vm6, %v627_v8  ;;  %v953_v52 = vpop.permute.xlu1 %952  ;;  %426 = vperm.xlu0 %6164, %v7486_v39   ;;  %857 = vperm.xlu1 %6171, %v7477_v28  }
 0x222   :  { %v976_v12 = vmul.f32 %v953_v52, %v7649_v1 }
 0x225   :  { %438 = vperm.xlu0 %6164, %v7601_v48   ;;  %6172 = vset.pattern.permute.xlu1 %v6852_v22 }
 0x226   :  { %v423_v14 = vpop.permute.xlu1 %422  ;;  %327 = vperm.xlu1 %6172, %v7477_v28  }
 0x227   :  { %v449_v7 = vmul.f32 %v7492_v9, %v423_v14 }
 0x229   :  { %6167 = vset.pattern.permute.xlu0 %v6850_v17  ;;  %v975_v17 = vmul.f32 %v949_v0, %v7655_v16 }
 0x22a   :  { %v1006_v47 = vpop.permute.xlu1 %1005  ;;  %1234 = vperm.xlu0 %6167, %v7477_v28   ;;  %332 = vperm.xlu1 %6172, %v7486_v39  }
 0x22b   :  { %1038 = vst.msk [vmem:[#allocation3 + $0x98] sm:$0xff] %vm506_vm5, %v1006_v47 }
 0x22e   :  { %1250 = vperm.xlu0 %6167, %v7601_v48   ;;  %v1008_v40 = vpop.permute.xlu1 %1007  ;;  %1011 = vrot.lane.b32.xlu1 %v976_v12, %s6854_s16 }
 0x22f   :  { %1039 = vst.msk [vmem:[#allocation3 + $0xb0] sm:$0xff] %vm506_vm5, %v1008_v40  ;;  %6174 = vset.pattern.permute.xlu1 %v6853_v24 }
 0x232   :  { %v7660_v53 = vpop.permute.xlu1 %1095  ;;  %1009 = vrot.lane.b32.xlu0 %v975_v17, %s6854_s16 }
 0x233   :  { %6173 = vset.pattern.permute.xlu0 %v6853_v24 }
 0x236   :  { %v480_v29 = vpop.permute.xlu1 %479  ;;  %483 = vrot.lane.b32.xlu0 %v449_v7, %s6854_s16 }
 0x237   :  { %513 = vst.msk [vmem:[#allocation3 + $0x90] sm:$0xff] %vm506_vm5, %v480_v29 }
 0x23a   :  { %v7667_v58 = vpop.permute.xlu1 %567 }
 0x23e   :  { %v1149_v38 = vpop.permute.xlu1 %1148 }
 0x23f   :  { %1181 = vst.msk [vmem:[#allocation3 + $0x98] sm:$0xff] %vm651_vm6, %v1149_v38 }
 0x242   :  { %v1151_v35 = vpop.permute.xlu1 %1150 }
 0x243   :  { %1182 = vst.msk [vmem:[#allocation3 + $0xb0] sm:$0xff] %vm651_vm6, %v1151_v35 }
 0x246   :  { %v7671_v44 = vpop.permute.xlu1 %1238 }
 0x24a   :  { %v625_v18 = vpop.permute.xlu1 %624 }
 0x24b   :  { %658 = vst.msk [vmem:[#allocation3 + $0x90] sm:$0xff] %vm651_vm6, %v625_v18 }
 0x24e   :  { %v7674_v19 = vpop.permute.xlu1 %712 }
 0x252   :  { %v1292_v9 = vpop.permute.xlu1 %1291 }
 0x253   :  { %1324 = vst.msk [vmem:[#allocation3 + $0x98] sm:$0xff] %vm796_vm7, %v1292_v9 }
 0x256   :  { %v1294_v56 = vpop.permute.xlu1 %1293 }
 0x257   :  { %1325 = vst.msk [vmem:[#allocation3 + $0xb0] sm:$0xff] %vm796_vm7, %v1294_v56  ;;  %v5967_v55 = vpop.f32.mrf.mxu1 }
 0x259   :  { %v5968_v42 = vpop.f32.mrf.mxu1 }
 0x25a   :  { %v5969_v25 = vadd.f32 %v5968_v42, %v5967_v55  ;;  %v1374_v62 = vpop.permute.xlu1 %1373  ;;  %v1441_v49 = vld [vmem:[#allocation3 + $0x98] sm:$0xff] }
 0x25b   :  { %v1403_v10 = vmul.f32 %v1374_v62, %v7683_v63  ;;  %v5970_v6 = vpop.f32.mrf.mxu1  ;;  %v1053_v62 = vld [vmem:[#allocation2 + $0x5c] sm:$0xff] }
 0x25c   :  { %v1689_v5 = vadd.f32 %v5969_v25, %v7681_v41 }
 0x25d   :  { %1416 = vst.msk [vmem:[#allocation3 + $0xb8] sm:$0xff] %vm227_vm4, %v1403_v10  ;;  %v5971_v8 = vpop.f32.mrf.mxu1 }
 0x25e   :  { %v1777_v15 = vadd.f32 %v7505_v61, %v1689_v5  ;;  %v5972_v3 = vadd.f32 %v5971_v8, %v5970_v6  ;;  %v770_v11 = vpop.permute.xlu1 %769  ;;  %v1444_v37 = vld [vmem:[#allocation3 + $0xb0] sm:$0xff]  ;;  %v1442_v61 = vld [vmem:[#allocation3 + $0xa0] sm:$0xff] }
 0x25f   :  { %803 = vst.msk [vmem:[#allocation3 + $0x90] sm:$0xff] %vm796_vm7, %v770_v11  ;;  %v1471_v45 = vpack.c.bf16 %v1444_v37, %v1441_v49  ;;  %v594_v49 = vmul.f32 %v7425_v32, %v7667_v58 }
 0x260   :  { %v1830_v36 = vmax.f32 %v1777_v15, 0.0  ;;  %v1692_v46 = vadd.f32 %v5972_v3, %v7681_v41 }
 0x261   :  { %1710 = vmatprep.mubr.bf16.mxu1 %v1471_v45 }
 0x262   :  { %1844 = vst.msk [vmem:[#allocation4] sm:$0xff] %vm1843_vm9, %v1830_v36  ;;  %v1780_v43 = vadd.f32 %v7509_v60, %v1692_v46  ;;  %v7693_v57 = vpop.permute.xlu1 %956 }
 0x264   :  { %v1831_v13 = vmax.f32 %v1780_v43, 0.0  ;;  %v1445_v4 = vld [vmem:[#allocation3 + $0xb8] sm:$0xff] }
 0x265   :  { %v1472_v52 = vpack.c.bf16 %v1445_v4, %v1442_v61 }
 0x266   :  { %1845 = vst.msk [vmem:[#allocation4 + $0x8] sm:$0xff] %vm1843_vm9, %v1831_v13  ;;  %v1440_v38 = vld [vmem:[#allocation3 + $0x90] sm:$0xff] }
 0x267   :  { %6065 = vmatmul.mubr.msk.bf16.gmra.mxu0 %vm227_vm4, %v1472_v52  ;;  %v7697_v14 = vpop.permute.xlu1 %430 }
 0x268   :  { %6068 = vmatprep.mubr.msk.bf16.mxu0 %vm6845_vm2, %v6843_v2 }
 0x269   :  { %v1874_v47 = vld [vmem:[#allocation4 + $0x4] sm:$0x3]  ;;  %v1858_v60 = vld [vmem:[#allocation4] sm:$0x3] }
 0x26a   :  { %1875 = vst.msk [vmem:[#allocation5 + $0x2] sm:$0x3] %vm1856_vm10, %v1874_v47  ;;  %1859 = vst.msk [vmem:[#allocation5] sm:$0x3] %vm1856_vm10, %v1858_v60 }
 0x26b   :  { %v7703_v12 = vpop.permute.xlu1 %434 }
 0x26d   :  { %v1904_v0 = vld [vmem:[#allocation4 + $0xc] sm:$0x3]  ;;  %v1889_v40 = vld [vmem:[#allocation4 + $0x8] sm:$0x3] }
 0x26e   :  { %1905 = vst.msk [vmem:[#allocation5 + $0x6] sm:$0x3] %vm1856_vm10, %v1904_v0  ;;  %1890 = vst.msk [vmem:[#allocation5 + $0x4] sm:$0x3] %vm1856_vm10, %v1889_v40 }
 0x26f   :  { %v772_v17 = vpop.permute.xlu0 %771 }
 0x270   :  { %804 = vst.msk [vmem:[#allocation3 + $0xa8] sm:$0xff] %vm796_vm7, %v772_v17  ;;  %v7708_v7 = vpop.permute.xlu1 %1103 }
 0x275   :  { %v7710_v29 = vpop.permute.xlu1 %575 }
 0x277   :  { %v1443_v35 = vld [vmem:[#allocation3 + $0xa8] sm:$0xff] }
 0x278   :  { %v1470_v18 = vpack.c.bf16 %v1443_v35, %v1440_v38 }
 0x27a   :  { %1711 = vmatmul.mubr.bf16.gmra.mxu1 %v1470_v18  ;;  %v7712_v9 = vpop.permute.xlu1 %1242 }
 0x27c   :  { %v7714_v56 = vpop.permute.xlu0 %960 }
 0x27e   :  { %v7716_v55 = vpop.permute.xlu1 %1246 }
 0x280   :  { %v5973_v42 = vpop.f32.mrf.mxu1 }
 0x281   :  { %v1092_v25 = vpop.permute.xlu0 %1091 }
 0x282   :  { %v1118_v10 = vmul.f32 %v1092_v25, %v1053_v62  ;;  %v5974_v6 = vpop.f32.mrf.mxu1 }
 0x283   :  { %v5975_v5 = vadd.f32 %v5974_v6, %v5973_v42  ;;  %v7718_v8 = vpop.permute.xlu1 %724 }
 0x284   :  { %1152 = vrot.lane.b32.xlu0 %v1118_v10, %s6855_s17  ;;  %v5976_v15 = vpop.f32.mrf.mxu1  ;;  %v1054_v10 = vld [vmem:[#allocation2 + $0x64] sm:$0xff] }
 0x285   :  { %v1697_v3 = vadd.f32 %v5975_v5, %v7681_v41  ;;  %v7722_v11 = vpop.permute.xlu0 %1099  ;;  %v1119_v5 = vmul.f32 %v7660_v53, %v1054_v10  ;;  %v6238_v10 = vld [vmem:[%s9333_s6 + $0x114] ss:$8 sps:$4 sm:$0xff]  }
 0x286   :  { %v5977_v37 = vpop.f32.mrf.mxu1 }
 0x287   :  { %v1785_v45 = vadd.f32 %v7530_v27, %v1697_v3  ;;  %v5978_v36 = vadd.f32 %v5977_v37, %v5976_v15 }
 0x288   :  { %628 = vrot.lane.b32.xlu0 %v594_v49, %s6855_s17  ;;  %v7728_v46 = vpop.permute.xlu1 %964  ;;  %v7759_v49 = vld [vmem:[#allocation2 + $0x5e] sm:$0xff] }
 0x289   :  { %v1832_v43 = vmax.f32 %v1785_v45, 0.0  ;;  %v1700_v13 = vadd.f32 %v5978_v36, %v7681_v41  ;;  %v7761_v45 = vld [vmem:[#allocation2 + $0x66] sm:$0xff] }
 0x28a   :  { %v572_v61 = vpop.permute.xlu0 %571 }
 0x28b   :  { %1846 = vst.msk [vmem:[#allocation4 + $0x10] sm:$0xff] %vm1843_vm9, %v1832_v43  ;;  %v1788_v4 = vadd.f32 %v7535_v31, %v1700_v13 }
 0x28d   :  { %v1833_v52 = vmax.f32 %v1788_v4, 0.0  ;;  %v7733_v47 = vpop.permute.xlu1 %1107  ;;  %v6215_v4 = vld [vmem:[%s9333_s6 + $0x150] ss:$8 sps:$4 sm:$0xff]  }
 0x28e   :  { %v580_v32 = vpop.permute.xlu0 %579 }
 0x28f   :  { %1847 = vst.msk [vmem:[#allocation4 + $0x18] sm:$0xff] %vm1843_vm9, %v1833_v52  ;;  %v7736_v27 = vmul.f32 %v1053_v62, %v580_v32  ;;  %v6218_v32 = vld [vmem:[%s9333_s6 + $0x140] ss:$8 sps:$4 sm:$0xff]  }
 0x292   :  { %v7738_v58 = vpop.permute.xlu1 %583  ;;  %v1919_v60 = vld [vmem:[#allocation4 + $0x10] sm:$0x3]  ;;  %v1934_v40 = vld [vmem:[#allocation4 + $0x14] sm:$0x3] }
 0x293   :  { %v717_v0 = vpop.permute.xlu0 %716  ;;  %1920 = vst.msk [vmem:[#allocation5 + $0x8] sm:$0x3] %vm1856_vm10, %v1919_v60  ;;  %1935 = vst.msk [vmem:[#allocation5 + $0xa] sm:$0x3] %vm1856_vm10, %v1934_v40  ;;  %v6221_v60 = vld [vmem:[%s9333_s6 + $0x70] ss:$8 sps:$4 sm:$0xff]  }
 0x294   :  { %v740_v13 = vmul.f32 %v7543_v23, %v717_v0  ;;  %v6212_v23 = vld [vmem:[%s9333_s6 + $0x160] ss:$8 sps:$4 sm:$0xff]   ;;  %v1055_v0 = vld [vmem:[#allocation2 + $0x6c] sm:$0xff] }
 0x295   :  { %v912_v40 = vld [vmem:[#allocation2 + $0x62] sm:$0xff] }
 0x296   :  { %v1949_v17 = vld [vmem:[#allocation4 + $0x18] sm:$0x3]  ;;  %v1964_v35 = vld [vmem:[#allocation4 + $0x1c] sm:$0x3] }
 0x297   :  { %v7742_v38 = vpop.permute.xlu0 %720  ;;  %v7744_v31 = vpop.permute.xlu1 %728  ;;  %1950 = vst.msk [vmem:[#allocation5 + $0xc] sm:$0x3] %vm1856_vm10, %v1949_v17  ;;  %1965 = vst.msk [vmem:[#allocation5 + $0xe] sm:$0x3] %vm1856_vm10, %v1964_v35  ;;  %v6226_v17 = vld [vmem:[%s9333_s6 + $0x134] ss:$8 sps:$4 sm:$0xff]   ;;  %v977_v35 = vmul.f32 %v7693_v57, %v912_v40  ;;  %v596_v57 = vmul.f32 %v7521_v59, %v7710_v29 }
 0x298   :  { %v6236_v59 = vld [vmem:[%s9333_s6 + $0x110] ss:$8 sps:$4 sm:$0xff]   ;;  %v6241_v29 = vld [vmem:[%s9333_s6 + $0x44] ss:$8 sps:$4 sm:$0xff]   ;;  %v6262_v40 = vld [vmem:[%s9333_s6 + $0x1d4] ss:$8 sps:$4 sm:$0xff]  }
 0x29c   :  { %v427_v18 = vpop.permute.xlu0 %426  ;;  %v858_v42 = vpop.permute.xlu1 %857 }
 0x29d   :  { %v450_v25 = vmul.f32 %v7496_v33, %v427_v18  ;;  %v884_v62 = vmul.f32 %v7620_v26, %v858_v42  ;;  %v595_v33 = vmul.f32 %v7518_v34, %v572_v61  ;;  %v6232_v18 = vld [vmem:[%s9333_s6 + $0x124] ss:$8 sps:$4 sm:$0xff]   ;;  %v6235_v42 = vld [vmem:[%s9333_s6 + $0x54] ss:$8 sps:$4 sm:$0xff]  }
 0x29f   :  { %897 = vst.msk [vmem:[#allocation3 + $0xc8] sm:$0xff] %vm227_vm4, %v884_v62  ;;  %485 = vrot.lane.b32.xlu1 %v450_v25, %s6854_s16  ;;  %v6233_v25 = vld [vmem:[%s9333_s6 + $0x50] ss:$8 sps:$4 sm:$0xff]  }
 0x2a0   :  { %v7752_v6 = vpop.permute.xlu0 %438  ;;  %v1198_v62 = vld [vmem:[#allocation2 + $0x6e] sm:$0xff] }
 0x2a1   :  { %v328_v15 = vpop.permute.xlu1 %327 }
 0x2a2   :  { %v358_v3 = vmul.f32 %v7604_v21, %v328_v15  ;;  %v1262_v21 = vmul.f32 %v7671_v44, %v7761_v45  ;;  %v913_v44 = vld [vmem:[#allocation2 + $0x6a] sm:$0xff]  ;;  %v1263_v15 = vmul.f32 %v7712_v9, %v1198_v62  ;;  %v5510_v62 = vld.sshfl [vmem:[#allocation4 + $0x2] sm:$0x3 pattern:$0x76325410] }
 0x2a3   :  { %1154 = vrot.lane.b32.xlu1 %v1119_v5, %s6855_s17  ;;  %v978_v52 = vmul.f32 %v7714_v56, %v913_v44  ;;  %v6223_v56 = vld [vmem:[%s9333_s6 + $0x74] ss:$8 sps:$4 sm:$0xff]   ;;  %v6242_v9 = vld [vmem:[%s9333_s6 + $0x100] ss:$8 sps:$4 sm:$0xff]  }
 0x2a4   :  { %371 = vst.msk [vmem:[#allocation3 + $0xc0] sm:$0xff] %vm227_vm4, %v358_v3  ;;  %4761 = vmatprep.subr.bf16.mxu1 %v6223_v56  ;;  %v1056_v5 = vld [vmem:[#allocation2 + $0x74] sm:$0xff]  ;;  %v6239_v3 = vld [vmem:[%s9333_s6 + $0x40] ss:$8 sps:$4 sm:$0xff]  }
 0x2a5   :  { %v1235_v26 = vpop.permute.xlu0 %1234  ;;  %v333_v37 = vpop.permute.xlu1 %332  ;;  %4762 = vmatpush1.bf16.msra.mxu1 %v6221_v60 }
 0x2a6   :  { %v1261_v36 = vmul.f32 %v1235_v26, %v7759_v49  ;;  %v359_v43 = vmul.f32 %v7591_v50, %v333_v37  ;;  %v739_v50 = vmul.f32 %v7539_v51, %v7674_v19  ;;  %v6209_v51 = vld [vmem:[%s9333_s6 + $0x170] ss:$8 sps:$4 sm:$0xff]   ;;  %v6217_v19 = vld [vmem:[%s9333_s6 + $0x154] ss:$8 sps:$4 sm:$0xff]   ;;  %v1121_v26 = vmul.f32 %v7708_v7, %v1056_v5 }
 0x2a7   :  { %630 = vrot.lane.b32.xlu1 %v595_v33, %s6855_s17  ;;  %v6244_v33 = vld [vmem:[%s9333_s6 + $0x104] ss:$8 sps:$4 sm:$0xff]   ;;  %v6245_v7 = vld [vmem:[%s9333_s6 + $0x30] ss:$8 sps:$4 sm:$0xff]  }
 0x2a8   :  { %372 = vst.msk [vmem:[#allocation3 + $0xd8] sm:$0xff] %vm227_vm4, %v359_v43  ;;  %1295 = vrot.lane.b32.xlu0 %v1261_v36, %s6856_s0  ;;  %v6250_v43 = vld [vmem:[%s9333_s6 + $0x1f4] ss:$8 sps:$4 sm:$0xff]  }
 0x2a9   :  { %v7770_v34 = vpop.permute.xlu0 %1250 }
 0x2ab   :  { %1297 = vrot.lane.b32.xlu1 %v1262_v21, %s6856_s0 }
 0x2ac   :  { %1377 = vperm.xlu0 %6173, %v7477_v28   ;;  %v6211_v28 = vld [vmem:[%s9333_s6 + $0x174] ss:$8 sps:$4 sm:$0xff]  }
 0x2ad   :  { %v1010_v53 = vpop.permute.xlu0 %1009  ;;  %4802 = vmatprep.subr.bf16.mxu0 %v6211_v28 }
 0x2ae   :  { %1040 = vst.msk [vmem:[#allocation3 + $0xc8] sm:$0xff] %vm506_vm5, %v1010_v53  ;;  %4803 = vmatpush1.bf16.msra.mxu0 %v6209_v51  ;;  %v1199_v53 = vld [vmem:[#allocation2 + $0x76] sm:$0xff]  ;;  %v5511_v51 = vld.sshfl [vmem:[#allocation4 + $0x6] sm:$0x3 pattern:$0x76325410] }
 0x2af   :  { %1381 = vperm.xlu1 %6174, %v7486_v39   ;;  %v1264_v44 = vmul.f32 %v7716_v55, %v1199_v53  ;;  %v6257_v55 = vld [vmem:[%s9333_s6 + $0x10] ss:$8 sps:$4 sm:$0xff]   ;;  %v6287_v53 = vld [vmem:[%s9333_s6 + $0xc0] ss:$8 sps:$4 sm:$0xff]  }
 0x2b0   :  { %775 = vrot.lane.b32.xlu0 %v740_v13, %s6856_s0 }
 0x2b1   :  { %v484_v61 = vpop.permute.xlu0 %483 }
 0x2b2   :  { %515 = vst.msk [vmem:[#allocation3 + $0xc0] sm:$0xff] %vm506_vm5, %v484_v61 }
 0x2b3   :  { %773 = vrot.lane.b32.xlu1 %v739_v50, %s6856_s0  ;;  %v6251_v50 = vld [vmem:[%s9333_s6 + $0x20] ss:$8 sps:$4 sm:$0xff]  }
 0x2b4   :  { %1389 = vperm.xlu0 %6173, %v7568_v30  }
 0x2b7   :  { %1385 = vperm.xlu1 %6174, %v7559_v54  }
 0x2b8   :  { %6175 = vset.pattern.permute.xlu0 %v6851_v20 }
 0x2b9   :  { %861 = vperm.xlu0 %6175, %v7486_v39   ;;  %v6214_v39 = vld [vmem:[%s9333_s6 + $0x164] ss:$8 sps:$4 sm:$0xff]  }
 0x2ba   :  { %4804 = vmatprep.subr.bf16.mxu0 %v6214_v39 }
 0x2bb   :  { %6176 = vset.pattern.permute.xlu1 %v6851_v20  ;;  %4805 = vmatpush1.bf16.msra.mxu0 %v6212_v23  ;;  %v6256_v23 = vld [vmem:[%s9333_s6 + $0x1e4] ss:$8 sps:$4 sm:$0xff]  }
 0x2bc   :  { %865 = vperm.xlu1 %6176, %v7559_v54   ;;  %4806 = vmatprep.subr.bf16.mxu0 %v6217_v19  ;;  %v914_v19 = vld [vmem:[#allocation2 + $0x72] sm:$0x3] }
 0x2bd   :  { %869 = vperm.xlu0 %6175, %v7568_v30  }
 0x2bf   :  { %4807 = vmatpush1.bf16.msra.mxu0 %v6215_v4 }
 0x2c0   :  { %6177 = vset.pattern.permute.xlu1 %v6853_v24 }
 0x2c1   :  { %6179 = vset.pattern.permute.xlu0 %v6852_v22  ;;  %1393 = vperm.xlu1 %6177, %v7601_v48  }
 0x2c2   :  { %342 = vperm.xlu0 %6179, %v7568_v30   ;;  %v6220_v30 = vld [vmem:[%s9333_s6 + $0x144] ss:$8 sps:$4 sm:$0xff]  }
 0x2c3   :  { %4808 = vmatprep.subr.bf16.mxu0 %v6220_v30  ;;  %v6254_v30 = vld [vmem:[%s9333_s6 + $0x1e0] ss:$8 sps:$4 sm:$0xff]  }
 0x2c4   :  { %4809 = vmatpush1.bf16.msra.mxu0 %v6218_v32  ;;  %v6259_v32 = vld [vmem:[%s9333_s6 + $0x14] ss:$8 sps:$4 sm:$0xff]  }
 0x2c5   :  { %6178 = vset.pattern.permute.xlu1 %v6852_v22  ;;  %4810 = vmatprep.subr.bf16.mxu0 %v6226_v17  ;;  %v1057_v17 = vld [vmem:[#allocation2 + $0x7c] sm:$0x3] }
 0x2c6   :  { %337 = vperm.xlu1 %6178, %v7559_v54   ;;  %1015 = vrot.lane.b32.xlu0 %v978_v52, %s6854_s16  ;;  %v451_v54 = vmul.f32 %v7655_v16, %v7697_v14  ;;  %v6229_v16 = vld [vmem:[%s9333_s6 + $0x64] ss:$8 sps:$4 sm:$0xff]   ;;  %v1120_v14 = vmul.f32 %v7722_v11, %v1055_v0  ;;  %v6230_v11 = vld [vmem:[%s9333_s6 + $0x120] ss:$8 sps:$4 sm:$0xff]   ;;  %v979_v0 = vmul.f32 %v7728_v46, %v914_v19 }
 0x2c7   :  { %6182 = vset.pattern.permute.xlu0 %v6853_v24  ;;  %v6224_v24 = vld [vmem:[%s9333_s6 + $0x130] ss:$8 sps:$4 sm:$0xff]   ;;  %4763 = vmatprep.subr.bf16.mxu1 %v6229_v16  ;;  %v6263_v46 = vld [vmem:[%s9333_s6] ss:$8 sps:$4 sm:$0xff]  }
 0x2c8   :  { %4811 = vmatpush1.bf16.msra.mxu0 %v6224_v24 }
 0x2c9   :  { %4812 = vmatprep.subr.bf16.mxu0 %v6232_v18 }
 0x2ca   :  { %6180 = vset.pattern.permute.xlu1 %v6851_v20  ;;  %487 = vrot.lane.b32.xlu0 %v451_v54, %s6854_s16  ;;  %v6227_v20 = vld [vmem:[%s9333_s6 + $0x60] ss:$8 sps:$4 sm:$0xff]  }
 0x2cb   :  { %873 = vperm.xlu1 %6180, %v7601_v48   ;;  %4764 = vmatpush1.bf16.msra.mxu1 %v6227_v20  ;;  %v6265_v20 = vld [vmem:[%s9333_s6 + $0x4] ss:$8 sps:$4 sm:$0xff]  }
 0x2cc   :  { %4765 = vmatprep.subr.bf16.mxu1 %v6235_v42  ;;  %4813 = vmatpush1.bf16.msra.mxu0 %v6230_v11  ;;  %v1122_v11 = vmul.f32 %v7733_v47, %v1057_v17  ;;  %v6268_v42 = vld [vmem:[%s9333_s6 + $0x1c4] ss:$8 sps:$4 sm:$0xff]   ;;  %v6269_v47 = vld [vmem:[%s9333_s6 + $0xf0] ss:$8 sps:$4 sm:$0xff]   ;;  %v6320_v17 = vld [vmem:[%s9333_s6 + $0x274] ss:$8 sps:$4 sm:$0xff]  }
 0x2cd   :  { %4814 = vmatprep.subr.bf16.mxu0 %v6238_v10  ;;  %v6274_v10 = vld [vmem:[%s9333_s6 + $0x1b4] ss:$8 sps:$4 sm:$0xff]  }
 0x2ce   :  { %1156 = vrot.lane.b32.xlu0 %v1120_v14, %s6855_s17  ;;  %v6260_v14 = vld [vmem:[%s9333_s6 + $0x1d0] ss:$8 sps:$4 sm:$0xff]  }
 0x2cf   :  { %1013 = vrot.lane.b32.xlu1 %v977_v35, %s6854_s16  ;;  %4766 = vmatpush1.bf16.msra.mxu1 %v6233_v25  ;;  %v742_v35 = vmul.f32 %v7761_v45, %v7718_v8  ;;  %v6266_v8 = vld [vmem:[%s9333_s6 + $0x1c0] ss:$8 sps:$4 sm:$0xff]   ;;  %v6271_v45 = vld [vmem:[%s9333_s6 + $0xf4] ss:$8 sps:$4 sm:$0xff]  }
 0x2d0   :  { %6181 = vset.pattern.permute.xlu1 %v6852_v22  ;;  %4767 = vmatprep.subr.bf16.mxu1 %v6241_v29  ;;  %v1200_v25 = vld [vmem:[#allocation2 + $0x7e] sm:$0x3]  ;;  %v6277_v29 = vld [vmem:[%s9333_s6 + $0xe4] ss:$8 sps:$4 sm:$0xff]  }
 0x2d1   :  { %4815 = vmatpush1.bf16.msra.mxu0 %v6236_v59  ;;  %v6272_v59 = vld [vmem:[%s9333_s6 + $0x1b0] ss:$8 sps:$4 sm:$0xff]   ;;  %v1265_v5 = vmul.f32 %v7770_v34, %v1200_v25  ;;  %v6278_v34 = vld [vmem:[%s9333_s6 + $0x1a0] ss:$8 sps:$4 sm:$0xff]  }
 0x2d2   :  { %632 = vrot.lane.b32.xlu0 %v596_v57, %s6855_s17  ;;  %4816 = vmatprep.subr.bf16.mxu0 %v6244_v33  ;;  %v6280_v33 = vld [vmem:[%s9333_s6 + $0x1a4] ss:$8 sps:$4 sm:$0xff]  }
 0x2d3   :  { %347 = vperm.xlu1 %6181, %v7601_v48   ;;  %v452_v48 = vmul.f32 %v7649_v1, %v7703_v12  ;;  %v6247_v1 = vld [vmem:[%s9333_s6 + $0x34] ss:$8 sps:$4 sm:$0xff]   ;;  %v741_v12 = vmul.f32 %v7742_v38, %v7759_v49  ;;  %4768 = vmatpush1.bf16.msra.mxu1 %v6239_v3  ;;  %v6248_v38 = vld [vmem:[%s9333_s6 + $0x1f0] ss:$8 sps:$4 sm:$0xff]   ;;  %v6253_v49 = vld [vmem:[%s9333_s6 + $0x24] ss:$8 sps:$4 sm:$0xff]  }
 0x2d4   :  { %4769 = vmatprep.subr.bf16.mxu1 %v6247_v1  ;;  %v388_v1 = vld [vmem:[#allocation2 + $0x62] sm:$0x3] }
 0x2d5   :  { %4817 = vmatpush1.bf16.msra.mxu0 %v6242_v9  ;;  %v6283_v9 = vld [vmem:[%s9333_s6 + $0xd4] ss:$8 sps:$4 sm:$0xff]  }
 0x2d6   :  { %1299 = vrot.lane.b32.xlu0 %v1263_v15, %s6856_s0  ;;  %4818 = vmatprep.subr.bf16.mxu0 %v6250_v43  ;;  %v6275_v15 = vld [vmem:[%s9333_s6 + $0xe0] ss:$8 sps:$4 sm:$0xff]   ;;  %v533_v43 = vld [vmem:[#allocation2 + $0x64] sm:$0x3] }
 0x2d7   :  { %489 = vrot.lane.b32.xlu1 %v452_v48, %s6854_s16  ;;  %4770 = vmatpush1.bf16.msra.mxu1 %v6245_v7  ;;  %v5512_v48 = vld.sshfl [vmem:[#allocation4 + $0xa] sm:$0x3 pattern:$0x76325410] }
 0x2d8   :  { %4771 = vmatprep.subr.bf16.mxu1 %v6253_v49  ;;  %v6284_v49 = vld [vmem:[%s9333_s6 + $0x190] ss:$8 sps:$4 sm:$0xff]  }
 0x2d9   :  { %v1792_v37 = vpop.f32.mrf.mxu0  ;;  %4819 = vmatpush2.bf16.msra.mxu0 %v6248_v38 }
 0x2da   :  { %v5979_v36 = vpop.f32.mrf.mxu1  ;;  %777 = vrot.lane.b32.xlu0 %v741_v12, %s6856_s0  ;;  %4820 = vmatprep.subr.bf16.mxu0 %v6256_v23  ;;  %v6281_v12 = vld [vmem:[%s9333_s6 + $0xd0] ss:$8 sps:$4 sm:$0xff]  }
 0x2db   :  { %1158 = vrot.lane.b32.xlu1 %v1121_v26, %s6855_s17  ;;  %v6062_v21 = vpop.f32.mrf.mxu0  ;;  %4772 = vmatpush1.bf16.msra.mxu1 %v6251_v50  ;;  %v5516_v50 = vld.sshfl [vmem:[#allocation4 + $0x1a] sm:$0x3 pattern:$0x76325410] }
 0x2dc   :  { %v5980_v13 = vpop.f32.mrf.mxu1  ;;  %4773 = vmatprep.subr.bf16.mxu1 %v6259_v32  ;;  %v6286_v21 = vld [vmem:[%s9333_s6 + $0x194] ss:$8 sps:$4 sm:$0xff]   ;;  %v6293_v23 = vld [vmem:[%s9333_s6 + $0xb0] ss:$8 sps:$4 sm:$0xff]  }
 0x2dd   :  { %v5981_v61 = vadd.f32 %v5980_v13, %v5979_v36  ;;  %v1795_v28 = vpop.f32.mrf.mxu0  ;;  %4821 = vmatpush2.bf16.msra.mxu0 %v6254_v30  ;;  %v5514_v36 = vld.sshfl [vmem:[#allocation4 + $0x12] sm:$0x3 pattern:$0x76325410]  ;;  %v598_v13 = vmul.f32 %v7738_v58, %v533_v43  ;;  %v6295_v58 = vld [vmem:[%s9333_s6 + $0xb4] ss:$8 sps:$4 sm:$0xff]  }
 0x2de   :  { %v5982_v39 = vpop.f32.mrf.mxu1  ;;  %1885 = vrot.lane.b32.xlu0 %v5511_v51, %s6855_s17  ;;  %4822 = vmatprep.subr.bf16.mxu0 %v6262_v40  ;;  %v6292_v51 = vld [vmem:[%s9333_s6 + $0x184] ss:$8 sps:$4 sm:$0xff]  }
 0x2df   :  { %v1705_v4 = vadd.f32 %v5981_v61, %v7681_v41  ;;  %634 = vrot.lane.b32.xlu1 %v7736_v27, %s6855_s17  ;;  %v6063_v52 = vpop.f32.mrf.mxu0  ;;  %v5513_v27 = vld.sshfl [vmem:[#allocation4 + $0xe] sm:$0x3 pattern:$0x76325410]  ;;  %4774 = vmatpush1.bf16.msra.mxu1 %v6257_v55  ;;  %v6308_v55 = vld [vmem:[%s9333_s6 + $0x94] ss:$8 sps:$4 sm:$0xff]  }
 0x2e0   :  { %v5983_v56 = vpop.f32.mrf.mxu1  ;;  %4775 = vmatprep.subr.bf16.mxu1 %v6265_v20  ;;  %v678_v61 = vld [vmem:[#allocation2 + $0x6e] sm:$0x3]  ;;  %v6299_v52 = vld [vmem:[%s9333_s6 + $0x374] ss:$8 sps:$4 sm:$0xff]  }
 0x2e1   :  { %v1793_v54 = vadd.f32 %v1792_v37, %v1705_v4  ;;  %v5984_v60 = vadd.f32 %v5983_v56, %v5982_v39  ;;  %4823 = vmatpush2.bf16.msra.mxu0 %v6260_v14  ;;  %v453_v37 = vmul.f32 %v7752_v6, %v388_v1  ;;  %v6289_v6 = vld [vmem:[%s9333_s6 + $0xc4] ss:$8 sps:$4 sm:$0xff]   ;;  %v6290_v39 = vld [vmem:[%s9333_s6 + $0x180] ss:$8 sps:$4 sm:$0xff]  }
 0x2e2   :  { %1915 = vrot.lane.b32.xlu0 %v5513_v27, %s6855_s17  ;;  %4824 = vmatprep.subr.bf16.mxu0 %v6268_v42  ;;  %v6302_v30 = vld [vmem:[%s9333_s6 + $0xa4] ss:$8 sps:$4 sm:$0xff]   ;;  %v5515_v56 = vld.sshfl [vmem:[#allocation4 + $0x16] sm:$0x3 pattern:$0x76325410] }
 0x2e3   :  { %v1834_v24 = vmax.f32 %v1793_v54, 0.0  ;;  %v1708_v16 = vadd.f32 %v5984_v60, %v7681_v41  ;;  %1301 = vrot.lane.b32.xlu1 %v1264_v44, %s6856_s0  ;;  %4776 = vmatpush1.bf16.msra.mxu1 %v6263_v46  ;;  %v743_v44 = vmul.f32 %v7744_v31, %v678_v61  ;;  %v6300_v31 = vld [vmem:[%s9333_s6 + $0xa0] ss:$8 sps:$4 sm:$0xff]   ;;  %v6306_v54 = vld [vmem:[%s9333_s6 + $0x90] ss:$8 sps:$4 sm:$0xff]  }
 0x2e4   :  { %4777 = vmatprep.subr.bf16.mxu1 %v6271_v45  ;;  %v5517_v60 = vld.sshfl [vmem:[#allocation4 + $0x1e] sm:$0x3 pattern:$0x76325410]  ;;  %v6312_v27 = vld [vmem:[%s9333_s6 + $0x80] ss:$8 sps:$4 sm:$0xff]  }
 0x2e5   :  { %1848 = vst.msk [vmem:[#allocation4 + $0x20] sm:$0xff] %vm1843_vm9, %v1834_v24  ;;  %v1796_v18 = vadd.f32 %v1795_v28, %v1708_v16  ;;  %4825 = vmatpush2.bf16.msra.mxu0 %v6266_v8  ;;  %v1012_v16 = vpop.permute.xlu1 %1011  ;;  %v1340_v45 = vld [vmem:[#allocation2 + $0x68] sm:$0xff] }
 0x2e6   :  { %1017 = vrot.lane.b32.xlu0 %v979_v0, %s6854_s16  ;;  %4826 = vmatprep.subr.bf16.mxu0 %v6274_v10  ;;  %v6314_v0 = vld [vmem:[%s9333_s6 + $0x84] ss:$8 sps:$4 sm:$0xff]  }
 0x2e7   :  { %v1835_v57 = vmax.f32 %v1796_v18, 0.0  ;;  %779 = vrot.lane.b32.xlu1 %v742_v35, %s6856_s0  ;;  %4778 = vmatpush2.bf16.msra.mxu1 %v6269_v47 }
 0x2e8   :  { %4779 = vmatprep.subr.bf16.mxu1 %v6277_v29 }
 0x2e9   :  { %1849 = vst.msk [vmem:[#allocation4 + $0x28] sm:$0xff] %vm1843_vm9, %v1835_v57  ;;  %4827 = vmatpush2.bf16.msra.mxu0 %v6272_v59 }
 0x2ea   :  { %1160 = vrot.lane.b32.xlu0 %v1122_v11, %s6855_s17  ;;  %4828 = vmatprep.subr.bf16.mxu0 %v6280_v33  ;;  %v1339_v11 = vld [vmem:[#allocation2 + $0x60] sm:$0xff] }
 0x2eb   :  { %1869 = vrot.lane.b32.xlu1 %v5510_v62, %s6855_s17  ;;  %4780 = vmatpush2.bf16.msra.mxu1 %v6275_v15 }
 0x2ec   :  { %v1979_v3 = vld [vmem:[#allocation4 + $0x20] sm:$0x3]  ;;  %v1994_v26 = vld [vmem:[#allocation4 + $0x24] sm:$0x3]  ;;  %4781 = vmatprep.subr.bf16.mxu1 %v6283_v9 }
 0x2ed   :  { %1980 = vst.msk [vmem:[#allocation5 + $0x10] sm:$0x3] %vm1856_vm10, %v1979_v3  ;;  %1995 = vst.msk [vmem:[#allocation5 + $0x12] sm:$0x3] %vm1856_vm10, %v1994_v26  ;;  %4829 = vmatpush2.bf16.msra.mxu0 %v6278_v34  ;;  %v1341_v26 = vld [vmem:[#allocation2 + $0x70] sm:$0xff] }
 0x2ee   :  { %1303 = vrot.lane.b32.xlu0 %v1265_v5, %s6856_s0  ;;  %4830 = vmatprep.subr.bf16.mxu0 %v6286_v21  ;;  %v5518_v19 = vld.sshfl [vmem:[#allocation4 + $0x22] sm:$0x3 pattern:$0x76325410]  ;;  %v1342_v5 = vld [vmem:[#allocation2 + $0x78] sm:$0xff] }
 0x2ef   :  { %1900 = vrot.lane.b32.xlu1 %v5512_v48, %s6855_s17  ;;  %4782 = vmatpush2.bf16.msra.mxu1 %v6281_v12  ;;  %v5519_v40 = vld.sshfl [vmem:[#allocation4 + $0x26] sm:$0x3 pattern:$0x76325410] }
 0x2f0   :  { %v2009_v7 = vld [vmem:[#allocation4 + $0x28] sm:$0x3]  ;;  %v2024_v38 = vld [vmem:[#allocation4 + $0x2c] sm:$0x3]  ;;  %4783 = vmatprep.subr.bf16.mxu1 %v6289_v6  ;;  %v1343_v6 = vld [vmem:[#allocation2 + $0x80] sm:$0x3] }
 0x2f1   :  { %2010 = vst.msk [vmem:[#allocation5 + $0x14] sm:$0x3] %vm1856_vm10, %v2009_v7  ;;  %2025 = vst.msk [vmem:[#allocation5 + $0x16] sm:$0x3] %vm1856_vm10, %v2024_v38  ;;  %4831 = vmatpush2.bf16.msra.mxu0 %v6284_v49 }
 0x2f2   :  { %1930 = vrot.lane.b32.xlu0 %v5514_v36, %s6855_s17  ;;  %4832 = vmatprep.subr.bf16.mxu0 %v6292_v51  ;;  %v5520_v32 = vld.sshfl [vmem:[#allocation4 + $0x2a] sm:$0x3 pattern:$0x76325410] }
 0x2f3   :  { %491 = vrot.lane.b32.xlu1 %v453_v37, %s6854_s16  ;;  %4784 = vmatpush2.bf16.msra.mxu1 %v6287_v53  ;;  %v5521_v24 = vld.sshfl [vmem:[#allocation4 + $0x2e] sm:$0x3 pattern:$0x76325410] }
 0x2f4   :  { %4785 = vmatprep.subr.bf16.mxu1 %v6295_v58 }
 0x2f5   :  { %4833 = vmatpush2.bf16.msra.mxu0 %v6290_v39 }
 0x2f6   :  { %v1153_v28 = vpop.permute.xlu0 %1152  ;;  %1960 = vrot.lane.b32.xlu0 %v5516_v50, %s6855_s17  ;;  %4884 = vmatprep.subr.bf16.mxu0 %v6299_v52 }
 0x2f7   :  { %1183 = vst.msk [vmem:[#allocation3 + $0xc8] sm:$0xff] %vm651_vm6, %v1153_v28  ;;  %636 = vrot.lane.b32.xlu1 %v598_v13, %s6855_s17  ;;  %4786 = vmatpush2.bf16.msra.mxu1 %v6293_v23 }
 0x2f8   :  { %4787 = vmatprep.subr.bf16.mxu1 %v6302_v30 }
 0x2fa   :  { %v629_v4 = vpop.permute.xlu0 %628  ;;  %1990 = vrot.lane.b32.xlu0 %v5518_v19, %s6855_s17 }
 0x2fb   :  { %660 = vst.msk [vmem:[#allocation3 + $0xc0] sm:$0xff] %vm651_vm6, %v629_v4  ;;  %781 = vrot.lane.b32.xlu1 %v743_v44, %s6856_s0  ;;  %4788 = vmatpush2.bf16.msra.mxu1 %v6300_v31 }
 0x2fc   :  { %4789 = vmatprep.subr.bf16.mxu1 %v6308_v55 }
 0x2fe   :  { %2020 = vrot.lane.b32.xlu0 %v5520_v32, %s6855_s17 }
 0x2ff   :  { %1945 = vrot.lane.b32.xlu1 %v5515_v56, %s6855_s17  ;;  %4790 = vmatpush2.bf16.msra.mxu1 %v6306_v54  ;;  %v6818_v54 = vld [vmem:[#allocation2 + $0x50] sm:$0xff] }
 0x300   :  { %4791 = vmatprep.subr.bf16.mxu1 %v6314_v0 }
 0x303   :  { %1975 = vrot.lane.b32.xlu1 %v5517_v60, %s6855_s17  ;;  %4792 = vmatpush2.bf16.msra.mxu1 %v6312_v27 }
 0x304   :  { %4843 = vmatprep.subr.bf16.mxu1 %v6320_v17 }
 0x307   :  { %2005 = vrot.lane.b32.xlu1 %v5519_v40, %s6855_s17 }
 0x30b   :  { %2035 = vrot.lane.b32.xlu1 %v5521_v24, %s6855_s17 }
 0x311   :  { %v486_v14 = vpop.permute.xlu1 %485 }
 0x312   :  { %516 = vst.msk [vmem:[#allocation3 + $0xd8] sm:$0xff] %vm506_vm5, %v486_v14 }
 0x315   :  { %v1155_v46 = vpop.permute.xlu1 %1154 }
 0x319   :  { %v631_v20 = vpop.permute.xlu1 %630 }
 0x31a   :  { %661 = vst.msk [vmem:[#allocation3 + $0xd8] sm:$0xff] %vm651_vm6, %v631_v20  ;;  %v1296_v35 = vpop.permute.xlu0 %1295 }
 0x31b   :  { %1326 = vst.msk [vmem:[#allocation3 + $0xc8] sm:$0xff] %vm796_vm7, %v1296_v35 }
 0x31d   :  { %v1298_v18 = vpop.permute.xlu1 %1297 }
 0x322   :  { %v1447_v55 = vld [vmem:[#allocation3 + $0xc8] sm:$0xff] }
 0x327   :  { %v1378_v42 = vpop.permute.xlu0 %1377  ;;  %v1800_v57 = vpop.f32.mrf.mxu0 }
 0x328   :  { %v1404_v8 = vmul.f32 %v1378_v42, %v1339_v11 }
 0x329   :  { %v6066_v47 = vpop.f32.mrf.mxu0 }
 0x32a   :  { %1417 = vst.msk [vmem:[#allocation3 + $0xd0] sm:$0xff] %vm227_vm4, %v1404_v8  ;;  %v1382_v25 = vpop.permute.xlu1 %1381 }
 0x32b   :  { %v1405_v62 = vmul.f32 %v1382_v25, %v1340_v45  ;;  %v776_v10 = vpop.permute.xlu0 %775  ;;  %v8065_v59 = vpop.f32.mrf.mxu0 }
 0x32c   :  { %806 = vst.msk [vmem:[#allocation3 + $0xd8] sm:$0xff] %vm796_vm7, %v776_v10 }
 0x32d   :  { %1418 = vst.msk [vmem:[#allocation3 + $0xe8] sm:$0xff] %vm227_vm4, %v1405_v62  ;;  %v6067_v29 = vpop.f32.mrf.mxu0  ;;  %v284_v62 = vld [vmem:[#allocation2 + $0x60] sm:$0x3] }
 0x32e   :  { %v774_v15 = vpop.permute.xlu1 %773 }
 0x32f   :  { %805 = vst.msk [vmem:[#allocation3 + $0xc0] sm:$0xff] %vm796_vm7, %v774_v15  ;;  %v1390_v3 = vpop.permute.xlu0 %1389 }
 0x330   :  { %v1407_v48 = vmul.f32 %v1390_v3, %v1342_v5 }
 0x331   :  { %v1448_v1 = vld [vmem:[#allocation3 + $0xd0] sm:$0xff] }
 0x332   :  { %1420 = vst.msk [vmem:[#allocation3 + $0x118] sm:$0xff] %vm227_vm4, %v1407_v48  ;;  %v1386_v33 = vpop.permute.xlu1 %1385 }
 0x333   :  { %v1406_v34 = vmul.f32 %v1386_v33, %v1341_v26  ;;  %v1449_v0 = vld [vmem:[#allocation3 + $0xd8] sm:$0xff] }
 0x334   :  { %v862_v9 = vpop.permute.xlu0 %861  ;;  %v1451_v12 = vld [vmem:[#allocation3 + $0xe8] sm:$0xff] }
 0x335   :  { %1419 = vst.msk [vmem:[#allocation3 + $0x100] sm:$0xff] %vm227_vm4, %v1406_v34  ;;  %v885_v7 = vmul.f32 %v7683_v63, %v862_v9  ;;  %v1475_v37 = vpack.c.bf16 %v1451_v12, %v1448_v1 }
 0x336   :  { %v1446_v52 = vld [vmem:[#allocation3 + $0xc0] sm:$0xff] }
 0x337   :  { %898 = vst.msk [vmem:[#allocation3 + $0xe0] sm:$0xff] %vm227_vm4, %v885_v7  ;;  %6069 = vmatmul.mubr.msk.bf16.gmra.mxu0 %vm227_vm4, %v1475_v37  ;;  %v866_v36 = vpop.permute.xlu1 %865  ;;  %v1473_v24 = vpack.c.bf16 %v1449_v0, %v1446_v52 }
 0x338   :  { %1041 = vst.msk [vmem:[#allocation3 + $0xe0] sm:$0xff] %vm506_vm5, %v1012_v16  ;;  %v886_v43 = vmul.f32 %v1339_v11, %v866_v36  ;;  %v870_v21 = vpop.permute.xlu0 %869  ;;  %6072 = vmatprep.mubr.msk.bf16.mxu0 %vm6845_vm2, %v6843_v2 }
 0x339   :  { %1184 = vst.msk [vmem:[#allocation3 + $0xe0] sm:$0xff] %vm651_vm6, %v1155_v46  ;;  %v887_v38 = vmul.f32 %v1340_v45, %v870_v21  ;;  %v1457_v61 = vld [vmem:[#allocation3 + $0x118] sm:$0xff]  ;;  %v823_v46 = vld [vmem:[#allocation2 + $0x70] sm:$0x3] }
 0x33a   :  { %1327 = vst.msk [vmem:[#allocation3 + $0xe0] sm:$0xff] %vm796_vm7, %v1298_v18  ;;  %v5985_v49 = vpop.f32.mrf.mxu1 }
 0x33b   :  { %899 = vst.msk [vmem:[#allocation3 + $0xf8] sm:$0xff] %vm227_vm4, %v886_v43  ;;  %900 = vst.msk [vmem:[#allocation3 + $0x110] sm:$0xff] %vm227_vm4, %v887_v38 }
 0x33c   :  { %v5986_v53 = vpop.f32.mrf.mxu1  ;;  %v1394_v13 = vpop.permute.xlu1 %1393  ;;  %v1454_v50 = vld [vmem:[#allocation3 + $0x100] sm:$0xff] }
 0x33d   :  { %v5987_v28 = vadd.f32 %v5986_v53, %v5985_v49  ;;  %v343_v51 = vpop.permute.xlu0 %342  ;;  %v1408_v39 = vmul.f32 %v1394_v13, %v1343_v6  ;;  %v1478_v58 = vpack.c.bf16 %v1457_v61, %v1454_v50 }
 0x33e   :  { %v361_v23 = vmul.f32 %v7683_v63, %v343_v51  ;;  %v5988_v44 = vpop.f32.mrf.mxu1  ;;  %v6857_v51 = vmov 1983009808  }
 0x33f   :  { %v1713_v19 = vadd.f32 %v5987_v28, %v7681_v41  ;;  %1421 = vst.msk [vmem:[#allocation3 + $0x130] sm:$0x3] %vm244_vm8, %v1408_v39  ;;  %6073 = vmatmul.mubr.msk.bf16.gmra.mxu0 %vm227_vm4, %v1478_v58  ;;  %v2237_v39 = vunpack.c.l.s4 %v6857_v51  ;;  %v2239_v58 = vlaneseq  ;;  %v6348_v51 = vld [vmem:[%s9333_s6 + $0x3f4] ss:$8 sps:$4 sm:$0xff]  }
 0x340   :  { %374 = vst.msk [vmem:[#allocation3 + $0x108] sm:$0xff] %vm227_vm4, %v361_v23  ;;  %v5989_v4 = vpop.f32.mrf.mxu1  ;;  %6076 = vmatprep.mubr.msk.bf16.mxu0 %vm6845_vm2, %v6843_v2 }
 0x341   :  { %v1801_v30 = vadd.f32 %v1800_v57, %v1713_v19  ;;  %v5990_v31 = vadd.f32 %v5989_v4, %v5988_v44  ;;  %v338_v32 = vpop.permute.xlu1 %337  ;;  %v1016_v56 = vpop.permute.xlu0 %1015  ;;  %v1450_v63 = vld [vmem:[#allocation3 + $0xe0] sm:$0xff]  ;;  %v2238_v19 = vunpack.c.0.s8 %v2237_v39  ;;  %v8126_v4 = vshrl.u32 %v2239_v58, 7  ;;  %v6346_v58 = vld [vmem:[%s9333_s6 + $0x3f0] ss:$8 sps:$4 sm:$0xff]  }
 0x342   :  { %v360_v60 = vmul.f32 %v6818_v54, %v338_v32  ;;  %1043 = vst.msk [vmem:[#allocation3 + $0x110] sm:$0xff] %vm506_vm5, %v1016_v56  ;;  %v1474_v27 = vpack.c.bf16 %v1450_v63, %v1447_v55  ;;  %v6351_v39 = vld [vmem:[%s9333_s6 + $0x224] ss:$8 sps:$4 sm:$0xff]  }
 0x343   :  { %v1836_v40 = vmax.f32 %v1801_v30, 0.0  ;;  %v1716_v17 = vadd.f32 %v5990_v31, %v7681_v41  ;;  %v8131_v63 = vsub.s32 %v2238_v19, %v8126_v4  ;;  %v6357_v19 = vld [vmem:[%s9333_s6 + $0x214] ss:$8 sps:$4 sm:$0xff]  }
 0x344   :  { %373 = vst.msk [vmem:[#allocation3 + $0xf0] sm:$0xff] %vm227_vm4, %v360_v60  ;;  %1718 = vmatprep.mubr.bf16.mxu1 %v1474_v27 }
 0x345   :  { %1850 = vst.msk [vmem:[#allocation4 + $0x30] sm:$0xff] %vm1843_vm9, %v1836_v40  ;;  %v1804_v2 = vadd.f32 %v8065_v59, %v1716_v17  ;;  %1719 = vmatmul.mubr.bf16.gmra.mxu1 %v1473_v24  ;;  %v488_v16 = vpop.permute.xlu0 %487 }
 0x346   :  { %517 = vst.msk [vmem:[#allocation3 + $0xf0] sm:$0xff] %vm506_vm5, %v488_v16  ;;  %v874_v14 = vpop.permute.xlu1 %873  ;;  %v1460_v20 = vld [vmem:[#allocation3 + $0x130] sm:$0x3] }
 0x347   :  { %v1837_v35 = vmax.f32 %v1804_v2, 0.0  ;;  %v888_v18 = vmul.f32 %v874_v14, %v823_v46  ;;  %v1481_v11 = vpack.c.bf16 %v1460_v20, %v1460_v20  ;;  %v6297_v2 = vld [vmem:[%s9333_s6 + $0x370] ss:$8 sps:$4 sm:$0xff]   ;;  %v6305_v46 = vld [vmem:[%s9333_s6 + $0x364] ss:$8 sps:$4 sm:$0xff]  }
 0x349   :  { %1851 = vst.msk [vmem:[#allocation4 + $0x38] sm:$0xff] %vm1843_vm9, %v1837_v35  ;;  %v1157_v41 = vpop.permute.xlu0 %1156  ;;  %6077 = vmatmul.mubr.msk.bf16.gmra.mxu0 %vm227_vm4, %v1481_v11  ;;  %v6303_v35 = vld [vmem:[%s9333_s6 + $0x360] ss:$8 sps:$4 sm:$0xff]  }
 0x34a   :  { %901 = vst.msk [vmem:[#allocation3 + $0x128] sm:$0x3] %vm244_vm8, %v888_v18  ;;  %v1014_v42 = vpop.permute.xlu1 %1013 }
 0x34b   :  { %1042 = vst.msk [vmem:[#allocation3 + $0xf8] sm:$0xff] %vm506_vm5, %v1014_v42 }
 0x34c   :  { %1185 = vst.msk [vmem:[#allocation3 + $0xf8] sm:$0xff] %vm651_vm6, %v1157_v41  ;;  %v5523_v57 = vld.sshfl [vmem:[#allocation4 + $0x36] sm:$0x3 pattern:$0x76325410] }
 0x34d   :  { %v2054_v8 = vld [vmem:[#allocation4 + $0x34] sm:$0x3]  ;;  %v633_v47 = vpop.permute.xlu0 %632  ;;  %2065 = vrot.lane.b32.xlu1 %v5523_v57, %s6855_s17  ;;  %v5522_v45 = vld.sshfl [vmem:[#allocation4 + $0x32] sm:$0x3 pattern:$0x76325410] }
 0x34e   :  { %2055 = vst.msk [vmem:[#allocation5 + $0x1a] sm:$0x3] %vm1856_vm10, %v2054_v8  ;;  %v2039_v25 = vld [vmem:[#allocation4 + $0x30] sm:$0x3]  ;;  %2050 = vrot.lane.b32.xlu0 %v5522_v45, %s6855_s17  ;;  %v348_v10 = vpop.permute.xlu1 %347  ;;  %v6311_v41 = vld [vmem:[%s9333_s6 + $0x354] ss:$8 sps:$4 sm:$0xff]  }
 0x34f   :  { %662 = vst.msk [vmem:[#allocation3 + $0xf0] sm:$0xff] %vm651_vm6, %v633_v47  ;;  %v362_v59 = vmul.f32 %v348_v10, %v284_v62  ;;  %v6309_v8 = vld [vmem:[%s9333_s6 + $0x350] ss:$8 sps:$4 sm:$0xff]   ;;  %v6317_v45 = vld [vmem:[%s9333_s6 + $0x344] ss:$8 sps:$4 sm:$0xff]  }
 0x350   :  { %2040 = vst.msk [vmem:[#allocation5 + $0x18] sm:$0x3] %vm1856_vm10, %v2039_v25  ;;  %v5525_v29 = vld.sshfl [vmem:[#allocation4 + $0x3e] sm:$0x3 pattern:$0x76325410] }
 0x351   :  { %v2084_v5 = vld [vmem:[#allocation4 + $0x3c] sm:$0x3]  ;;  %375 = vst.msk [vmem:[#allocation3 + $0x120] sm:$0x3] %vm244_vm8, %v362_v59  ;;  %v1300_v15 = vpop.permute.xlu0 %1299  ;;  %2095 = vrot.lane.b32.xlu1 %v5525_v29, %s6855_s17  ;;  %v2069_v48 = vld [vmem:[#allocation4 + $0x38] sm:$0x3] }
 0x352   :  { %v5524_v3 = vld.sshfl [vmem:[#allocation4 + $0x3a] sm:$0x3 pattern:$0x76325410]  ;;  %2085 = vst.msk [vmem:[#allocation5 + $0x1e] sm:$0x3] %vm1856_vm10, %v2084_v5  ;;  %v490_v33 = vpop.permute.xlu1 %489 }
 0x353   :  { %1328 = vst.msk [vmem:[#allocation3 + $0xf8] sm:$0xff] %vm796_vm7, %v1300_v15  ;;  %2080 = vrot.lane.b32.xlu0 %v5524_v3, %s6855_s17  ;;  %v6315_v25 = vld [vmem:[%s9333_s6 + $0x340] ss:$8 sps:$4 sm:$0xff]   ;;  %v6318_v10 = vld [vmem:[%s9333_s6 + $0x270] ss:$8 sps:$4 sm:$0xff]  }
 0x354   :  { %2070 = vst.msk [vmem:[#allocation5 + $0x1c] sm:$0x3] %vm1856_vm10, %v2069_v48  ;;  %v6323_v59 = vld [vmem:[%s9333_s6 + $0x334] ss:$8 sps:$4 sm:$0xff]   ;;  %v6326_v15 = vld [vmem:[%s9333_s6 + $0x264] ss:$8 sps:$4 sm:$0xff]  }
 0x355   :  { %518 = vst.msk [vmem:[#allocation3 + $0x108] sm:$0xff] %vm506_vm5, %v490_v33  ;;  %v778_v26 = vpop.permute.xlu0 %777  ;;  %v6321_v33 = vld [vmem:[%s9333_s6 + $0x330] ss:$8 sps:$4 sm:$0xff]  }
 0x356   :  { %807 = vst.msk [vmem:[#allocation3 + $0xf0] sm:$0xff] %vm796_vm7, %v778_v26  ;;  %v1159_v34 = vpop.permute.xlu1 %1158 }
 0x357   :  { %1186 = vst.msk [vmem:[#allocation3 + $0x110] sm:$0xff] %vm651_vm6, %v1159_v34 }
 0x359   :  { %v1886_v9 = vpop.permute.xlu0 %1885 }
 0x35a   :  { %1888 = vst.msk [vmem:[#allocation5 + $0x2] sm:$0x3] %vm1872_vm11, %v1886_v9  ;;  %v635_v1 = vpop.permute.xlu1 %634  ;;  %v1453_v38 = vld [vmem:[#allocation3 + $0xf8] sm:$0xff] }
 0x35b   :  { %663 = vst.msk [vmem:[#allocation3 + $0x108] sm:$0xff] %vm651_vm6, %v635_v1  ;;  %v6324_v9 = vld [vmem:[%s9333_s6 + $0x260] ss:$8 sps:$4 sm:$0xff]   ;;  %v6329_v1 = vld [vmem:[%s9333_s6 + $0x324] ss:$8 sps:$4 sm:$0xff]  }
 0x35d   :  { %v1916_v12 = vpop.permute.xlu0 %1915  ;;  %v1452_v50 = vld [vmem:[#allocation3 + $0xf0] sm:$0xff] }
 0x35e   :  { %1918 = vst.msk [vmem:[#allocation5 + $0x6] sm:$0x3] %vm1872_vm11, %v1916_v12  ;;  %v1302_v7 = vpop.permute.xlu1 %1301 }
 0x35f   :  { %1329 = vst.msk [vmem:[#allocation3 + $0x110] sm:$0xff] %vm796_vm7, %v1302_v7 }
 0x361   :  { %v1018_v37 = vpop.permute.xlu0 %1017 }
 0x362   :  { %1044 = vst.msk [vmem:[#allocation3 + $0x128] sm:$0x3] %vm519_vm12, %v1018_v37  ;;  %v780_v36 = vpop.permute.xlu1 %779  ;;  %v6333_v37 = vld [vmem:[%s9333_s6 + $0x254] ss:$8 sps:$4 sm:$0xff]  }
 0x363   :  { %808 = vst.msk [vmem:[#allocation3 + $0x108] sm:$0xff] %vm796_vm7, %v780_v36  ;;  %v6327_v36 = vld [vmem:[%s9333_s6 + $0x320] ss:$8 sps:$4 sm:$0xff]  }
 0x365   :  { %v1161_v43 = vpop.permute.xlu0 %1160 }
 0x366   :  { %1187 = vst.msk [vmem:[#allocation3 + $0x128] sm:$0x3] %vm664_vm13, %v1161_v43  ;;  %v1870_v21 = vpop.permute.xlu1 %1869  ;;  %v1456_v49 = vld [vmem:[#allocation3 + $0x110] sm:$0xff] }
 0x367   :  { %1873 = vst.msk [vmem:[#allocation5] sm:$0x3] %vm1872_vm11, %v1870_v21  ;;  %v1477_v6 = vpack.c.bf16 %v1456_v49, %v1453_v38  ;;  %v6331_v21 = vld [vmem:[%s9333_s6 + $0x250] ss:$8 sps:$4 sm:$0xff]   ;;  %v6336_v38 = vld [vmem:[%s9333_s6 + $0x314] ss:$8 sps:$4 sm:$0xff]  }
 0x368   :  { %v6339_v49 = vld [vmem:[%s9333_s6 + $0x244] ss:$8 sps:$4 sm:$0xff]  }
 0x369   :  { %1726 = vmatprep.mubr.bf16.mxu1 %v1477_v6  ;;  %v1304_v53 = vpop.permute.xlu0 %1303  ;;  %v6334_v6 = vld [vmem:[%s9333_s6 + $0x310] ss:$8 sps:$4 sm:$0xff]  }
 0x36a   :  { %1330 = vst.msk [vmem:[#allocation3 + $0x128] sm:$0x3] %vm809_vm14, %v1304_v53  ;;  %v1901_v13 = vpop.permute.xlu1 %1900  ;;  %v1455_v61 = vld [vmem:[#allocation3 + $0x108] sm:$0xff]  ;;  %v6337_v53 = vld [vmem:[%s9333_s6 + $0x240] ss:$8 sps:$4 sm:$0xff]  }
 0x36b   :  { %1903 = vst.msk [vmem:[#allocation5 + $0x4] sm:$0x3] %vm1872_vm11, %v1901_v13  ;;  %v1476_v28 = vpack.c.bf16 %v1455_v61, %v1452_v50  ;;  %v6342_v13 = vld [vmem:[%s9333_s6 + $0x304] ss:$8 sps:$4 sm:$0xff]   ;;  %v6345_v50 = vld [vmem:[%s9333_s6 + $0x234] ss:$8 sps:$4 sm:$0xff]  }
 0x36c   :  { %v6340_v61 = vld [vmem:[%s9333_s6 + $0x300] ss:$8 sps:$4 sm:$0xff]  }
 0x36d   :  { %1727 = vmatmul.mubr.bf16.gmra.mxu1 %v1476_v28  ;;  %v1931_v23 = vpop.permute.xlu0 %1930  ;;  %v6343_v28 = vld [vmem:[%s9333_s6 + $0x230] ss:$8 sps:$4 sm:$0xff]  }
 0x36e   :  { %1933 = vst.msk [vmem:[#allocation5 + $0x8] sm:$0x3] %vm1872_vm11, %v1931_v23  ;;  %v492_v44 = vpop.permute.xlu1 %491  ;;  %v6349_v23 = vld [vmem:[%s9333_s6 + $0x220] ss:$8 sps:$4 sm:$0xff]  }
 0x36f   :  { %520 = vst.msk [vmem:[#allocation3 + $0x120] sm:$0x3] %vm519_vm12, %v492_v44  ;;  %v6354_v44 = vld [vmem:[%s9333_s6 + $0x3e4] ss:$8 sps:$4 sm:$0xff]  }
 0x371   :  { %v1961_v52 = vpop.permute.xlu0 %1960  ;;  %v1459_v30 = vld [vmem:[#allocation3 + $0x128] sm:$0x3] }
 0x372   :  { %1963 = vst.msk [vmem:[#allocation5 + $0xc] sm:$0x3] %vm1872_vm11, %v1961_v52  ;;  %v637_v31 = vpop.permute.xlu1 %636  ;;  %v1480_v32 = vpack.c.bf16 %v1459_v30, %v1459_v30  ;;  %v2221_v56 = vld [vmem:[#allocation5] sm:$0xff]  ;;  %v6355_v30 = vld [vmem:[%s9333_s6 + $0x210] ss:$8 sps:$4 sm:$0xff]  }
 0x373   :  { %665 = vst.msk [vmem:[#allocation3 + $0x120] sm:$0x3] %vm664_vm13, %v637_v31  ;;  %v2235_v55 = vcombine.high %v2221_v56, %v2221_v56  ;;  %v2242_v40 = vrot.slane %v2221_v56, %v8131_v63  ;;  %v6352_v52 = vld [vmem:[%s9333_s6 + $0x3e0] ss:$8 sps:$4 sm:$0xff]   ;;  %v6360_v31 = vld [vmem:[%s9333_s6 + $0x3d4] ss:$8 sps:$4 sm:$0xff]  }
 0x374   :  { %1734 = vmatprep.mubr.bf16.mxu1 %v1480_v32  ;;  %v6363_v32 = vld [vmem:[%s9333_s6 + $0x204] ss:$8 sps:$4 sm:$0xff]   ;;  %v6358_v56 = vld [vmem:[%s9333_s6 + $0x3d0] ss:$8 sps:$4 sm:$0xff]  }
 0x375   :  { %v1991_v54 = vpop.permute.xlu0 %1990  ;;  %v2249_v60 = vrot.slane %v2235_v55, %v8131_v63  ;;  %v2250_v20 = vcombine.high %v2242_v40, %v2242_v40  ;;  %v2369_v5 = vpack.c.bf16 %v2242_v40, %v2242_v40  ;;  %v6361_v55 = vld [vmem:[%s9333_s6 + $0x200] ss:$8 sps:$4 sm:$0xff]   ;;  %v6372_v40 = vld [vmem:[%s9333_s6 + $0x3b4] ss:$8 sps:$4 sm:$0xff]  }
 0x376   :  { %1993 = vst.msk [vmem:[#allocation5 + $0x10] sm:$0x3] %vm1872_vm11, %v1991_v54  ;;  %v782_v27 = vpop.permute.xlu1 %781  ;;  %v6366_v54 = vld [vmem:[%s9333_s6 + $0x3c4] ss:$8 sps:$4 sm:$0xff]  }
 0x377   :  { %810 = vst.msk [vmem:[#allocation3 + $0x120] sm:$0x3] %vm809_vm14, %v782_v27  ;;  %v2251_v0 = vcombine.high %v2249_v60, %v2249_v60  ;;  %v2371_v14 = vpack.c.bf16 %v2249_v60, %v2249_v60  ;;  %v2370_v57 = vpack.c.bf16 %v2250_v20, %v2250_v20  ;;  %v6369_v60 = vld [vmem:[%s9333_s6 + $0x2f4] ss:$8 sps:$4 sm:$0xff]   ;;  %v6364_v27 = vld [vmem:[%s9333_s6 + $0x3c0] ss:$8 sps:$4 sm:$0xff]  }
 0x378   :  { %v6376_v20 = vld [vmem:[%s9333_s6 + $0x3a0] ss:$8 sps:$4 sm:$0xff]  }
 0x379   :  { %v2021_v17 = vpop.permute.xlu0 %2020  ;;  %v2372_v24 = vpack.c.bf16 %v2251_v0, %v2251_v0  ;;  %v6367_v0 = vld [vmem:[%s9333_s6 + $0x2f0] ss:$8 sps:$4 sm:$0xff]  }
 0x37a   :  { %2023 = vst.msk [vmem:[#allocation5 + $0x14] sm:$0x3] %vm1872_vm11, %v2021_v17  ;;  %v1946_v16 = vpop.permute.xlu1 %1945  ;;  %v6375_v17 = vld [vmem:[%s9333_s6 + $0x2e4] ss:$8 sps:$4 sm:$0xff]  }
 0x37b   :  { %1948 = vst.msk [vmem:[#allocation5 + $0xa] sm:$0x3] %vm1872_vm11, %v1946_v16  ;;  %4834 = vmatprep.mubr.bf16.mxu0 %v2372_v24  ;;  %v6370_v24 = vld [vmem:[%s9333_s6 + $0x3b0] ss:$8 sps:$4 sm:$0xff]   ;;  %v6378_v16 = vld [vmem:[%s9333_s6 + $0x3a4] ss:$8 sps:$4 sm:$0xff]  }
 0x37c   :  { %4835 = vmatmul.mubr.bf16.vlgmr.msra.gmra.mxu0 %v2371_v14  ;;  %v6381_v14 = vld [vmem:[%s9333_s6 + $0x2d4] ss:$8 sps:$4 sm:$0xff]  }
 0x37d   :  { %4885 = vmatpush1.bf16.msra.mxu0 %v6297_v2  ;;  %v6373_v2 = vld [vmem:[%s9333_s6 + $0x2e0] ss:$8 sps:$4 sm:$0xff]  }
 0x37e   :  { %v1976_v18 = vpop.permute.xlu1 %1975  ;;  %4886 = vmatprep.subr.bf16.mxu0 %v6305_v46  ;;  %v1458_v11 = vld [vmem:[#allocation3 + $0x120] sm:$0x3] }
 0x37f   :  { %1978 = vst.msk [vmem:[#allocation5 + $0xe] sm:$0x3] %vm1872_vm11, %v1976_v18  ;;  %v1479_v42 = vpack.c.bf16 %v1458_v11, %v1458_v11  ;;  %v6384_v18 = vld [vmem:[%s9333_s6 + $0x394] ss:$8 sps:$4 sm:$0xff]   ;;  %v6387_v11 = vld [vmem:[%s9333_s6 + $0x2c4] ss:$8 sps:$4 sm:$0xff]  }
 0x381   :  { %4887 = vmatpush1.bf16.msra.mxu0 %v6303_v35  ;;  %1735 = vmatmul.mubr.bf16.gmra.mxu1 %v1479_v42  ;;  %v6379_v35 = vld [vmem:[%s9333_s6 + $0x2d0] ss:$8 sps:$4 sm:$0xff]  }
 0x382   :  { %4793 = vmatprep.mubr.bf16.mxu1 %v2370_v57  ;;  %v2006_v47 = vpop.permute.xlu1 %2005  ;;  %4888 = vmatprep.subr.bf16.mxu0 %v6311_v41  ;;  %v6382_v42 = vld [vmem:[%s9333_s6 + $0x390] ss:$8 sps:$4 sm:$0xff]   ;;  %v6385_v57 = vld [vmem:[%s9333_s6 + $0x2c0] ss:$8 sps:$4 sm:$0xff]  }
 0x383   :  { %2008 = vst.msk [vmem:[#allocation5 + $0x12] sm:$0x3] %vm1872_vm11, %v2006_v47  ;;  %v6393_v47 = vld [vmem:[%s9333_s6 + $0x2b4] ss:$8 sps:$4 sm:$0xff]  }
 0x385   :  { %4889 = vmatpush1.bf16.msra.mxu0 %v6309_v8  ;;  %v6390_v8 = vld [vmem:[%s9333_s6 + $0x384] ss:$8 sps:$4 sm:$0xff]  }
 0x386   :  { %v2036_v62 = vpop.permute.xlu1 %2035  ;;  %4890 = vmatprep.subr.bf16.mxu0 %v6317_v45  ;;  %v2222_v29 = vld [vmem:[#allocation5 + $0x8] sm:$0xff] }
 0x387   :  { %2038 = vst.msk [vmem:[#allocation5 + $0x16] sm:$0x3] %vm1872_vm11, %v2036_v62  ;;  %v8173_v3 = vrot.slane %v2222_v29, %v8131_v63  ;;  %v2252_v48 = vcombine.high %v2222_v29, %v2222_v29  ;;  %v6391_v62 = vld [vmem:[%s9333_s6 + $0x2b0] ss:$8 sps:$4 sm:$0xff]  }
 0x389   :  { %4891 = vmatpush1.bf16.msra.mxu0 %v6315_v25  ;;  %4794 = vmatmul.mubr.bf16.vlgmr.msra.gmra.mxu1 %v2369_v5  ;;  %v2267_v26 = vcombine.high %v8173_v3, %v8173_v3  ;;  %v8181_v34 = vrot.slane %v2252_v48, %v8131_v63  ;;  %v6388_v25 = vld [vmem:[%s9333_s6 + $0x380] ss:$8 sps:$4 sm:$0xff]   ;;  %v6394_v5 = vld [vmem:[%s9333_s6 + $0x570] ss:$8 sps:$4 sm:$0xff]  }
 0x38a   :  { %4844 = vmatpush1.bf16.msra.mxu1 %v6318_v10  ;;  %4892 = vmatprep.subr.bf16.mxu0 %v6323_v59  ;;  %v6396_v10 = vld [vmem:[%s9333_s6 + $0x574] ss:$8 sps:$4 sm:$0xff]   ;;  %v6399_v59 = vld [vmem:[%s9333_s6 + $0x2a4] ss:$8 sps:$4 sm:$0xff]   ;;  %v6397_v48 = vld [vmem:[%s9333_s6 + $0x2a0] ss:$8 sps:$4 sm:$0xff]  }
 0x38b   :  { %4845 = vmatprep.subr.bf16.mxu1 %v6326_v15  ;;  %v2374_v12 = vpack.c.bf16 %v2267_v26, %v2267_v26  ;;  %v2268_v7 = vcombine.high %v8181_v34, %v8181_v34  ;;  %v2375_v15 = vpack.c.bf16 %v8181_v34, %v8181_v34  ;;  %v6401_v34 = vld [vmem:[%s9333_s6 + $0x560] ss:$8 sps:$4 sm:$0xff]  }
 0x38d   :  { %4893 = vmatpush1.bf16.msra.mxu0 %v6321_v33  ;;  %4875 = vmatprep.mubr.bf16.mxu1 %v2374_v12  ;;  %v2376_v43 = vpack.c.bf16 %v2268_v7, %v2268_v7  ;;  %v6403_v33 = vld [vmem:[%s9333_s6 + $0x564] ss:$8 sps:$4 sm:$0xff]   ;;  %v6409_v12 = vld [vmem:[%s9333_s6 + $0x554] ss:$8 sps:$4 sm:$0xff]  }
 0x38e   :  { %4846 = vmatpush1.bf16.msra.mxu1 %v6324_v9  ;;  %4894 = vmatprep.subr.bf16.mxu0 %v6329_v1  ;;  %v2223_v46 = vld [vmem:[#allocation5 + $0x10] sm:$0xff] }
 0x38f   :  { %4916 = vmatprep.mubr.bf16.mxu0 %v2376_v43  ;;  %4847 = vmatprep.subr.bf16.mxu1 %v6333_v37  ;;  %v2269_v41 = vcombine.high %v2223_v46, %v2223_v46  ;;  %v6406_v9 = vld [vmem:[%s9333_s6 + $0x294] ss:$8 sps:$4 sm:$0xff]   ;;  %v6404_v1 = vld [vmem:[%s9333_s6 + $0x290] ss:$8 sps:$4 sm:$0xff]   ;;  %v6412_v37 = vld [vmem:[%s9333_s6 + $0x284] ss:$8 sps:$4 sm:$0xff]   ;;  %v8359_v43 = vrot.slane %v2223_v46, %v8131_v63 }
 0x390   :  { %v6454_v46 = vld [vmem:[%s9333_s6 + $0x414] ss:$8 sps:$4 sm:$0xff]  }
 0x391   :  { %4895 = vmatpush1.bf16.msra.mxu0 %v6327_v36  ;;  %v8315_v45 = vrot.slane %v2269_v41, %v8131_v63  ;;  %v6455_v41 = vld [vmem:[%s9333_s6 + $0x5d0] ss:$8 sps:$4 sm:$0xff]  }
 0x392   :  { %4848 = vmatpush1.bf16.msra.mxu1 %v6331_v21  ;;  %4896 = vmatprep.subr.bf16.mxu0 %v6336_v38  ;;  %v6407_v21 = vld [vmem:[%s9333_s6 + $0x550] ss:$8 sps:$4 sm:$0xff]   ;;  %v6410_v38 = vld [vmem:[%s9333_s6 + $0x280] ss:$8 sps:$4 sm:$0xff]  }
 0x393   :  { %4849 = vmatprep.subr.bf16.mxu1 %v6339_v49  ;;  %v2285_v29 = vcombine.high %v8315_v45, %v8315_v45  ;;  %v6415_v49 = vld [vmem:[%s9333_s6 + $0x544] ss:$8 sps:$4 sm:$0xff]  }
 0x395   :  { %4897 = vmatpush1.bf16.msra.mxu0 %v6334_v6  ;;  %v2380_v26 = vpack.c.bf16 %v2285_v29, %v2285_v29  ;;  %v6470_v29 = vld [vmem:[%s9333_s6 + $0x4e0] ss:$8 sps:$4 sm:$0xff]  }
 0x396   :  { %4850 = vmatpush1.bf16.msra.mxu1 %v6337_v53  ;;  %4898 = vmatprep.subr.bf16.mxu0 %v6342_v13  ;;  %v6418_v53 = vld [vmem:[%s9333_s6 + $0x474] ss:$8 sps:$4 sm:$0xff]  }
 0x397   :  { %4851 = vmatprep.subr.bf16.mxu1 %v6345_v50  ;;  %v2284_v50 = vcombine.high %v8359_v43, %v8359_v43 }
 0x399   :  { %4899 = vmatpush1.bf16.msra.mxu0 %v6340_v61  ;;  %v6413_v61 = vld [vmem:[%s9333_s6 + $0x540] ss:$8 sps:$4 sm:$0xff]  }
 0x39a   :  { %4852 = vmatpush1.bf16.msra.mxu1 %v6343_v28  ;;  %4900 = vmatprep.subr.bf16.mxu0 %v6348_v51  ;;  %v6416_v28 = vld [vmem:[%s9333_s6 + $0x470] ss:$8 sps:$4 sm:$0xff]   ;;  %v2373_v51 = vpack.c.bf16 %v8173_v3, %v8173_v3  ;;  %v6422_v3 = vld [vmem:[%s9333_s6 + $0x460] ss:$8 sps:$4 sm:$0xff]  }
 0x39b   :  { %4853 = vmatprep.subr.bf16.mxu1 %v6351_v39  ;;  %v6421_v39 = vld [vmem:[%s9333_s6 + $0x534] ss:$8 sps:$4 sm:$0xff]  }
 0x39d   :  { %4901 = vmatpush2.bf16.msra.mxu0 %v6346_v58  ;;  %v6424_v58 = vld [vmem:[%s9333_s6 + $0x464] ss:$8 sps:$4 sm:$0xff]  }
 0x39e   :  { %4854 = vmatpush1.bf16.msra.mxu1 %v6349_v23  ;;  %4902 = vmatprep.subr.bf16.mxu0 %v6354_v44  ;;  %v2378_v23 = vpack.c.bf16 %v2284_v50, %v2284_v50  ;;  %v6419_v44 = vld [vmem:[%s9333_s6 + $0x530] ss:$8 sps:$4 sm:$0xff]  }
 0x39f   :  { %4855 = vmatprep.subr.bf16.mxu1 %v6357_v19  ;;  %v6427_v19 = vld [vmem:[%s9333_s6 + $0x524] ss:$8 sps:$4 sm:$0xff]  }
 0x3a1   :  { %4903 = vmatpush2.bf16.msra.mxu0 %v6352_v52  ;;  %v6430_v52 = vld [vmem:[%s9333_s6 + $0x454] ss:$8 sps:$4 sm:$0xff]  }
 0x3a2   :  { %4856 = vmatpush1.bf16.msra.mxu1 %v6355_v30  ;;  %4904 = vmatprep.subr.bf16.mxu0 %v6360_v31  ;;  %v6425_v30 = vld [vmem:[%s9333_s6 + $0x520] ss:$8 sps:$4 sm:$0xff]   ;;  %v6428_v31 = vld [vmem:[%s9333_s6 + $0x450] ss:$8 sps:$4 sm:$0xff]  }
 0x3a3   :  { %4857 = vmatprep.subr.bf16.mxu1 %v6363_v32  ;;  %v6433_v32 = vld [vmem:[%s9333_s6 + $0x514] ss:$8 sps:$4 sm:$0xff]  }
 0x3a5   :  { %4905 = vmatpush2.bf16.msra.mxu0 %v6358_v56  ;;  %v6436_v56 = vld [vmem:[%s9333_s6 + $0x444] ss:$8 sps:$4 sm:$0xff]  }
 0x3a6   :  { %4858 = vmatpush1.bf16.msra.mxu1 %v6361_v55  ;;  %4906 = vmatprep.subr.bf16.mxu0 %v6366_v54  ;;  %v6431_v55 = vld [vmem:[%s9333_s6 + $0x510] ss:$8 sps:$4 sm:$0xff]   ;;  %v6434_v54 = vld [vmem:[%s9333_s6 + $0x440] ss:$8 sps:$4 sm:$0xff]  }
 0x3a7   :  { %4859 = vmatprep.subr.bf16.mxu1 %v6369_v60  ;;  %v6439_v60 = vld [vmem:[%s9333_s6 + $0x504] ss:$8 sps:$4 sm:$0xff]  }
 0x3a9   :  { %4907 = vmatpush2.bf16.msra.mxu0 %v6364_v27  ;;  %v6442_v27 = vld [vmem:[%s9333_s6 + $0x434] ss:$8 sps:$4 sm:$0xff]  }
 0x3aa   :  { %4860 = vmatpush2.bf16.msra.mxu1 %v6367_v0  ;;  %4908 = vmatprep.subr.bf16.mxu0 %v6372_v40  ;;  %v6437_v0 = vld [vmem:[%s9333_s6 + $0x500] ss:$8 sps:$4 sm:$0xff]   ;;  %v6440_v40 = vld [vmem:[%s9333_s6 + $0x430] ss:$8 sps:$4 sm:$0xff]  }
 0x3ab   :  { %4861 = vmatprep.subr.bf16.mxu1 %v6375_v17  ;;  %v6445_v17 = vld [vmem:[%s9333_s6 + $0x5f4] ss:$8 sps:$4 sm:$0xff]  }
 0x3ad   :  { %4909 = vmatpush2.bf16.msra.mxu0 %v6370_v24  ;;  %v6448_v24 = vld [vmem:[%s9333_s6 + $0x424] ss:$8 sps:$4 sm:$0xff]  }
 0x3ae   :  { %4862 = vmatpush2.bf16.msra.mxu1 %v6373_v2  ;;  %4910 = vmatprep.subr.bf16.mxu0 %v6378_v16  ;;  %v6443_v2 = vld [vmem:[%s9333_s6 + $0x5f0] ss:$8 sps:$4 sm:$0xff]   ;;  %v6446_v16 = vld [vmem:[%s9333_s6 + $0x420] ss:$8 sps:$4 sm:$0xff]  }
 0x3af   :  { %4863 = vmatprep.subr.bf16.mxu1 %v6381_v14  ;;  %v6451_v14 = vld [vmem:[%s9333_s6 + $0x5e4] ss:$8 sps:$4 sm:$0xff]  }
 0x3b1   :  { %4911 = vmatpush2.bf16.msra.mxu0 %v6376_v20  ;;  %v6449_v20 = vld [vmem:[%s9333_s6 + $0x5e0] ss:$8 sps:$4 sm:$0xff]  }
 0x3b2   :  { %4864 = vmatpush2.bf16.msra.mxu1 %v6379_v35  ;;  %4912 = vmatprep.subr.bf16.mxu0 %v6384_v18  ;;  %v6452_v35 = vld [vmem:[%s9333_s6 + $0x410] ss:$8 sps:$4 sm:$0xff]   ;;  %v6457_v18 = vld [vmem:[%s9333_s6 + $0x5d4] ss:$8 sps:$4 sm:$0xff]  }
 0x3b3   :  { %4865 = vmatprep.subr.bf16.mxu1 %v6387_v11  ;;  %v6460_v11 = vld [vmem:[%s9333_s6 + $0x404] ss:$8 sps:$4 sm:$0xff]  }
 0x3b5   :  { %4913 = vmatpush2.bf16.msra.mxu0 %v6382_v42  ;;  %v6458_v42 = vld [vmem:[%s9333_s6 + $0x400] ss:$8 sps:$4 sm:$0xff]  }
 0x3b6   :  { %4866 = vmatpush2.bf16.msra.mxu1 %v6385_v57  ;;  %4914 = vmatprep.subr.bf16.mxu0 %v6390_v8  ;;  %v6463_v57 = vld [vmem:[%s9333_s6 + $0x5c4] ss:$8 sps:$4 sm:$0xff]   ;;  %v6466_v8 = vld [vmem:[%s9333_s6 + $0x4f4] ss:$8 sps:$4 sm:$0xff]  }
 0x3b7   :  { %4867 = vmatprep.subr.bf16.mxu1 %v6393_v47  ;;  %v6461_v47 = vld [vmem:[%s9333_s6 + $0x5c0] ss:$8 sps:$4 sm:$0xff]  }
 0x3b9   :  { %4915 = vmatpush2.bf16.msra.mxu0 %v6388_v25  ;;  %v6464_v25 = vld [vmem:[%s9333_s6 + $0x4f0] ss:$8 sps:$4 sm:$0xff]  }
 0x3ba   :  { %4868 = vmatpush2.bf16.msra.mxu1 %v6391_v62  ;;  %4966 = vmatprep.subr.bf16.mxu0 %v6396_v10  ;;  %v6469_v62 = vld [vmem:[%s9333_s6 + $0x5b4] ss:$8 sps:$4 sm:$0xff]   ;;  %v6472_v10 = vld [vmem:[%s9333_s6 + $0x4e4] ss:$8 sps:$4 sm:$0xff]  }
 0x3bb   :  { %4869 = vmatprep.subr.bf16.mxu1 %v6399_v59  ;;  %v6467_v59 = vld [vmem:[%s9333_s6 + $0x5b0] ss:$8 sps:$4 sm:$0xff]  }
 0x3bc   :  { %4917 = vmatmul.mubr.bf16.vlgmr.msra.gmra.mxu0 %v2375_v15  ;;  %v6478_v15 = vld [vmem:[%s9333_s6 + $0x4d4] ss:$8 sps:$4 sm:$0xff]  }
 0x3bd   :  { %4967 = vmatpush1.bf16.msra.mxu0 %v6394_v5  ;;  %4998 = vmatprep.mubr.bf16.mxu0 %v2380_v26  ;;  %v6475_v5 = vld [vmem:[%s9333_s6 + $0x5a4] ss:$8 sps:$4 sm:$0xff]   ;;  %v6476_v26 = vld [vmem:[%s9333_s6 + $0x4d0] ss:$8 sps:$4 sm:$0xff]  }
 0x3be   :  { %4870 = vmatpush2.bf16.msra.mxu1 %v6397_v48  ;;  %4968 = vmatprep.subr.bf16.mxu0 %v6403_v33  ;;  %v6473_v33 = vld [vmem:[%s9333_s6 + $0x5a0] ss:$8 sps:$4 sm:$0xff]  }
 0x3bf   :  { %v2066_v7 = vpop.permute.xlu1 %2065  ;;  %4871 = vmatprep.subr.bf16.mxu1 %v6406_v9  ;;  %v6481_v9 = vld [vmem:[%s9333_s6 + $0x594] ss:$8 sps:$4 sm:$0xff]  }
 0x3c0   :  { %2068 = vst.msk [vmem:[#allocation5 + $0x1a] sm:$0x3] %vm1872_vm11, %v2066_v7  ;;  %v2051_v36 = vpop.permute.xlu0 %2050  ;;  %v6482_v7 = vld [vmem:[%s9333_s6 + $0x4c0] ss:$8 sps:$4 sm:$0xff]  }
 0x3c1   :  { %2053 = vst.msk [vmem:[#allocation5 + $0x18] sm:$0x3] %vm1872_vm11, %v2051_v36  ;;  %4969 = vmatpush1.bf16.msra.mxu0 %v6401_v34  ;;  %v6484_v34 = vld [vmem:[%s9333_s6 + $0x4c4] ss:$8 sps:$4 sm:$0xff]   ;;  %v6490_v36 = vld [vmem:[%s9333_s6 + $0x4b4] ss:$8 sps:$4 sm:$0xff]  }
 0x3c2   :  { %4872 = vmatpush2.bf16.msra.mxu1 %v6404_v1  ;;  %4970 = vmatprep.subr.bf16.mxu0 %v6409_v12  ;;  %v6479_v12 = vld [vmem:[%s9333_s6 + $0x590] ss:$8 sps:$4 sm:$0xff]  }
 0x3c3   :  { %v2096_v6 = vpop.permute.xlu1 %2095  ;;  %4873 = vmatprep.subr.bf16.mxu1 %v6412_v37  ;;  %v6487_v37 = vld [vmem:[%s9333_s6 + $0x584] ss:$8 sps:$4 sm:$0xff]  }
 0x3c4   :  { %2098 = vst.msk [vmem:[#allocation5 + $0x1e] sm:$0x3] %vm1872_vm11, %v2096_v6  ;;  %v6493_v6 = vld [vmem:[%s9333_s6 + $0x774] ss:$8 sps:$4 sm:$0xff]  }
 0x3c5   :  { %v2081_v13 = vpop.permute.xlu0 %2080  ;;  %4971 = vmatpush1.bf16.msra.mxu0 %v6407_v21 }
 0x3c6   :  { %2083 = vst.msk [vmem:[#allocation5 + $0x1c] sm:$0x3] %vm1872_vm11, %v2081_v13  ;;  %4874 = vmatpush2.bf16.msra.mxu1 %v6410_v38  ;;  %4972 = vmatprep.subr.bf16.mxu0 %v6415_v49  ;;  %v6485_v38 = vld [vmem:[%s9333_s6 + $0x580] ss:$8 sps:$4 sm:$0xff]   ;;  %v6488_v49 = vld [vmem:[%s9333_s6 + $0x4b0] ss:$8 sps:$4 sm:$0xff]  }
 0x3c7   :  { %4925 = vmatprep.subr.bf16.mxu1 %v6418_v53  ;;  %v6496_v13 = vld [vmem:[%s9333_s6 + $0x4a4] ss:$8 sps:$4 sm:$0xff]  }
 0x3c9   :  { %4876 = vmatmul.mubr.bf16.vlgmr.msra.gmra.mxu1 %v2373_v51  ;;  %4973 = vmatpush1.bf16.msra.mxu0 %v6413_v61  ;;  %v2379_v51 = vpack.c.bf16 %v8315_v45, %v8315_v45 }
 0x3ca   :  { %4926 = vmatpush1.bf16.msra.mxu1 %v6416_v28  ;;  %4957 = vmatprep.mubr.bf16.mxu1 %v2378_v23  ;;  %v6491_v28 = vld [vmem:[%s9333_s6 + $0x770] ss:$8 sps:$4 sm:$0xff]  }
 0x3cb   :  { %4974 = vmatprep.subr.bf16.mxu0 %v6421_v39  ;;  %4927 = vmatprep.subr.bf16.mxu1 %v6424_v58  ;;  %v6494_v39 = vld [vmem:[%s9333_s6 + $0x4a0] ss:$8 sps:$4 sm:$0xff]   ;;  %v6500_v58 = vld [vmem:[%s9333_s6 + $0x764] ss:$8 sps:$4 sm:$0xff]  }
 0x3cd   :  { %4975 = vmatpush1.bf16.msra.mxu0 %v6419_v44  ;;  %v2224_v48 = vld [vmem:[#allocation5 + $0x18] sm:$0xff] }
 0x3ce   :  { %4928 = vmatpush1.bf16.msra.mxu1 %v6422_v3  ;;  %4976 = vmatprep.subr.bf16.mxu0 %v6427_v19  ;;  %v2286_v1 = vcombine.high %v2224_v48, %v2224_v48  ;;  %v6503_v3 = vld [vmem:[%s9333_s6 + $0x494] ss:$8 sps:$4 sm:$0xff]   ;;  %v6498_v19 = vld [vmem:[%s9333_s6 + $0x760] ss:$8 sps:$4 sm:$0xff]  }
 0x3cf   :  { %4929 = vmatprep.subr.bf16.mxu1 %v6430_v52  ;;  %v6501_v52 = vld [vmem:[%s9333_s6 + $0x490] ss:$8 sps:$4 sm:$0xff]  }
 0x3d0   :  { %v8525_v21 = vrot.slane %v2286_v1, %v8131_v63  ;;  %v6530_v1 = vld [vmem:[%s9333_s6 + $0x714] ss:$8 sps:$4 sm:$0xff]  }
 0x3d1   :  { %4977 = vmatpush1.bf16.msra.mxu0 %v6425_v30  ;;  %v6506_v30 = vld [vmem:[%s9333_s6 + $0x754] ss:$8 sps:$4 sm:$0xff]  }
 0x3d2   :  { %4930 = vmatpush1.bf16.msra.mxu1 %v6428_v31  ;;  %4978 = vmatprep.subr.bf16.mxu0 %v6433_v32  ;;  %v2302_v50 = vcombine.high %v8525_v21, %v8525_v21  ;;  %v6509_v32 = vld [vmem:[%s9333_s6 + $0x484] ss:$8 sps:$4 sm:$0xff]  }
 0x3d3   :  { %4931 = vmatprep.subr.bf16.mxu1 %v6436_v56  ;;  %v8574_v56 = vrot.slane %v2224_v48, %v8131_v63  ;;  %v6522_v48 = vld [vmem:[%s9333_s6 + $0x720] ss:$8 sps:$4 sm:$0xff]  }
 0x3d4   :  { %v2384_v44 = vpack.c.bf16 %v2302_v50, %v2302_v50  ;;  %v6537_v50 = vld [vmem:[%s9333_s6 + $0x630] ss:$8 sps:$4 sm:$0xff]  }
 0x3d5   :  { %4979 = vmatpush1.bf16.msra.mxu0 %v6431_v55 }
 0x3d6   :  { %4932 = vmatpush1.bf16.msra.mxu1 %v6434_v54  ;;  %4980 = vmatprep.subr.bf16.mxu0 %v6439_v60  ;;  %v6504_v54 = vld [vmem:[%s9333_s6 + $0x750] ss:$8 sps:$4 sm:$0xff]   ;;  %v6507_v60 = vld [vmem:[%s9333_s6 + $0x480] ss:$8 sps:$4 sm:$0xff]  }
 0x3d7   :  { %4933 = vmatprep.subr.bf16.mxu1 %v6442_v27  ;;  %v6512_v27 = vld [vmem:[%s9333_s6 + $0x744] ss:$8 sps:$4 sm:$0xff]  }
 0x3d9   :  { %4981 = vmatpush1.bf16.msra.mxu0 %v6437_v0 }
 0x3da   :  { %4934 = vmatpush1.bf16.msra.mxu1 %v6440_v40  ;;  %4982 = vmatprep.subr.bf16.mxu0 %v6445_v17  ;;  %v6515_v40 = vld [vmem:[%s9333_s6 + $0x674] ss:$8 sps:$4 sm:$0xff]   ;;  %v2301_v17 = vcombine.high %v8574_v56, %v8574_v56 }
 0x3db   :  { %4935 = vmatprep.subr.bf16.mxu1 %v6448_v24 }
 0x3dd   :  { %4983 = vmatpush2.bf16.msra.mxu0 %v6443_v2 }
 0x3de   :  { %4936 = vmatpush1.bf16.msra.mxu1 %v6446_v16  ;;  %4984 = vmatprep.subr.bf16.mxu0 %v6451_v14  ;;  %v6510_v16 = vld [vmem:[%s9333_s6 + $0x740] ss:$8 sps:$4 sm:$0xff]   ;;  %v6513_v14 = vld [vmem:[%s9333_s6 + $0x670] ss:$8 sps:$4 sm:$0xff]  }
 0x3df   :  { %4937 = vmatprep.subr.bf16.mxu1 %v6454_v46 }
 0x3e1   :  { %4985 = vmatpush2.bf16.msra.mxu0 %v6449_v20  ;;  %v2377_v20 = vpack.c.bf16 %v8359_v43, %v8359_v43  ;;  %v8614_v43 = vld [vmem:[%s9332_s5] ss:$0 sm:$0xff]  ;;  %s5460_s5 = sshll.u32 %s6858_s12, 4  ;;  %s5461_s5 = int_to_ptr.vmem [resolvable:$true] %s5460_s5 }
 0x3e2   :  { %4938 = vmatpush1.bf16.msra.mxu1 %v6452_v35  ;;  %4986 = vmatprep.subr.bf16.mxu0 %v6457_v18  ;;  %v6518_v35 = vld [vmem:[%s9333_s6 + $0x734] ss:$8 sps:$4 sm:$0xff]   ;;  %v6521_v18 = vld [vmem:[%s9333_s6 + $0x664] ss:$8 sps:$4 sm:$0xff]   ;;  %s6820_s13 = scalar_lea.vmem %s5461_s5, 32  ;;  %p6825_p1 = scmp.lt.s32.totalorder %s5461_s5, %s5461_s5 }
 0x3e3   :  { %4939 = vmatprep.subr.bf16.mxu1 %v6460_v11  ;;  %p6821_p0 = scmp.ne.s32.totalorder %s5461_s5, %s6820_s13  ;;  %p6826_p2 = scmp.lt.s32.totalorder %s6820_s13, %s6820_s13 }
 0x3e5   :  { %4987 = vmatpush2.bf16.msra.mxu0 %v6455_v41  ;;  %v2382_v41 = vpack.c.bf16 %v2301_v17, %v2301_v17  ;;  %v6552_v17 = vld [vmem:[%s9333_s6 + $0x7d0] ss:$8 sps:$4 sm:$0xff]   ;;  %p6827_p3 = por %p6826_p2, %p6825_p1 }
 0x3e6   :  { %4940 = vmatpush1.bf16.msra.mxu1 %v6458_v42  ;;  %4988 = vmatprep.subr.bf16.mxu0 %v6463_v57  ;;  %v6516_v57 = vld [vmem:[%s9333_s6 + $0x730] ss:$8 sps:$4 sm:$0xff]  }
 0x3e7   :  { %4941 = vmatprep.subr.bf16.mxu1 %v6466_v8  ;;  %p6828_p4 = pnand %p6827_p3, %p6821_p0 }
 0x3e9   :  { %4989 = vmatpush2.bf16.msra.mxu0 %v6461_v47 }
 0x3ea   :  { %4942 = vmatpush2.bf16.msra.mxu1 %v6464_v25  ;;  %4990 = vmatprep.subr.bf16.mxu0 %v6469_v62  ;;  %v6519_v25 = vld [vmem:[%s9333_s6 + $0x660] ss:$8 sps:$4 sm:$0xff]   ;;  %v6524_v62 = vld [vmem:[%s9333_s6 + $0x724] ss:$8 sps:$4 sm:$0xff]  }
 0x3eb   :  { %4943 = vmatprep.subr.bf16.mxu1 %v6472_v10 }
 0x3ed   :  { %4991 = vmatpush2.bf16.msra.mxu0 %v6467_v59  ;;  %v6527_v59 = vld [vmem:[%s9333_s6 + $0x654] ss:$8 sps:$4 sm:$0xff]  }
 0x3ee   :  { %4944 = vmatpush2.bf16.msra.mxu1 %v6470_v29  ;;  %4992 = vmatprep.subr.bf16.mxu0 %v6475_v5 }
 0x3ef   :  { %4945 = vmatprep.subr.bf16.mxu1 %v6478_v15 }
 0x3f1   :  { %4993 = vmatpush2.bf16.msra.mxu0 %v6473_v33 }
 0x3f2   :  { %4946 = vmatpush2.bf16.msra.mxu1 %v6476_v26  ;;  %4994 = vmatprep.subr.bf16.mxu0 %v6481_v9 }
 0x3f3   :  { %4947 = vmatprep.subr.bf16.mxu1 %v6484_v34  ;;  %v6525_v34 = vld [vmem:[%s9333_s6 + $0x650] ss:$8 sps:$4 sm:$0xff]  }
 0x3f5   :  { %4995 = vmatpush2.bf16.msra.mxu0 %v6479_v12  ;;  %v6533_v12 = vld [vmem:[%s9333_s6 + $0x644] ss:$8 sps:$4 sm:$0xff]  }
 0x3f6   :  { %4948 = vmatpush2.bf16.msra.mxu1 %v6482_v7  ;;  %4996 = vmatprep.subr.bf16.mxu0 %v6487_v37 }
 0x3f7   :  { %v8536_v53 = vpop.f32.mrf.mxu0  ;;  %4949 = vmatprep.subr.bf16.mxu1 %v6490_v36  ;;  %v6528_v36 = vld [vmem:[%s9333_s6 + $0x710] ss:$8 sps:$4 sm:$0xff]  }
 0x3f9   :  { %4997 = vmatpush2.bf16.msra.mxu0 %v6485_v38  ;;  %v6070_v61 = vpop.f32.mrf.mxu0 }
 0x3fa   :  { %4950 = vmatpush2.bf16.msra.mxu1 %v6488_v49  ;;  %5048 = vmatprep.subr.bf16.mxu0 %v6493_v6  ;;  %v6531_v49 = vld [vmem:[%s9333_s6 + $0x640] ss:$8 sps:$4 sm:$0xff]   ;;  %v6536_v6 = vld [vmem:[%s9333_s6 + $0x704] ss:$8 sps:$4 sm:$0xff]   ;;  %v6542_v61 = vld [vmem:[%s9333_s6 + $0x7f4] ss:$8 sps:$4 sm:$0xff]  }
 0x3fb   :  { %v8554_v23 = vpop.f32.mrf.mxu0  ;;  %4951 = vmatprep.subr.bf16.mxu1 %v6496_v13  ;;  %v6534_v13 = vld [vmem:[%s9333_s6 + $0x700] ss:$8 sps:$4 sm:$0xff]  }
 0x3fc   :  { %4999 = vmatmul.mubr.bf16.vlgmr.msra.gmra.mxu0 %v2379_v51 }
 0x3fd   :  { %5049 = vmatpush1.bf16.msra.mxu0 %v6491_v28  ;;  %5080 = vmatprep.mubr.bf16.mxu0 %v2384_v44  ;;  %v6071_v45 = vpop.f32.mrf.mxu0  ;;  %v6545_v28 = vld [vmem:[%s9333_s6 + $0x624] ss:$8 sps:$4 sm:$0xff]   ;;  %v6540_v44 = vld [vmem:[%s9333_s6 + $0x7f0] ss:$8 sps:$4 sm:$0xff]  }
 0x3fe   :  { %4952 = vmatpush2.bf16.msra.mxu1 %v6494_v39  ;;  %5050 = vmatprep.subr.bf16.mxu0 %v6500_v58  ;;  %v6548_v45 = vld [vmem:[%s9333_s6 + $0x7e4] ss:$8 sps:$4 sm:$0xff]  }
 0x3ff   :  { %v8568_v31 = vpop.f32.mrf.mxu0  ;;  %4953 = vmatprep.subr.bf16.mxu1 %v6503_v3  ;;  %v6543_v3 = vld [vmem:[%s9333_s6 + $0x620] ss:$8 sps:$4 sm:$0xff]  }
 0x401   :  { %5051 = vmatpush1.bf16.msra.mxu0 %v6498_v19  ;;  %v6074_v55 = vpop.f32.mrf.mxu0  ;;  %v6551_v19 = vld [vmem:[%s9333_s6 + $0x614] ss:$8 sps:$4 sm:$0xff]  }
 0x402   :  { %4954 = vmatpush2.bf16.msra.mxu1 %v6501_v52  ;;  %5052 = vmatprep.subr.bf16.mxu0 %v6506_v30 }
 0x403   :  { %v8585_v0 = vpop.f32.mrf.mxu0  ;;  %4955 = vmatprep.subr.bf16.mxu1 %v6509_v32 }
 0x405   :  { %5053 = vmatpush1.bf16.msra.mxu0 %v6504_v54  ;;  %v5991_v24 = vpop.f32.mrf.mxu1  ;;  %v6075_v2 = vpop.f32.mrf.mxu0  ;;  %v6546_v54 = vld [vmem:[%s9333_s6 + $0x7e0] ss:$8 sps:$4 sm:$0xff]  }
 0x406   :  { %4956 = vmatpush2.bf16.msra.mxu1 %v6507_v60  ;;  %5054 = vmatprep.subr.bf16.mxu0 %v6512_v27  ;;  %v6549_v60 = vld [vmem:[%s9333_s6 + $0x610] ss:$8 sps:$4 sm:$0xff]   ;;  %v6554_v27 = vld [vmem:[%s9333_s6 + $0x7d4] ss:$8 sps:$4 sm:$0xff]   ;;  %v6560_v2 = vld [vmem:[%s9333_s6 + $0x7c4] ss:$8 sps:$4 sm:$0xff]  }
 0x407   :  { %v5992_v46 = vpop.f32.mrf.mxu1  ;;  %5007 = vmatprep.subr.bf16.mxu1 %v6515_v40  ;;  %v6557_v40 = vld [vmem:[%s9333_s6 + $0x604] ss:$8 sps:$4 sm:$0xff]  }
 0x408   :  { %v5993_v11 = vadd.f32 %v5992_v46, %v5991_v24  ;;  %v6555_v24 = vld [vmem:[%s9333_s6 + $0x600] ss:$8 sps:$4 sm:$0xff]   ;;  %v6561_v46 = vld [vmem:[%s9333_s6 + $0x6f0] ss:$8 sps:$4 sm:$0xff]  }
 0x409   :  { %4958 = vmatmul.mubr.bf16.vlgmr.msra.gmra.mxu1 %v2377_v20  ;;  %5055 = vmatpush1.bf16.msra.mxu0 %v6510_v16  ;;  %v5994_v42 = vpop.f32.mrf.mxu1  ;;  %v8609_v8 = vpop.f32.mrf.mxu0  ;;  %v6563_v16 = vld [vmem:[%s9333_s6 + $0x6f4] ss:$8 sps:$4 sm:$0xff]  }
 0x40a   :  { %v1721_v47 = vadd.f32 %v8614_v43, %v5993_v11  ;;  %5008 = vmatpush1.bf16.msra.mxu1 %v6513_v14  ;;  %5039 = vmatprep.mubr.bf16.mxu1 %v2382_v41  ;;  %v6558_v14 = vld [vmem:[%s9333_s6 + $0x7c0] ss:$8 sps:$4 sm:$0xff]   ;;  %v6566_v20 = vld [vmem:[%s9333_s6 + $0x7b4] ss:$8 sps:$4 sm:$0xff]   ;;  %v6572_v41 = vld [vmem:[%s9333_s6 + $0x7a4] ss:$8 sps:$4 sm:$0xff]  }
 0x40b   :  { %v5995_v10 = vpop.f32.mrf.mxu1  ;;  %5056 = vmatprep.subr.bf16.mxu0 %v6518_v35  ;;  %5009 = vmatprep.subr.bf16.mxu1 %v6521_v18  ;;  %v6078_v29 = vpop.f32.mrf.mxu0  ;;  %v6569_v35 = vld [vmem:[%s9333_s6 + $0x6e4] ss:$8 sps:$4 sm:$0xff]   ;;  %v6564_v18 = vld [vmem:[%s9333_s6 + $0x7b0] ss:$8 sps:$4 sm:$0xff]   ;;  %v6567_v11 = vld [vmem:[%s9333_s6 + $0x6e0] ss:$8 sps:$4 sm:$0xff]  }
 0x40c   :  { %v1809_v5 = vadd.f32 %v8536_v53, %v1721_v47  ;;  %v5996_v15 = vadd.f32 %v5995_v10, %v5994_v42  ;;  %v6539_v53 = vld [vmem:[%s9333_s6 + $0x634] ss:$8 sps:$4 sm:$0xff]   ;;  %v6570_v47 = vld [vmem:[%s9333_s6 + $0x7a0] ss:$8 sps:$4 sm:$0xff]  }
 0x40d   :  { %5057 = vmatpush1.bf16.msra.mxu0 %v6516_v57  ;;  %v1827_v33 = vpop.f32.mrf.mxu0  ;;  %v6575_v42 = vld [vmem:[%s9333_s6 + $0x6d4] ss:$8 sps:$4 sm:$0xff]  }
 0x40e   :  { %v1838_v26 = vmax.f32 %v1809_v5, 0.0  ;;  %v1724_v9 = vadd.f32 %v8614_v43, %v5996_v15  ;;  %5010 = vmatpush1.bf16.msra.mxu1 %v6519_v25  ;;  %5058 = vmatprep.subr.bf16.mxu0 %v6524_v62  ;;  %v6573_v25 = vld [vmem:[%s9333_s6 + $0x6d0] ss:$8 sps:$4 sm:$0xff]   ;;  %v6578_v62 = vld [vmem:[%s9333_s6 + $0x794] ss:$8 sps:$4 sm:$0xff]  }
 0x40f   :  { %5011 = vmatprep.subr.bf16.mxu1 %v6527_v59  ;;  %v6079_v7 = vpop.f32.mrf.mxu0  ;;  %v6581_v59 = vld [vmem:[%s9333_s6 + $0x6c4] ss:$8 sps:$4 sm:$0xff]   ;;  %v6576_v15 = vld [vmem:[%s9333_s6 + $0x790] ss:$8 sps:$4 sm:$0xff]   ;;  %v6579_v33 = vld [vmem:[%s9333_s6 + $0x6c0] ss:$8 sps:$4 sm:$0xff]  }
 0x410   :  { %1852 = vst.msk [vmem:[#allocation4 + $0x40] sm:$0xff] %vm1843_vm9, %v1838_v26  ;;  %v1812_v37 = vadd.f32 %v8554_v23, %v1724_v9  ;;  %v6584_v26 = vld [vmem:[%s9333_s6 + $0x784] ss:$8 sps:$4 sm:$0xff]   ;;  %v6582_v7 = vld [vmem:[%s9333_s6 + $0x780] ss:$8 sps:$4 sm:$0xff]  }
 0x411   :  { %5059 = vmatpush1.bf16.msra.mxu0 %v6522_v48 }
 0x412   :  { %v1839_v38 = vmax.f32 %v1812_v37, 0.0  ;;  %5012 = vmatpush1.bf16.msra.mxu1 %v6525_v34  ;;  %5060 = vmatprep.subr.bf16.mxu0 %v6530_v1  ;;  %v6587_v34 = vld [vmem:[%s9333_s6 + $0x6b4] ss:$8 sps:$4 sm:$0xff]  }
 0x413   :  { %5013 = vmatprep.subr.bf16.mxu1 %v6533_v12 }
 0x414   :  { %1853 = vst.msk [vmem:[#allocation4 + $0x48] sm:$0xff] %vm1843_vm9, %v1839_v38  ;;  %v6585_v38 = vld [vmem:[%s9333_s6 + $0x6b0] ss:$8 sps:$4 sm:$0xff]  }
 0x415   :  { %5061 = vmatpush1.bf16.msra.mxu0 %v6528_v36 }
 0x416   :  { %5014 = vmatpush1.bf16.msra.mxu1 %v6531_v49  ;;  %5062 = vmatprep.subr.bf16.mxu0 %v6536_v6  ;;  %v6602_v49 = vld [vmem:[%s9333_s6 + $0x974] ss:$8 sps:$4 sm:$0xff]  }
 0x417   :  { %5015 = vmatprep.subr.bf16.mxu1 %v6539_v53  ;;  %v5527_v51 = vld.sshfl [vmem:[#allocation4 + $0x46] sm:$0x3 pattern:$0x76325410]  ;;  %v2114_v39 = vld [vmem:[#allocation4 + $0x44] sm:$0x3] }
 0x418   :  { %2125 = vrot.lane.b32.xlu1 %v5527_v51, %s6855_s17  ;;  %v5526_v58 = vld.sshfl [vmem:[#allocation4 + $0x42] sm:$0x3 pattern:$0x76325410]  ;;  %2115 = vst.msk [vmem:[#allocation5 + $0x22] sm:$0x3] %vm1856_vm10, %v2114_v39 }
 0x419   :  { %v2099_v23 = vld [vmem:[#allocation4 + $0x40] sm:$0x3]  ;;  %5063 = vmatpush1.bf16.msra.mxu0 %v6534_v13  ;;  %2110 = vrot.lane.b32.xlu0 %v5526_v58, %s6855_s17  ;;  %v6600_v53 = vld [vmem:[%s9333_s6 + $0x970] ss:$8 sps:$4 sm:$0xff]  }
 0x41a   :  { %2100 = vst.msk [vmem:[#allocation5 + $0x20] sm:$0x3] %vm1856_vm10, %v2099_v23  ;;  %5016 = vmatpush1.bf16.msra.mxu1 %v6537_v50  ;;  %5064 = vmatprep.subr.bf16.mxu0 %v6542_v61  ;;  %v2383_v50 = vpack.c.bf16 %v8525_v21, %v8525_v21  ;;  %v6588_v61 = vld [vmem:[%s9333_s6 + $0x6a0] ss:$8 sps:$4 sm:$0xff]   ;;  %v6591_v58 = vld [vmem:[%s9333_s6 + $0x690] ss:$8 sps:$4 sm:$0xff]  }
 0x41b   :  { %5017 = vmatprep.subr.bf16.mxu1 %v6545_v28  ;;  %v5529_v52 = vld.sshfl [vmem:[#allocation4 + $0x4e] sm:$0x3 pattern:$0x76325410]  ;;  %v2144_v30 = vld [vmem:[#allocation4 + $0x4c] sm:$0x3] }
 0x41c   :  { %2155 = vrot.lane.b32.xlu1 %v5529_v52, %s6855_s17  ;;  %v5528_v32 = vld.sshfl [vmem:[#allocation4 + $0x4a] sm:$0x3 pattern:$0x76325410]  ;;  %2145 = vst.msk [vmem:[#allocation5 + $0x26] sm:$0x3] %vm1856_vm10, %v2144_v30 }
 0x41d   :  { %v2129_v55 = vld [vmem:[#allocation4 + $0x48] sm:$0x3]  ;;  %5065 = vmatpush2.bf16.msra.mxu0 %v6540_v44  ;;  %2140 = vrot.lane.b32.xlu0 %v5528_v32, %s6855_s17  ;;  %v6608_v28 = vld [vmem:[%s9333_s6 + $0x964] ss:$8 sps:$4 sm:$0xff]   ;;  %v6614_v44 = vld [vmem:[%s9333_s6 + $0x954] ss:$8 sps:$4 sm:$0xff]  }
 0x41e   :  { %2130 = vst.msk [vmem:[#allocation5 + $0x24] sm:$0x3] %vm1856_vm10, %v2129_v55  ;;  %5018 = vmatpush1.bf16.msra.mxu1 %v6543_v3  ;;  %5066 = vmatprep.subr.bf16.mxu0 %v6548_v45  ;;  %v6606_v21 = vld [vmem:[%s9333_s6 + $0x960] ss:$8 sps:$4 sm:$0xff]   ;;  %v6596_v23 = vld [vmem:[%s9333_s6 + $0x684] ss:$8 sps:$4 sm:$0xff]  }
 0x41f   :  { %5019 = vmatprep.subr.bf16.mxu1 %v6551_v19  ;;  %v6594_v55 = vld [vmem:[%s9333_s6 + $0x680] ss:$8 sps:$4 sm:$0xff]  }
 0x421   :  { %5067 = vmatpush2.bf16.msra.mxu0 %v6546_v54  ;;  %v2786_v54 = vld [vmem:[%s9334_s7] sm:$0x3] }
 0x422   :  { %5020 = vmatpush1.bf16.msra.mxu1 %v6549_v60  ;;  %5068 = vmatprep.subr.bf16.mxu0 %v6554_v27  ;;  %v6612_v60 = vld [vmem:[%s9333_s6 + $0x950] ss:$8 sps:$4 sm:$0xff]  }
 0x423   :  { %5021 = vmatprep.subr.bf16.mxu1 %v6557_v40  ;;  %v2790_v40 = vsub.s32 0, %v8126_v4 }
 0x425   :  { %5069 = vmatpush2.bf16.msra.mxu0 %v6552_v17  ;;  %v2794_v17 = vsub.s32 1, %v8126_v4 }
 0x426   :  { %5022 = vmatpush1.bf16.msra.mxu1 %v6555_v24  ;;  %5070 = vmatprep.subr.bf16.mxu0 %v6560_v2  ;;  %v6599_v24 = vld [vmem:[%s9333_s6 + $0x874] ss:$8 sps:$4 sm:$0xff]   ;;  %v6620_v2 = vld [vmem:[%s9333_s6 + $0x944] ss:$8 sps:$4 sm:$0xff]  }
 0x427   :  { %5023 = vmatprep.subr.bf16.mxu1 %v6563_v16 }
 0x429   :  { %5071 = vmatpush2.bf16.msra.mxu0 %v6558_v14 }
 0x42a   :  { %5024 = vmatpush2.bf16.msra.mxu1 %v6561_v46  ;;  %5072 = vmatprep.subr.bf16.mxu0 %v6566_v20 }
 0x42b   :  { %5025 = vmatprep.subr.bf16.mxu1 %v6569_v35 }
 0x42d   :  { %5073 = vmatpush2.bf16.msra.mxu0 %v6564_v18  ;;  %v5997_v57 = vpop.f32.mrf.mxu1 }
 0x42e   :  { %5026 = vmatpush2.bf16.msra.mxu1 %v6567_v11  ;;  %5074 = vmatprep.subr.bf16.mxu0 %v6572_v41  ;;  %v6618_v11 = vld [vmem:[%s9333_s6 + $0x940] ss:$8 sps:$4 sm:$0xff]  }
 0x42f   :  { %v5998_v10 = vpop.f32.mrf.mxu1  ;;  %5027 = vmatprep.subr.bf16.mxu1 %v6575_v42  ;;  %v2791_v42 = vrot.slane %v2786_v54, %v2790_v40  ;;  %v6653_v40 = vld [vmem:[%s9333_s6 + $0x8e4] ss:$8 sps:$4 sm:$0xff]  }
 0x430   :  { %v5999_v29 = vadd.f32 %v5998_v10, %v5997_v57  ;;  %v6597_v57 = vld [vmem:[%s9333_s6 + $0x870] ss:$8 sps:$4 sm:$0xff]  }
 0x431   :  { %5075 = vmatpush2.bf16.msra.mxu0 %v6570_v47  ;;  %v6000_v5 = vpop.f32.mrf.mxu1  ;;  %v6626_v47 = vld [vmem:[%s9333_s6 + $0x934] ss:$8 sps:$4 sm:$0xff]  }
 0x432   :  { %v1729_v48 = vadd.f32 %v8614_v43, %v5999_v29  ;;  %5028 = vmatpush2.bf16.msra.mxu1 %v6573_v25  ;;  %5076 = vmatprep.subr.bf16.mxu0 %v6578_v62  ;;  %v2381_v62 = vpack.c.bf16 %v8574_v56, %v8574_v56  ;;  %v6603_v56 = vld [vmem:[%s9333_s6 + $0x860] ss:$8 sps:$4 sm:$0xff]  }
 0x433   :  { %v6001_v9 = vpop.f32.mrf.mxu1  ;;  %5029 = vmatprep.subr.bf16.mxu1 %v6581_v59  ;;  %v2795_v59 = vrot.slane %v2786_v54, %v2794_v17  ;;  %v6666_v54 = vld [vmem:[%s9333_s6 + $0x9c0] ss:$8 sps:$4 sm:$0xff]   ;;  %v6672_v17 = vld [vmem:[%s9333_s6 + $0x9b0] ss:$8 sps:$4 sm:$0xff]  }
 0x434   :  { %v1817_v1 = vadd.f32 %v8568_v31, %v1729_v48  ;;  %v6002_v12 = vadd.f32 %v6001_v9, %v6000_v5  ;;  %v6590_v31 = vld [vmem:[%s9333_s6 + $0x6a4] ss:$8 sps:$4 sm:$0xff]   ;;  %v6624_v5 = vld [vmem:[%s9333_s6 + $0x930] ss:$8 sps:$4 sm:$0xff]  }
 0x435   :  { %5077 = vmatpush2.bf16.msra.mxu0 %v6576_v15 }
 0x436   :  { %v1840_v37 = vmax.f32 %v1817_v1, 0.0  ;;  %v1732_v36 = vadd.f32 %v8614_v43, %v6002_v12  ;;  %5030 = vmatpush2.bf16.msra.mxu1 %v6579_v33  ;;  %5078 = vmatprep.subr.bf16.mxu0 %v6584_v26  ;;  %v6611_v26 = vld [vmem:[%s9333_s6 + $0x854] ss:$8 sps:$4 sm:$0xff]   ;;  %v6630_v12 = vld [vmem:[%s9333_s6 + $0x920] ss:$8 sps:$4 sm:$0xff]  }
 0x437   :  { %5031 = vmatprep.subr.bf16.mxu1 %v6587_v34 }
 0x438   :  { %1854 = vst.msk [vmem:[#allocation4 + $0x50] sm:$0xff] %vm1843_vm9, %v1840_v37  ;;  %v1820_v6 = vadd.f32 %v8585_v0, %v1732_v36  ;;  %v6593_v0 = vld [vmem:[%s9333_s6 + $0x694] ss:$8 sps:$4 sm:$0xff]  }
 0x439   :  { %5079 = vmatpush2.bf16.msra.mxu0 %v6582_v7  ;;  %v6609_v7 = vld [vmem:[%s9333_s6 + $0x850] ss:$8 sps:$4 sm:$0xff]   ;;  %v6638_v37 = vld [vmem:[%s9333_s6 + $0x914] ss:$8 sps:$4 sm:$0xff]  }
 0x43a   :  { %v1841_v13 = vmax.f32 %v1820_v6, 0.0  ;;  %5032 = vmatpush2.bf16.msra.mxu1 %v6585_v38  ;;  %5130 = vmatprep.subr.bf16.mxu0 %v6602_v49  ;;  %v6617_v49 = vld [vmem:[%s9333_s6 + $0x844] ss:$8 sps:$4 sm:$0xff]   ;;  %v6615_v6 = vld [vmem:[%s9333_s6 + $0x840] ss:$8 sps:$4 sm:$0xff]  }
 0x43b   :  { %5033 = vmatprep.subr.bf16.mxu1 %v6590_v31  ;;  %v6636_v31 = vld [vmem:[%s9333_s6 + $0x910] ss:$8 sps:$4 sm:$0xff]  }
 0x43c   :  { %1855 = vst.msk [vmem:[#allocation4 + $0x58] sm:$0xff] %vm1843_vm9, %v1841_v13  ;;  %5081 = vmatmul.mubr.bf16.vlgmr.msra.gmra.mxu0 %v2383_v50  ;;  %v8791_v51 = vpop.f32.mrf.mxu0  ;;  %v6623_v50 = vld [vmem:[%s9333_s6 + $0x834] ss:$8 sps:$4 sm:$0xff]  }
 0x43d   :  { %5131 = vmatpush1.bf16.msra.mxu0 %v6600_v53  ;;  %v6644_v53 = vld [vmem:[%s9333_s6 + $0x904] ss:$8 sps:$4 sm:$0xff]  }
 0x43e   :  { %5034 = vmatpush2.bf16.msra.mxu1 %v6588_v61  ;;  %v8796_v39 = vpop.f32.mrf.mxu0  ;;  %5132 = vmatprep.subr.bf16.mxu0 %v6608_v28  ;;  %v6642_v61 = vld [vmem:[%s9333_s6 + $0x900] ss:$8 sps:$4 sm:$0xff]   ;;  %v6621_v28 = vld [vmem:[%s9333_s6 + $0x830] ss:$8 sps:$4 sm:$0xff]  }
 0x43f   :  { %5035 = vmatprep.subr.bf16.mxu1 %v6593_v0  ;;  %v5531_v3 = vld.sshfl [vmem:[#allocation4 + $0x56] sm:$0x3 pattern:$0x76325410]  ;;  %v2174_v45 = vld [vmem:[#allocation4 + $0x54] sm:$0x3] }
 0x440   :  { %2185 = vrot.lane.b32.xlu1 %v5531_v3, %s6855_s17  ;;  %v5530_v19 = vld.sshfl [vmem:[#allocation4 + $0x52] sm:$0x3 pattern:$0x76325410]  ;;  %v4840_v52 = vpop.f32.mrf.mxu0  ;;  %2175 = vst.msk [vmem:[#allocation5 + $0x2a] sm:$0x3] %vm1856_vm10, %v2174_v45 }
 0x441   :  { %v2159_v30 = vld [vmem:[#allocation4 + $0x50] sm:$0x3]  ;;  %2170 = vrot.lane.b32.xlu0 %v5530_v19, %s6855_s17  ;;  %v6003_v32 = vpop.f32.mrf.mxu1  ;;  %5133 = vmatpush1.bf16.msra.mxu0 %v6606_v21  ;;  %v6650_v0 = vld [vmem:[%s9333_s6 + $0x9f4] ss:$8 sps:$4 sm:$0xff]   ;;  %v6641_v19 = vld [vmem:[%s9333_s6 + $0x804] ss:$8 sps:$4 sm:$0xff]  }
 0x442   :  { %2160 = vst.msk [vmem:[#allocation5 + $0x28] sm:$0x3] %vm1856_vm10, %v2159_v30  ;;  %5036 = vmatpush2.bf16.msra.mxu1 %v6591_v58  ;;  %v4841_v27 = vpop.f32.mrf.mxu0  ;;  %5134 = vmatprep.subr.bf16.mxu0 %v6614_v44  ;;  %v6648_v21 = vld [vmem:[%s9333_s6 + $0x9f0] ss:$8 sps:$4 sm:$0xff]   ;;  %v6656_v58 = vld [vmem:[%s9333_s6 + $0x9e4] ss:$8 sps:$4 sm:$0xff]  }
 0x443   :  { %v6004_v16 = vpop.f32.mrf.mxu1  ;;  %5037 = vmatprep.subr.bf16.mxu1 %v6596_v23  ;;  %v5533_v14 = vld.sshfl [vmem:[#allocation4 + $0x5e] sm:$0x3 pattern:$0x76325410]  ;;  %v2204_v46 = vld [vmem:[#allocation4 + $0x5c] sm:$0x3] }
 0x444   :  { %v6005_v20 = vadd.f32 %v6004_v16, %v6003_v32  ;;  %2215 = vrot.lane.b32.xlu1 %v5533_v14, %s6855_s17  ;;  %v5532_v35 = vld.sshfl [vmem:[#allocation4 + $0x5a] sm:$0x3 pattern:$0x76325410]  ;;  %2205 = vst.msk [vmem:[#allocation5 + $0x2e] sm:$0x3] %vm1856_vm10, %v2204_v46 }
 0x445   :  { %v2189_v4 = vld [vmem:[#allocation4 + $0x58] sm:$0x3]  ;;  %2200 = vrot.lane.b32.xlu0 %v5532_v35, %s6855_s17  ;;  %v6006_v18 = vpop.f32.mrf.mxu1  ;;  %5135 = vmatpush1.bf16.msra.mxu0 %v6612_v60  ;;  %v6635_v23 = vld [vmem:[%s9333_s6 + $0x814] ss:$8 sps:$4 sm:$0xff]   ;;  %v6654_v44 = vld [vmem:[%s9333_s6 + $0x9e0] ss:$8 sps:$4 sm:$0xff]  }
 0x446   :  { %2190 = vst.msk [vmem:[#allocation5 + $0x2c] sm:$0x3] %vm1856_vm10, %v2189_v4  ;;  %v1737_v41 = vadd.f32 %v8614_v43, %v6005_v20  ;;  %5038 = vmatpush2.bf16.msra.mxu1 %v6594_v55  ;;  %5136 = vmatprep.subr.bf16.mxu0 %v6620_v2  ;;  %v6605_v43 = vld [vmem:[%s9333_s6 + $0x864] ss:$8 sps:$4 sm:$0xff]   ;;  %v6633_v3 = vld [vmem:[%s9333_s6 + $0x810] ss:$8 sps:$4 sm:$0xff]  }
 0x447   :  { %v6007_v25 = vpop.f32.mrf.mxu1  ;;  %5089 = vmatprep.subr.bf16.mxu1 %v6599_v24  ;;  %v6662_v45 = vld [vmem:[%s9333_s6 + $0x9d4] ss:$8 sps:$4 sm:$0xff]   ;;  %v6660_v52 = vld [vmem:[%s9333_s6 + $0x9d0] ss:$8 sps:$4 sm:$0xff]   ;;  %v6639_v30 = vld [vmem:[%s9333_s6 + $0x800] ss:$8 sps:$4 sm:$0xff]  }
 0x448   :  { %v1825_v10 = vadd.f32 %v8609_v8, %v1737_v41  ;;  %v6632_v8 = vld [vmem:[%s9333_s6 + $0x924] ss:$8 sps:$4 sm:$0xff]   ;;  %v6647_v55 = vld [vmem:[%s9333_s6 + $0x8f4] ss:$8 sps:$4 sm:$0xff]   ;;  %v6645_v60 = vld [vmem:[%s9333_s6 + $0x8f0] ss:$8 sps:$4 sm:$0xff]  }
 0x449   :  { %5040 = vmatmul.mubr.bf16.vlgmr.msra.gmra.mxu1 %v2381_v62  ;;  %v4795_v29 = vpop.f32.mrf.mxu1  ;;  %5137 = vmatpush1.bf16.msra.mxu0 %v6618_v11  ;;  %v6668_v32 = vld [vmem:[%s9333_s6 + $0x9c4] ss:$8 sps:$4 sm:$0xff]   ;;  %v6674_v27 = vld [vmem:[%s9333_s6 + $0x9b4] ss:$8 sps:$4 sm:$0xff]   ;;  %v6651_v24 = vld [vmem:[%s9333_s6 + $0x8e0] ss:$8 sps:$4 sm:$0xff]  }
 0x44a   :  { %v1842_v15 = vmax.f32 %v1825_v10, 0.0  ;;  %v4796_v48 = vadd.f32 %v4795_v29, %v2791_v42  ;;  %5090 = vmatpush1.bf16.msra.mxu1 %v6597_v57  ;;  %5138 = vmatprep.subr.bf16.mxu0 %v6626_v47  ;;  %v6680_v2 = vld [vmem:[%s9333_s6 + $0x9a4] ss:$8 sps:$4 sm:$0xff]   ;;  %v6659_v16 = vld [vmem:[%s9333_s6 + $0x8d4] ss:$8 sps:$4 sm:$0xff]  }
 0x44b   :  { %v4797_v33 = vpop.f32.mrf.mxu1  ;;  %5091 = vmatprep.subr.bf16.mxu1 %v6605_v43  ;;  %v6678_v14 = vld [vmem:[%s9333_s6 + $0x9a0] ss:$8 sps:$4 sm:$0xff]   ;;  %v6657_v46 = vld [vmem:[%s9333_s6 + $0x8d0] ss:$8 sps:$4 sm:$0xff]   ;;  %v6686_v20 = vld [vmem:[%s9333_s6 + $0x994] ss:$8 sps:$4 sm:$0xff]  }
 0x44c   :  { %1857 = vst.msk [vmem:[#allocation4 + $0x60] sm:$0x3] %vm1856_vm10, %v1842_v15  ;;  %v4798_v9 = vadd.f32 %v4797_v33, %v2795_v59  ;;  %v8862_v34 = vadd.f32 %v8791_v51, %v4796_v48  ;;  %v6629_v51 = vld [vmem:[%s9333_s6 + $0x824] ss:$8 sps:$4 sm:$0xff]   ;;  %v6684_v4 = vld [vmem:[%s9333_s6 + $0x990] ss:$8 sps:$4 sm:$0xff]  }
 0x44d   :  { %v4799_v1 = vpop.f32.mrf.mxu1  ;;  %5139 = vmatpush1.bf16.msra.mxu0 %v6624_v5  ;;  %v6665_v35 = vld [vmem:[%s9333_s6 + $0x8c4] ss:$8 sps:$4 sm:$0xff]   ;;  %v6663_v18 = vld [vmem:[%s9333_s6 + $0x8c0] ss:$8 sps:$4 sm:$0xff]   ;;  %v6671_v41 = vld [vmem:[%s9333_s6 + $0x8b4] ss:$8 sps:$4 sm:$0xff]  }
 0x44e   :  { %5092 = vmatpush1.bf16.msra.mxu1 %v6603_v56  ;;  %5140 = vmatprep.subr.bf16.mxu0 %v6632_v8  ;;  %v8874_v36 = vadd.f32 %v8796_v39, %v4798_v9  ;;  %v6627_v39 = vld [vmem:[%s9333_s6 + $0x820] ss:$8 sps:$4 sm:$0xff]   ;;  %v6692_v11 = vld [vmem:[%s9333_s6 + $0x984] ss:$8 sps:$4 sm:$0xff]   ;;  %v6669_v57 = vld [vmem:[%s9333_s6 + $0x8b0] ss:$8 sps:$4 sm:$0xff]  }
 0x44f   :  { %v4800_v38 = vpop.f32.mrf.mxu1  ;;  %5093 = vmatprep.subr.bf16.mxu1 %v6611_v26  ;;  %v6690_v42 = vld [vmem:[%s9333_s6 + $0x980] ss:$8 sps:$4 sm:$0xff]   ;;  %v6699_v47 = vld [vmem:[%s9333_s6 + $0xb74] ss:$8 sps:$4 sm:$0xff]   ;;  %v6677_v25 = vld [vmem:[%s9333_s6 + $0x8a4] ss:$8 sps:$4 sm:$0xff]  }
 0x450   :  { %v6675_v62 = vld [vmem:[%s9333_s6 + $0x8a0] ss:$8 sps:$4 sm:$0xff]   ;;  %v6683_v43 = vld [vmem:[%s9333_s6 + $0x894] ss:$8 sps:$4 sm:$0xff]   ;;  %v6681_v29 = vld [vmem:[%s9333_s6 + $0x890] ss:$8 sps:$4 sm:$0xff]  }
 0x451   :  { %5141 = vmatpush1.bf16.msra.mxu0 %v6630_v12  ;;  %v6689_v5 = vld [vmem:[%s9333_s6 + $0x884] ss:$8 sps:$4 sm:$0xff]   ;;  %v6687_v56 = vld [vmem:[%s9333_s6 + $0x880] ss:$8 sps:$4 sm:$0xff]   ;;  %v6695_v8 = vld [vmem:[%s9333_s6 + $0xa74] ss:$8 sps:$4 sm:$0xff]  }
 0x452   :  { %5094 = vmatpush1.bf16.msra.mxu1 %v6609_v7  ;;  %5142 = vmatprep.subr.bf16.mxu0 %v6638_v37 }
 0x453   :  { %v2219_v13 = vld [vmem:[#allocation4 + $0x60] sm:$0x3]  ;;  %5095 = vmatprep.subr.bf16.mxu1 %v6617_v49 }
 0x454   :  { %2220 = vst.msk [vmem:[#allocation5 + $0x30] sm:$0x3] %vm1856_vm10, %v2219_v13 }
 0x455   :  { %5143 = vmatpush1.bf16.msra.mxu0 %v6636_v31 }
 0x456   :  { %5096 = vmatpush1.bf16.msra.mxu1 %v6615_v6  ;;  %5144 = vmatprep.subr.bf16.mxu0 %v6644_v53 }
 0x457   :  { %5097 = vmatprep.subr.bf16.mxu1 %v6623_v50 }
 0x459   :  { %5145 = vmatpush1.bf16.msra.mxu0 %v6642_v61 }
 0x45a   :  { %5098 = vmatpush1.bf16.msra.mxu1 %v6621_v28  ;;  %5146 = vmatprep.subr.bf16.mxu0 %v6650_v0  ;;  %v6693_v0 = vld [vmem:[%s9333_s6 + $0xa70] ss:$8 sps:$4 sm:$0xff]  }
 0x45b   :  { %5099 = vmatprep.subr.bf16.mxu1 %v6629_v51 }
 0x45d   :  { %5147 = vmatpush2.bf16.msra.mxu0 %v6648_v21 }
 0x45e   :  { %5100 = vmatpush1.bf16.msra.mxu1 %v6627_v39  ;;  %5148 = vmatprep.subr.bf16.mxu0 %v6656_v58  ;;  %v6702_v39 = vld [vmem:[%s9333_s6 + $0xa64] ss:$8 sps:$4 sm:$0xff]  }
 0x45f   :  { %5101 = vmatprep.subr.bf16.mxu1 %v6635_v23  ;;  %v6697_v23 = vld [vmem:[%s9333_s6 + $0xb70] ss:$8 sps:$4 sm:$0xff]  }
 0x461   :  { %5149 = vmatpush2.bf16.msra.mxu0 %v6654_v44 }
 0x462   :  { %5102 = vmatpush1.bf16.msra.mxu1 %v6633_v3  ;;  %5150 = vmatprep.subr.bf16.mxu0 %v6662_v45  ;;  %v6705_v3 = vld [vmem:[%s9333_s6 + $0xb64] ss:$8 sps:$4 sm:$0xff]   ;;  %v6700_v45 = vld [vmem:[%s9333_s6 + $0xa60] ss:$8 sps:$4 sm:$0xff]  }
 0x463   :  { %5103 = vmatprep.subr.bf16.mxu1 %v6641_v19  ;;  %v6708_v19 = vld [vmem:[%s9333_s6 + $0xa54] ss:$8 sps:$4 sm:$0xff]  }
 0x465   :  { %5151 = vmatpush2.bf16.msra.mxu0 %v6660_v52  ;;  %v6703_v52 = vld [vmem:[%s9333_s6 + $0xb60] ss:$8 sps:$4 sm:$0xff]  }
 0x466   :  { %5104 = vmatpush1.bf16.msra.mxu1 %v6639_v30  ;;  %5152 = vmatprep.subr.bf16.mxu0 %v6668_v32  ;;  %v6711_v30 = vld [vmem:[%s9333_s6 + $0xb54] ss:$8 sps:$4 sm:$0xff]   ;;  %v6706_v32 = vld [vmem:[%s9333_s6 + $0xa50] ss:$8 sps:$4 sm:$0xff]  }
 0x467   :  { %5105 = vmatprep.subr.bf16.mxu1 %v6647_v55  ;;  %v6714_v55 = vld [vmem:[%s9333_s6 + $0xa44] ss:$8 sps:$4 sm:$0xff]  }
 0x469   :  { %5153 = vmatpush2.bf16.msra.mxu0 %v6666_v54  ;;  %v6709_v54 = vld [vmem:[%s9333_s6 + $0xb50] ss:$8 sps:$4 sm:$0xff]  }
 0x46a   :  { %5106 = vmatpush2.bf16.msra.mxu1 %v6645_v60  ;;  %5154 = vmatprep.subr.bf16.mxu0 %v6674_v27  ;;  %v6717_v60 = vld [vmem:[%s9333_s6 + $0xb44] ss:$8 sps:$4 sm:$0xff]   ;;  %v6712_v27 = vld [vmem:[%s9333_s6 + $0xa40] ss:$8 sps:$4 sm:$0xff]  }
 0x46b   :  { %5107 = vmatprep.subr.bf16.mxu1 %v6653_v40  ;;  %v6720_v40 = vld [vmem:[%s9333_s6 + $0xa34] ss:$8 sps:$4 sm:$0xff]  }
 0x46d   :  { %5155 = vmatpush2.bf16.msra.mxu0 %v6672_v17  ;;  %v6715_v17 = vld [vmem:[%s9333_s6 + $0xb40] ss:$8 sps:$4 sm:$0xff]  }
 0x46e   :  { %5108 = vmatpush2.bf16.msra.mxu1 %v6651_v24  ;;  %5156 = vmatprep.subr.bf16.mxu0 %v6680_v2  ;;  %v6723_v24 = vld [vmem:[%s9333_s6 + $0xb34] ss:$8 sps:$4 sm:$0xff]   ;;  %v6718_v2 = vld [vmem:[%s9333_s6 + $0xa30] ss:$8 sps:$4 sm:$0xff]  }
 0x46f   :  { %5109 = vmatprep.subr.bf16.mxu1 %v6659_v16  ;;  %v6726_v16 = vld [vmem:[%s9333_s6 + $0xa24] ss:$8 sps:$4 sm:$0xff]  }
 0x471   :  { %5157 = vmatpush2.bf16.msra.mxu0 %v6678_v14  ;;  %v6721_v14 = vld [vmem:[%s9333_s6 + $0xb30] ss:$8 sps:$4 sm:$0xff]  }
 0x472   :  { %5110 = vmatpush2.bf16.msra.mxu1 %v6657_v46  ;;  %5158 = vmatprep.subr.bf16.mxu0 %v6686_v20  ;;  %v6729_v46 = vld [vmem:[%s9333_s6 + $0xb24] ss:$8 sps:$4 sm:$0xff]   ;;  %v6724_v20 = vld [vmem:[%s9333_s6 + $0xa20] ss:$8 sps:$4 sm:$0xff]  }
 0x473   :  { %5111 = vmatprep.subr.bf16.mxu1 %v6665_v35  ;;  %v6732_v35 = vld [vmem:[%s9333_s6 + $0xa14] ss:$8 sps:$4 sm:$0xff]  }
 0x475   :  { %5159 = vmatpush2.bf16.msra.mxu0 %v6684_v4 }
 0x476   :  { %5112 = vmatpush2.bf16.msra.mxu1 %v6663_v18  ;;  %5160 = vmatprep.subr.bf16.mxu0 %v6692_v11  ;;  %v6727_v18 = vld [vmem:[%s9333_s6 + $0xb20] ss:$8 sps:$4 sm:$0xff]  }
 0x477   :  { %5113 = vmatprep.subr.bf16.mxu1 %v6671_v41  ;;  %v6735_v41 = vld [vmem:[%s9333_s6 + $0xb14] ss:$8 sps:$4 sm:$0xff]  }
 0x479   :  { %5161 = vmatpush2.bf16.msra.mxu0 %v6690_v42  ;;  %v6730_v42 = vld [vmem:[%s9333_s6 + $0xa10] ss:$8 sps:$4 sm:$0xff]  }
 0x47a   :  { %5114 = vmatpush2.bf16.msra.mxu1 %v6669_v57  ;;  %5212 = vmatprep.subr.bf16.mxu0 %v6699_v47  ;;  %v6738_v57 = vld [vmem:[%s9333_s6 + $0xa04] ss:$8 sps:$4 sm:$0xff]  }
 0x47b   :  { %5115 = vmatprep.subr.bf16.mxu1 %v6677_v25  ;;  %v6733_v25 = vld [vmem:[%s9333_s6 + $0xb10] ss:$8 sps:$4 sm:$0xff]  }
 0x47c   :  { %v4918_v10 = vpop.f32.mrf.mxu0 }
 0x47e   :  { %v4920_v59 = vpop.f32.mrf.mxu0  ;;  %5116 = vmatpush2.bf16.msra.mxu1 %v6675_v62 }
 0x47f   :  { %5117 = vmatprep.subr.bf16.mxu1 %v6683_v43  ;;  %v6741_v43 = vld [vmem:[%s9333_s6 + $0xb04] ss:$8 sps:$4 sm:$0xff]  }
 0x480   :  { %v4922_v15 = vpop.f32.mrf.mxu0 }
 0x482   :  { %v4923_v48 = vpop.f32.mrf.mxu0  ;;  %5118 = vmatpush2.bf16.msra.mxu1 %v6681_v29  ;;  %v6739_v29 = vld [vmem:[%s9333_s6 + $0xb00] ss:$8 sps:$4 sm:$0xff]  }
 0x483   :  { %5119 = vmatprep.subr.bf16.mxu1 %v6689_v5  ;;  %v6747_v5 = vld [vmem:[%s9333_s6 + $0xbf4] ss:$8 sps:$4 sm:$0xff]   ;;  %v6742_v48 = vld [vmem:[%s9333_s6 + $0xaf0] ss:$8 sps:$4 sm:$0xff]  }
 0x486   :  { %5120 = vmatpush2.bf16.msra.mxu1 %v6687_v56  ;;  %v6750_v56 = vld [vmem:[%s9333_s6 + $0xae4] ss:$8 sps:$4 sm:$0xff]  }
 0x487   :  { %5171 = vmatprep.subr.bf16.mxu1 %v6695_v8 }
 0x489   :  { %v4877_v33 = vpop.f32.mrf.mxu1 }
 0x48a   :  { %v4878_v26 = vadd.f32 %v4877_v33, %v8862_v34  ;;  %v2126_v9 = vpop.permute.xlu1 %2125  ;;  %v6745_v33 = vld [vmem:[%s9333_s6 + $0xbf0] ss:$8 sps:$4 sm:$0xff]  }
 0x48b   :  { %v4879_v1 = vpop.f32.mrf.mxu1  ;;  %2128 = vst.msk [vmem:[#allocation5 + $0x22] sm:$0x3] %vm1872_vm11, %v2126_v9  ;;  %v2111_v12 = vpop.permute.xlu0 %2110 }
 0x48c   :  { %v4880_v7 = vadd.f32 %v4879_v1, %v8874_v36  ;;  %2113 = vst.msk [vmem:[#allocation5 + $0x20] sm:$0x3] %vm1872_vm11, %v2111_v12  ;;  %v9022_v37 = vadd.f32 %v4918_v10, %v4878_v26  ;;  %v6736_v10 = vld [vmem:[%s9333_s6 + $0xa00] ss:$8 sps:$4 sm:$0xff]   ;;  %v6753_v26 = vld [vmem:[%s9333_s6 + $0xbe4] ss:$8 sps:$4 sm:$0xff]  }
 0x48d   :  { %v4881_v38 = vpop.f32.mrf.mxu1  ;;  %v6748_v12 = vld [vmem:[%s9333_s6 + $0xae0] ss:$8 sps:$4 sm:$0xff]  }
 0x48e   :  { %v2156_v49 = vpop.permute.xlu1 %2155  ;;  %v9024_v31 = vadd.f32 %v4920_v59, %v4880_v7  ;;  %v6744_v59 = vld [vmem:[%s9333_s6 + $0xaf4] ss:$8 sps:$4 sm:$0xff]  }
 0x48f   :  { %v4882_v6 = vpop.f32.mrf.mxu1  ;;  %2158 = vst.msk [vmem:[#allocation5 + $0x26] sm:$0x3] %vm1872_vm11, %v2156_v49  ;;  %v2141_v53 = vpop.permute.xlu0 %2140  ;;  %v6756_v49 = vld [vmem:[%s9333_s6 + $0xad4] ss:$8 sps:$4 sm:$0xff]  }
 0x490   :  { %2143 = vst.msk [vmem:[#allocation5 + $0x24] sm:$0x3] %vm1872_vm11, %v2141_v53  ;;  %v6751_v53 = vld [vmem:[%s9333_s6 + $0xbe0] ss:$8 sps:$4 sm:$0xff]  }
 0x497   :  { %v2225_v34 = vld [vmem:[#allocation5 + $0x20] sm:$0xff] }
 0x498   :  { %v2310_v13 = vrot.slane %v2225_v34, %v8131_v63  ;;  %v2303_v50 = vcombine.high %v2225_v34, %v2225_v34 }
 0x49a   :  { %v2318_v61 = vcombine.high %v2310_v13, %v2310_v13  ;;  %v2317_v36 = vrot.slane %v2303_v50, %v8131_v63  ;;  %v2385_v21 = vpack.c.bf16 %v2310_v13, %v2310_v13  ;;  %v6759_v50 = vld [vmem:[%s9333_s6 + $0xbd4] ss:$8 sps:$4 sm:$0xff]  }
 0x49c   :  { %v2386_v28 = vpack.c.bf16 %v2318_v61, %v2318_v61  ;;  %v2319_v51 = vcombine.high %v2317_v36, %v2317_v36  ;;  %v2387_v44 = vpack.c.bf16 %v2317_v36, %v2317_v36  ;;  %v6754_v61 = vld [vmem:[%s9333_s6 + $0xad0] ss:$8 sps:$4 sm:$0xff]  }
 0x49e   :  { %5121 = vmatprep.mubr.bf16.mxu1 %v2386_v28  ;;  %v2388_v58 = vpack.c.bf16 %v2319_v51, %v2319_v51 }
 0x49f   :  { %5122 = vmatmul.mubr.bf16.vlgmr.msra.gmra.mxu1 %v2385_v21  ;;  %v6766_v21 = vld [vmem:[%s9333_s6 + $0xbc4] ss:$8 sps:$4 sm:$0xff]  }
 0x4a0   :  { %5172 = vmatpush1.bf16.msra.mxu1 %v6693_v0  ;;  %5162 = vmatprep.mubr.bf16.mxu0 %v2388_v58  ;;  %v6757_v0 = vld [vmem:[%s9333_s6 + $0xbd0] ss:$8 sps:$4 sm:$0xff]  }
 0x4a1   :  { %5163 = vmatmul.mubr.bf16.vlgmr.msra.gmra.mxu0 %v2387_v44  ;;  %5173 = vmatprep.subr.bf16.mxu1 %v6702_v39  ;;  %v6761_v39 = vld [vmem:[%s9333_s6 + $0xac0] ss:$8 sps:$4 sm:$0xff]  }
 0x4a2   :  { %5213 = vmatpush1.bf16.msra.mxu0 %v6697_v23  ;;  %v6769_v23 = vld [vmem:[%s9333_s6 + $0xab4] ss:$8 sps:$4 sm:$0xff]  }
 0x4a3   :  { %5214 = vmatprep.subr.bf16.mxu0 %v6705_v3  ;;  %v6764_v3 = vld [vmem:[%s9333_s6 + $0xbc0] ss:$8 sps:$4 sm:$0xff]  }
 0x4a4   :  { %5174 = vmatpush1.bf16.msra.mxu1 %v6700_v45 }
 0x4a5   :  { %5175 = vmatprep.subr.bf16.mxu1 %v6708_v19  ;;  %v6772_v19 = vld [vmem:[%s9333_s6 + $0xbb4] ss:$8 sps:$4 sm:$0xff]  }
 0x4a6   :  { %5215 = vmatpush1.bf16.msra.mxu0 %v6703_v52 }
 0x4a7   :  { %5216 = vmatprep.subr.bf16.mxu0 %v6711_v30  ;;  %v6767_v30 = vld [vmem:[%s9333_s6 + $0xab0] ss:$8 sps:$4 sm:$0xff]  }
 0x4a8   :  { %5176 = vmatpush1.bf16.msra.mxu1 %v6706_v32 }
 0x4a9   :  { %5177 = vmatprep.subr.bf16.mxu1 %v6714_v55  ;;  %v6775_v55 = vld [vmem:[%s9333_s6 + $0xaa4] ss:$8 sps:$4 sm:$0xff]  }
 0x4aa   :  { %5217 = vmatpush1.bf16.msra.mxu0 %v6709_v54  ;;  %v6770_v54 = vld [vmem:[%s9333_s6 + $0xbb0] ss:$8 sps:$4 sm:$0xff]  }
 0x4ab   :  { %5218 = vmatprep.subr.bf16.mxu0 %v6717_v60 }
 0x4ac   :  { %5178 = vmatpush1.bf16.msra.mxu1 %v6712_v27  ;;  %v6778_v27 = vld [vmem:[%s9333_s6 + $0xba4] ss:$8 sps:$4 sm:$0xff]  }
 0x4ad   :  { %5179 = vmatprep.subr.bf16.mxu1 %v6720_v40  ;;  %v6773_v40 = vld [vmem:[%s9333_s6 + $0xaa0] ss:$8 sps:$4 sm:$0xff]  }
 0x4ae   :  { %5219 = vmatpush1.bf16.msra.mxu0 %v6715_v17  ;;  %v6781_v17 = vld [vmem:[%s9333_s6 + $0xa94] ss:$8 sps:$4 sm:$0xff]  }
 0x4af   :  { %5220 = vmatprep.subr.bf16.mxu0 %v6723_v24  ;;  %v6776_v24 = vld [vmem:[%s9333_s6 + $0xba0] ss:$8 sps:$4 sm:$0xff]  }
 0x4b0   :  { %5180 = vmatpush1.bf16.msra.mxu1 %v6718_v2  ;;  %v6784_v2 = vld [vmem:[%s9333_s6 + $0xb94] ss:$8 sps:$4 sm:$0xff]  }
 0x4b1   :  { %5181 = vmatprep.subr.bf16.mxu1 %v6726_v16  ;;  %v6779_v16 = vld [vmem:[%s9333_s6 + $0xa90] ss:$8 sps:$4 sm:$0xff]  }
 0x4b2   :  { %5221 = vmatpush1.bf16.msra.mxu0 %v6721_v14  ;;  %v2186_v4 = vpop.permute.xlu1 %2185  ;;  %v6787_v14 = vld [vmem:[%s9333_s6 + $0xa84] ss:$8 sps:$4 sm:$0xff]  }
 0x4b3   :  { %2188 = vst.msk [vmem:[#allocation5 + $0x2a] sm:$0x3] %vm1872_vm11, %v2186_v4  ;;  %v2171_v11 = vpop.permute.xlu0 %2170  ;;  %5222 = vmatprep.subr.bf16.mxu0 %v6729_v46  ;;  %v6782_v46 = vld [vmem:[%s9333_s6 + $0xb90] ss:$8 sps:$4 sm:$0xff]   ;;  %v6788_v4 = vld [vmem:[%s9333_s6 + $0xb80] ss:$8 sps:$4 sm:$0xff]  }
 0x4b4   :  { %5182 = vmatpush1.bf16.msra.mxu1 %v6724_v20  ;;  %2173 = vst.msk [vmem:[#allocation5 + $0x28] sm:$0x3] %vm1872_vm11, %v2171_v11  ;;  %v6790_v20 = vld [vmem:[%s9333_s6 + $0xb84] ss:$8 sps:$4 sm:$0xff]  }
 0x4b5   :  { %5183 = vmatprep.subr.bf16.mxu1 %v6732_v35  ;;  %v6785_v35 = vld [vmem:[%s9333_s6 + $0xa80] ss:$8 sps:$4 sm:$0xff]  }
 0x4b6   :  { %5223 = vmatpush1.bf16.msra.mxu0 %v6727_v18  ;;  %v2216_v47 = vpop.permute.xlu1 %2215  ;;  %v6793_v18 = vld [vmem:[%s9333_s6 + $0xc34] ss:$8 sps:$4 sm:$0xff]  }
 0x4b7   :  { %2218 = vst.msk [vmem:[#allocation5 + $0x2e] sm:$0x3] %vm1872_vm11, %v2216_v47  ;;  %v2201_v62 = vpop.permute.xlu0 %2200  ;;  %5224 = vmatprep.subr.bf16.mxu0 %v6735_v41  ;;  %v6791_v41 = vld [vmem:[%s9333_s6 + $0xc30] ss:$8 sps:$4 sm:$0xff]   ;;  %v6794_v47 = vld [vmem:[%s9333_s6 + $0xc20] ss:$8 sps:$4 sm:$0xff]  }
 0x4b8   :  { %5184 = vmatpush1.bf16.msra.mxu1 %v6730_v42  ;;  %2203 = vst.msk [vmem:[#allocation5 + $0x2c] sm:$0x3] %vm1872_vm11, %v2201_v62  ;;  %v6797_v62 = vld [vmem:[%s9333_s6 + $0xc10] ss:$8 sps:$4 sm:$0xff]  }
 0x4b9   :  { %5185 = vmatprep.subr.bf16.mxu1 %v6738_v57  ;;  %v6796_v57 = vld [vmem:[%s9333_s6 + $0xc24] ss:$8 sps:$4 sm:$0xff]  }
 0x4ba   :  { %5225 = vmatpush1.bf16.msra.mxu0 %v6733_v25  ;;  %v6799_v25 = vld [vmem:[%s9333_s6 + $0xc14] ss:$8 sps:$4 sm:$0xff]  }
 0x4bb   :  { %5226 = vmatprep.subr.bf16.mxu0 %v6741_v43  ;;  %v6802_v43 = vld [vmem:[%s9333_s6 + $0xc04] ss:$8 sps:$4 sm:$0xff]  }
 0x4bc   :  { %5186 = vmatpush1.bf16.msra.mxu1 %v6736_v10  ;;  %v5000_v15 = vpop.f32.mrf.mxu0  ;;  %v6803_v10 = vld [vmem:[%s9335_s8 + $0x38] sm:$0xff]  }
 0x4bd   :  { %5187 = vmatprep.subr.bf16.mxu1 %v6744_v59  ;;  %v6804_v59 = vld [vmem:[%s9335_s8 + $0x30] sm:$0xff]  }
 0x4be   :  { %5227 = vmatpush1.bf16.msra.mxu0 %v6739_v29  ;;  %v5002_v8 = vpop.f32.mrf.mxu0  ;;  %v6800_v29 = vld [vmem:[%s9333_s6 + $0xc00] ss:$8 sps:$4 sm:$0xff]  }
 0x4bf   :  { %5228 = vmatprep.subr.bf16.mxu0 %v6747_v5  ;;  %v2226_v9 = vld [vmem:[#allocation5 + $0x28] sm:$0xff]  ;;  %v5534_v5 = vld.sshfl [vmem:[#allocation5 + $0x30] sm:$0x3 pattern:$0x76325410] }
 0x4c0   :  { %5188 = vmatpush2.bf16.msra.mxu1 %v6742_v48  ;;  %v5004_v1 = vpop.f32.mrf.mxu0  ;;  %v9146_v7 = vrot.slane %v2226_v9, %v8131_v63  ;;  %v2320_v38 = vcombine.high %v2226_v9, %v2226_v9  ;;  %v2393_v48 = vpack.c.bf16 %v5534_v5, %v5534_v5 }
 0x4c1   :  { %5189 = vmatprep.subr.bf16.mxu1 %v6750_v56  ;;  %v6806_v56 = vld [vmem:[%s9335_s8 + $0x20] sm:$0xff]  }
 0x4c2   :  { %5229 = vmatpush2.bf16.msra.mxu0 %v6745_v33  ;;  %v5005_v6 = vpop.f32.mrf.mxu0  ;;  %v2335_v34 = vcombine.high %v9146_v7, %v9146_v7  ;;  %v9157_v13 = vrot.slane %v2320_v38, %v8131_v63  ;;  %v6763_v63 = vld [vmem:[%s9333_s6 + $0xac4] ss:$8 sps:$4 sm:$0xff]   ;;  %v2389_v11 = vpack.c.bf16 %v9146_v7, %v9146_v7  ;;  %v6808_v33 = vld [vmem:[%s9335_s8 + $0x10] sm:$0xff]  }
 0x4c3   :  { %5230 = vmatprep.subr.bf16.mxu0 %v6753_v26 }
 0x4c4   :  { %5190 = vmatpush2.bf16.msra.mxu1 %v6748_v12  ;;  %v2390_v36 = vpack.c.bf16 %v2335_v34, %v2335_v34  ;;  %v2336_v28 = vcombine.high %v9157_v13, %v9157_v13  ;;  %v2391_v42 = vpack.c.bf16 %v9157_v13, %v9157_v13 }
 0x4c5   :  { %5191 = vmatprep.subr.bf16.mxu1 %v6756_v49 }
 0x4c6   :  { %5231 = vmatpush2.bf16.msra.mxu0 %v6751_v53  ;;  %5203 = vmatprep.mubr.bf16.mxu1 %v2390_v36  ;;  %v2392_v51 = vpack.c.bf16 %v2336_v28, %v2336_v28  ;;  %v6810_v36 = vld [vmem:[%s9335_s8] sm:$0xff]  }
 0x4c7   :  { %5232 = vmatprep.subr.bf16.mxu0 %v6759_v50  ;;  %v6811_v28 = vld [vmem:[%s9335_s8 + $0x60] ss:$0 sps:$4 sm:$0xff]  }
 0x4c8   :  { %5192 = vmatpush2.bf16.msra.mxu1 %v6754_v61  ;;  %5244 = vmatprep.mubr.bf16.mxu0 %v2392_v51  ;;  %v6809_v61 = vld [vmem:[%s9335_s8 + $0x8] sm:$0xff]   ;;  %v6813_v51 = vld [vmem:[%s9335_s8 + $0x50] sm:$0xff]  }
 0x4c9   :  { %v4959_v58 = vpop.f32.mrf.mxu1  ;;  %5193 = vmatprep.subr.bf16.mxu1 %v6763_v63  ;;  %v5410_v63 = vsel %vm119_vm0, %v6811_v28, 0  ;;  %vm5452_vm0 = vcmask 74752  }
 0x4ca   :  { %v4960_v44 = vadd.f32 %v4959_v58, %v9022_v37  ;;  %5233 = vmatpush2.bf16.msra.mxu0 %v6757_v0  ;;  %v6812_v0 = vld [vmem:[%s9335_s8 + $0x58] sm:$0xff]  }
 0x4cb   :  { %v4961_v45 = vpop.f32.mrf.mxu1  ;;  %5234 = vmatprep.subr.bf16.mxu0 %v6766_v21  ;;  %v6814_v21 = vld [vmem:[%s9335_s8 + $0x48] sm:$0xff]  }
 0x4cc   :  { %v4962_v52 = vadd.f32 %v4961_v45, %v9024_v31  ;;  %5194 = vmatpush2.bf16.msra.mxu1 %v6761_v39  ;;  %v9193_v32 = vadd.f32 %v5000_v15, %v4960_v44  ;;  %v6805_v15 = vld [vmem:[%s9335_s8 + $0x28] sm:$0xff]   ;;  %v6815_v39 = vld [vmem:[%s9335_s8 + $0x40] sm:$0xff]  }
 0x4cd   :  { %v4963_v37 = vpop.f32.mrf.mxu1  ;;  %5195 = vmatprep.subr.bf16.mxu1 %v6769_v23 }
 0x4ce   :  { %5235 = vmatpush2.bf16.msra.mxu0 %v6764_v3  ;;  %v9201_v60 = vadd.f32 %v5002_v8, %v4962_v52  ;;  %v6807_v8 = vld [vmem:[%s9335_s8 + $0x18] sm:$0xff]  }
 0x4cf   :  { %v4964_v31 = vpop.f32.mrf.mxu1  ;;  %5236 = vmatprep.subr.bf16.mxu0 %v6772_v19 }
 0x4d0   :  { %5196 = vmatpush2.bf16.msra.mxu1 %v6767_v30 }
 0x4d1   :  { %5197 = vmatprep.subr.bf16.mxu1 %v6775_v55 }
 0x4d2   :  { %5237 = vmatpush2.bf16.msra.mxu0 %v6770_v54 }
 0x4d3   :  { %5238 = vmatprep.subr.bf16.mxu0 %v6778_v27 }
 0x4d4   :  { %5198 = vmatpush2.bf16.msra.mxu1 %v6773_v40 }
 0x4d5   :  { %5199 = vmatprep.subr.bf16.mxu1 %v6781_v17 }
 0x4d6   :  { %5239 = vmatpush2.bf16.msra.mxu0 %v6776_v24 }
 0x4d7   :  { %5240 = vmatprep.subr.bf16.mxu0 %v6784_v2 }
 0x4d8   :  { %5200 = vmatpush2.bf16.msra.mxu1 %v6779_v16 }
 0x4d9   :  { %5201 = vmatprep.subr.bf16.mxu1 %v6787_v14 }
 0x4da   :  { %5241 = vmatpush2.bf16.msra.mxu0 %v6782_v46 }
 0x4db   :  { %5242 = vmatprep.subr.bf16.mxu0 %v6790_v20 }
 0x4dc   :  { %5202 = vmatpush2.bf16.msra.mxu1 %v6785_v35 }
 0x4dd   :  { %5412 = vmatprep.subr.bf16.mxu1 %v6852_v22 }
 0x4de   :  { %5243 = vmatpush2.bf16.msra.mxu0 %v6788_v4 }
 0x4df   :  { %5204 = vmatmul.mubr.bf16.vlgmr.msra.gmra.mxu1 %v2389_v11  ;;  %5261 = vmatprep.subr.bf16.mxu0 %v6793_v18 }
 0x4e0   :  { %5413 = vmatpush1.bf16.msra.mxu1 %v6803_v10 }
 0x4e1   :  { %5245 = vmatmul.mubr.bf16.vlgmr.msra.gmra.mxu0 %v2391_v42  ;;  %5414 = vmatprep.subr.bf16.mxu1 %v6852_v22 }
 0x4e2   :  { %5262 = vmatpush1.bf16.msra.mxu0 %v6791_v41  ;;  %5285 = vmatprep.mubr.bf16.mxu0 %v6852_v22 }
 0x4e3   :  { %5263 = vmatprep.subr.bf16.mxu0 %v6796_v57 }
 0x4e4   :  { %5415 = vmatpush1.bf16.msra.mxu1 %v6804_v59 }
 0x4e5   :  { %5416 = vmatprep.subr.bf16.mxu1 %v6852_v22 }
 0x4e6   :  { %5264 = vmatpush1.bf16.msra.mxu0 %v6794_v47 }
 0x4e7   :  { %5265 = vmatprep.subr.bf16.mxu0 %v6799_v25 }
 0x4e8   :  { %5417 = vmatpush1.bf16.msra.mxu1 %v6805_v15 }
 0x4e9   :  { %5418 = vmatprep.subr.bf16.mxu1 %v6852_v22 }
 0x4ea   :  { %5266 = vmatpush1.bf16.msra.mxu0 %v6797_v62 }
 0x4eb   :  { %5267 = vmatprep.subr.bf16.mxu0 %v6802_v43  ;;  %v5928_v43 = vld [vmem:[%s9336_s9] ss:$0 sm:$0xff] }
 0x4ec   :  { %5419 = vmatpush1.bf16.msra.mxu1 %v6806_v56 }
 0x4ed   :  { %5420 = vmatprep.subr.bf16.mxu1 %v6852_v22 }
 0x4ee   :  { %5268 = vmatpush1.bf16.msra.mxu0 %v6800_v29 }
 0x4f0   :  { %5421 = vmatpush1.bf16.msra.mxu1 %v6807_v8 }
 0x4f1   :  { %5927 = vmatmul.mubr.msk.bf16.vlgmr.msra.gmra.mxu0 %vm1843_vm9, %v2393_v48  ;;  %5422 = vmatprep.subr.bf16.mxu1 %v6852_v22 }
 0x4f4   :  { %5423 = vmatpush1.bf16.msra.mxu1 %v6808_v33 }
 0x4f5   :  { %5424 = vmatprep.subr.bf16.mxu1 %v6852_v22 }
 0x4f8   :  { %5425 = vmatpush1.bf16.msra.mxu1 %v6809_v61 }
 0x4f9   :  { %5426 = vmatprep.subr.bf16.mxu1 %v6852_v22 }
 0x4fc   :  { %v5082_v26 = vpop.f32.mrf.mxu0  ;;  %5427 = vmatpush1.bf16.msra.mxu1 %v6810_v36 }
 0x4fd   :  { %5434 = vmatprep.subr.bf16.mxu1 %v6852_v22 }
 0x4fe   :  { %v5084_v9 = vpop.f32.mrf.mxu0 }
 0x500   :  { %v5086_v1 = vpop.f32.mrf.mxu0  ;;  %5435 = vmatpush2.bf16.msra.mxu1 %v5410_v63 }
 0x501   :  { %5436 = vmatprep.subr.bf16.mxu1 %v6852_v22 }
 0x502   :  { %v5087_v12 = vpop.f32.mrf.mxu0 }
 0x504   :  { %5437 = vmatpush2.bf16.msra.mxu1 %v6812_v0 }
 0x505   :  { %5438 = vmatprep.subr.bf16.mxu1 %v6852_v22 }
 0x508   :  { %5439 = vmatpush2.bf16.msra.mxu1 %v6813_v51 }
 0x509   :  { %v5041_v7 = vpop.f32.mrf.mxu1  ;;  %5440 = vmatprep.subr.bf16.mxu1 %v6852_v22 }
 0x50a   :  { %v5042_v38 = vadd.f32 %v5041_v7, %v9193_v32 }
 0x50b   :  { %v5043_v49 = vpop.f32.mrf.mxu1 }
 0x50c   :  { %v5044_v6 = vadd.f32 %v5043_v49, %v9201_v60  ;;  %v5083_v53 = vadd.f32 %v5082_v26, %v5042_v38  ;;  %5441 = vmatpush2.bf16.msra.mxu1 %v6814_v21 }
 0x50d   :  { %v5045_v34 = vpop.f32.mrf.mxu1  ;;  %5442 = vmatprep.subr.bf16.mxu1 %v6852_v22 }
 0x50e   :  { %v5085_v13 = vadd.f32 %v5084_v9, %v5044_v6 }
 0x50f   :  { %v5046_v50 = vpop.f32.mrf.mxu1 }
 0x510   :  { %5443 = vmatpush2.bf16.msra.mxu1 %v6815_v39 }
 0x55f   :  { %v5123_v58 = vpop.f32.mrf.mxu1 }
 0x560   :  { %v5124_v23 = vadd.f32 %v5123_v58, %v5083_v53 }
 0x561   :  { %v5125_v44 = vpop.f32.mrf.mxu1  ;;  %v5164_v3 = vpop.f32.mrf.mxu0 }
 0x562   :  { %v5126_v45 = vadd.f32 %v5125_v44, %v5085_v13  ;;  %v5165_v19 = vadd.f32 %v5164_v3, %v5124_v23 }
 0x563   :  { %v5127_v52 = vpop.f32.mrf.mxu1  ;;  %v5166_v30 = vpop.f32.mrf.mxu0 }
 0x564   :  { %v5167_v32 = vadd.f32 %v5166_v30, %v5126_v45 }
 0x565   :  { %v5128_v37 = vpop.f32.mrf.mxu1  ;;  %v5168_v55 = vpop.f32.mrf.mxu0 }
 0x567   :  { %v5169_v54 = vpop.f32.mrf.mxu0 }
 0x59f   :  { %v5205_v60 = vpop.f32.mrf.mxu1 }
 0x5a0   :  { %v5206_v16 = vadd.f32 %v5205_v60, %v5165_v19 }
 0x5a1   :  { %v5207_v31 = vpop.f32.mrf.mxu1  ;;  %v5246_v22 = vpop.f32.mrf.mxu0 }
 0x5a2   :  { %v5208_v14 = vadd.f32 %v5207_v31, %v5167_v32  ;;  %v5247_v46 = vadd.f32 %v5246_v22, %v5206_v16 }
 0x5a3   :  { %v5209_v27 = vpop.f32.mrf.mxu1  ;;  %v5248_v40 = vpop.f32.mrf.mxu0 }
 0x5a4   :  { %v5249_v35 = vadd.f32 %v5248_v40, %v5208_v14 }
 0x5a5   :  { %v5210_v17 = vpop.f32.mrf.mxu1  ;;  %v5250_v24 = vpop.f32.mrf.mxu0 }
 0x5a7   :  { %v5251_v2 = vpop.f32.mrf.mxu0 }
 0x5b1   :  { %v5287_v20 = vpop.f32.mrf.mxu0 }
 0x5b2   :  { %v5288_v4 = vadd.f32 %v5287_v20, %v5247_v46 }
 0x5b3   :  { %v5289_v18 = vpop.f32.mrf.mxu0 }
 0x5b4   :  { %v5290_v11 = vadd.f32 %v5289_v18, %v5249_v35  ;;  %v5294_v41 = vmax.f32 %v5288_v4, 0.0 }
 0x5b5   :  { %v5291_v42 = vpop.f32.mrf.mxu0 }
 0x5b6   :  { %v5295_v57 = vmax.f32 %v5290_v11, 0.0  ;;  %v5296_v62 = vpack.c.bf16 %v5294_v41, %v5294_v41 }
 0x5b7   :  { %v5292_v47 = vpop.f32.mrf.mxu0 }
 0x5b8   :  { %v5297_v25 = vpack.c.bf16 %v5295_v57, %v5295_v57 }
 0x5ba   :  { %5942 = vmatprep.mubr.msk.bf16.mxu1 %vm5405_vm15, %v5297_v25 }
 0x5bb   :  { %5445 = vmatmul.mubr.bf16.vlgmr.msra.gmra.mxu1 %v5296_v62 }
 0x67b   :  { %v5446_v10 = vpop.f32.mrf.mxu1 }
 0x67c   :  { %v5447_v59 = vadd.f32 %v5928_v43, %v5446_v10 }
 0x67d   :  { %v5448_v29 = vpop.f32.mrf.mxu1 }
 0x67e   :  { %5453 = vst.msk [vmem:[#allocation6] sm:$0x3] %vm5452_vm0, %v5447_v59 }
 0x67f   :  { %v5449_v5 = vpop.f32.mrf.mxu1 }
 0x680   :  { %6831 = shalt.err (!%p6828_p4)
}
 0x681   :  { %5463 = dma.vmem_to_hbm [thread:$0]  %s5461_s5, 32, %s9337_s10, [#allocation7]   ;;  %v5450_v15 = vpop.f32.mrf.mxu1 }
 0x682   :  { %6840 = dma.done.wait [#allocation7], 32  }
 0x683   :  { %6841 = vsyncadd [#allocation7], 4294967264 }
 0x684   :  { %5467 = vsyncpa [#allocation7], 1 }

</bundles_post_ra>
